<compile_context>
chip_gen: v7x
topology: tpu7x:2x2x1
jax: 0.10.0
libtpu: 0.0.40
codegen_flags: <defaults>
</compile_context>

<pallas_src>
import functools

import jax
import jax.numpy as jnp
from jax import lax
from jax.experimental import pallas as pl
from jax.experimental.pallas import tpu as pltpu

H = W = 16            # spatial size of the example input
K1, K3 = 9, 5         # conv1 / conv3 kernel sizes
C1, C2 = 64, 32       # conv1 / conv2 output channels
P1, P3 = 4, 2         # conv1 / conv3 paddings
WP = W + 2 * P1       # 24, padded input width
K1_COLS = K1 * WP                         # 216 im2col lanes for conv1
K1_PAD = ((K1_COLS + 15) // 16) * 16      # 224: pad K to a bf16 sublane multiple
NSLAB3 = 4 + 2 * P3                       # 8 kh-slabs for the 4-row-grouped conv3
NGRP = H // 4                             # 4 row groups per image


def srcnn_kernel(x_ref, a1_ref, b1_ref, w2q_ref, b2_ref, c3_ref, b3_ref,
                 o_ref, y2s_ref):
    B = x_ref.shape[0]
    x = x_ref[...]                                                    # (B, 24, 24) f32

    # ---- conv1 (1->64, 9x9, pad 4) + ReLU : one bf16 MXU matmul -------------
    # Row-wise im2col: output row h needs padded-input rows h..h+8 (24 cols each).
    # An 8-lane zero slab pads K to 224 so the bf16 RHS has no ragged sublane tile.
    slabs1 = [x[:, kh:kh + H, :] for kh in range(K1)]
    slabs1.append(jnp.zeros((B, H, K1_PAD - K1_COLS), jnp.float32))
    lhs1 = jnp.concatenate(slabs1, axis=-1).reshape(B * H, K1_PAD)
    lhs1 = lhs1.astype(jnp.bfloat16)                                  # (B*H, 224)
    y1 = jnp.dot(lhs1, a1_ref[...], preferred_element_type=jnp.float32)
    y1 = jnp.maximum(y1 + b1_ref[...], 0.0)                           # (B*H, W*64) f32
    y1 = y1.astype(jnp.bfloat16)

    # ---- conv2 (64->32, 1x1) + ReLU : four tile-aligned quarter matmuls -----
    # Each 256-lane quarter (4 pixels x 64 ch) hits the SAME (256,128) block-diag RHS.
    w2q = w2q_ref[...]                                                # (256, 128) bf16
    QL = 4 * C1
    parts = [jnp.dot(y1[:, q * QL:(q + 1) * QL], w2q,
                     preferred_element_type=jnp.float32)
             for q in range(W // 4)]
    y2 = jnp.concatenate(parts, axis=-1)                              # (B*H, W*32), lane = w*32+c
    y2 = jnp.maximum(y2 + b2_ref[...], 0.0)                           # f32

    # ---- conv3 (32->1, 5x5, pad 2) + ReLU : one row-grouped MXU matmul ------
    # 4 output rows per LHS row -> LHS (4B, 4096), RHS (4096, 64).  The grouping is
    # done through a VMEM staging buffer: full-ref store, then per-row reads that are
    # concatenated at 512-lane (tile-aligned) offsets.  kh-padding rows come from a
    # register zero slab instead of scratch zero rows.
    y2s_ref[...] = y2.reshape(B, H, W * C2)                           # (B, 16, 512)
    zero_slab = jnp.zeros((B, W * C2), jnp.float32)
    rows = []
    for hg in range(NGRP):
        slabs3 = []
        for j in range(NSLAB3):
            p = 4 * hg + j - P3                                       # source y2 row (may be OOB)
            slabs3.append(y2s_ref[:, p, :] if 0 <= p < H else zero_slab)
        rows.append(jnp.concatenate(slabs3, axis=-1))                 # (B, 4096)
    lhs3 = jnp.concatenate(rows, axis=0).astype(jnp.bfloat16)         # (4B, 4096), row = hg*B + b
    y3 = jnp.dot(lhs3, c3_ref[...], preferred_element_type=jnp.float32)   # (4B, 64), col = r*16+w
    y3 = jnp.maximum(y3 + b3_ref[0, 0], 0.0)

    # Lane-dense output slab: row b, lane h*16 + w with h = 4*hg + r.
    o_ref[...] = jnp.concatenate(
        [y3[hg * B:(hg + 1) * B, :] for hg in range(NGRP)], axis=-1)  # (B, 256)


def _pack_weights(w1, b1, w2, b2, w3, b3):
    """Repack PyTorch OIHW conv weights into the banded/block bf16 matrices used above."""
    # conv1: A1[kh*24 + j, w*64 + c] = w1[c, 0, kh, j - w] if 0 <= j-w < 9 else 0.
    w1_hwio = jnp.transpose(w1[:, 0], (1, 2, 0))                      # (9, 9, 64) [kh, kw, c]
    j_idx = jnp.arange(WP)
    w_idx = jnp.arange(W)
    kw1 = j_idx[:, None] - w_idx[None, :]                             # (24, 16)
    valid1 = (kw1 >= 0) & (kw1 < K1)
    a1 = jnp.where(valid1[None, :, :, None],
                   w1_hwio[:, jnp.clip(kw1, 0, K1 - 1), :], 0.0)      # (9, 24, 16, 64)
    a1 = a1.reshape(K1_COLS, W * C1)
    a1 = jnp.pad(a1, ((0, K1_PAD - K1_COLS), (0, 0))).astype(jnp.bfloat16)   # (224, 1024)

    # conv2: shared 4-pixel block-diagonal RHS, (256, 128) bf16.
    w2_io = jnp.transpose(w2[:, :, 0, 0])                             # (64, 32) [c_in, c_out]
    w2q = jnp.kron(jnp.eye(4, dtype=w2.dtype), w2_io).astype(jnp.bfloat16)   # (256, 128)

    # conv3 (row-grouped): C3[j*512 + wp*32 + c, r*16 + w] = w3[0, c, j-r, wp-w+2]
    # when 0 <= j-r < 5 and 0 <= wp-w+2 < 5, else 0.
    w3_hwi = jnp.transpose(w3[0], (1, 2, 0))                          # (5, 5, 32) [kh, kw, c]
    kw3 = w_idx[:, None] - w_idx[None, :] + P3                        # (16, 16) [wp, w]
    valid3 = (kw3 >= 0) & (kw3 < K3)
    c3_pre = jnp.where(valid3[None, :, :, None],
                       w3_hwi[:, jnp.clip(kw3, 0, K3 - 1), :], 0.0)   # (5, 16, 16, 32) [kh,wp,w,c]
    c3_pre = jnp.transpose(c3_pre, (0, 1, 3, 2))                      # (5, 16, 32, 16) [kh,wp,c,w]
    j8 = jnp.arange(NSLAB3)
    r4 = jnp.arange(4)
    khg = j8[:, None] - r4[None, :]                                   # (8, 4)
    validg = (khg >= 0) & (khg < K3)
    g = c3_pre[jnp.clip(khg, 0, K3 - 1)]                              # (8, 4, 16, 32, 16) [j,r,wp,c,w]
    g = jnp.where(validg[:, :, None, None, None], g, 0.0)
    c3g = jnp.transpose(g, (0, 2, 3, 1, 4))                           # (j, wp, c, r, w)
    c3g = c3g.reshape(NSLAB3 * W * C2, 4 * W).astype(jnp.bfloat16)    # (4096, 64)

    b1_big = jnp.tile(b1, W).reshape(1, W * C1)                       # f32, lane w*64+c
    b2_big = jnp.tile(b2, W).reshape(1, W * C2)                       # f32, lane w*32+c
    b3_s = b3.reshape(1, 1)
    return a1, b1_big, w2q, b2_big, c3g, b3_s


@functools.partial(jax.jit, static_argnames=("block_b",))
def srcnn_pallas(x_nchw, w1, b1, w2, b2, w3, b3, *, block_b=8):
    """x_nchw: (N, 1, 16, 16) float32; weights in PyTorch OIHW layout."""
    assert block_b % 8 == 0
    N = x_nchw.shape[0]
    n_pad = (-N) % block_b
    np_ = N + n_pad
    # Zero-pad spatial dims by 4 (conv1 padding) and batch up to a block multiple.
    # Batch-padding rows compute ReLU(bias) garbage that is sliced off below -- harmless
    # by construction, do NOT "fix" it into an in-kernel mask.
    x_pad = jnp.pad(x_nchw[:, 0], ((0, n_pad), (P1, P1), (P1, P1)))   # (Np, 24, 24)

    a1, b1_big, w2q, b2_big, c3g, b3_s = _pack_weights(w1, b1, w2, b2, w3, b3)

    out = pl.pallas_call(
        srcnn_kernel,
        out_shape=jax.ShapeDtypeStruct((np_, H * W), jnp.float32),
        grid_spec=pltpu.PrefetchScalarGridSpec(
            num_scalar_prefetch=0,
            grid=(np_ // block_b,),
            in_specs=[
                pl.BlockSpec((block_b, WP, WP), lambda i: (i, 0, 0)),           # x
                pl.BlockSpec((K1_PAD, W * C1), lambda i: (0, 0)),               # conv1 banded (bf16)
                pl.BlockSpec((1, W * C1), lambda i: (0, 0)),                    # b1 (tiled, f32)
                pl.BlockSpec((4 * C1, 4 * C2), lambda i: (0, 0)),               # conv2 quarter RHS (bf16)
                pl.BlockSpec((1, W * C2), lambda i: (0, 0)),                    # b2 (tiled, f32)
                pl.BlockSpec((NSLAB3 * W * C2, 4 * W), lambda i: (0, 0)),       # conv3 grouped (bf16)
                pl.BlockSpec(memory_space=pltpu.MemorySpace.SMEM),              # b3 scalar
            ],
            out_specs=pl.BlockSpec((block_b, H * W), lambda i: (i, 0)),
            scratch_shapes=[pltpu.VMEM((block_b, H, W * C2), jnp.float32)],     # conv3 row staging
        ),
        compiler_params=pltpu.CompilerParams(
            # Keep >= 2 grid steps so ("parallel",) can shard across v7x's 2 TensorCores.
            dimension_semantics=("parallel",),
            # 32 MiB is v7x-safe (64 MiB physical) and ample for block_b <= 64;
            # raise to 64-96 MiB on v5e/v6e if pushing block_b higher.
            vmem_limit_bytes=32 * 1024 * 1024,
        ),
    )(x_pad, a1, b1_big, w2q, b2_big, c3g, b3_s)

    return out[:N].reshape(N, 1, H, W)                                # back to NCHW


def srcnn_ref(x, w1, b1, w2, b2, w3, b3):
    """Pure-JAX f32 reference (NCHW / OIHW), mirrors the PyTorch forward."""
    dn = ('NCHW', 'OIHW', 'NCHW')
    hp = lax.Precision.HIGHEST
    y = lax.conv_general_dilated(x, w1, (1, 1), [(P1, P1), (P1, P1)],
                                 dimension_numbers=dn, precision=hp)
    y = jnp.maximum(y + b1[None, :, None, None], 0.0)
    y = lax.conv_general_dilated(y, w2, (1, 1), [(0, 0), (0, 0)],
                                 dimension_numbers=dn, precision=hp)
    y = jnp.maximum(y + b2[None, :, None, None], 0.0)
    y = lax.conv_general_dilated(y, w3, (1, 1), [(P3, P3), (P3, P3)],
                                 dimension_numbers=dn, precision=hp)
    y = jnp.maximum(y + b3[None, :, None, None], 0.0)
    return y


if __name__ == "__main__":
    key = jax.random.PRNGKey(0)
    kx, kw1, kb1, kw2, kb2, kw3, kb3 = jax.random.split(key, 7)

    N = 16                       # 2 "parallel" grid steps x 8 images per step
    x = jax.random.normal(kx, (N, 1, H, W), jnp.float32)

    # The module initializes weights with std=1e-3 and zero bias; use larger random
    # weights/biases here so the check against the reference is numerically meaningful
    # (forward semantics are identical).
    w1 = 0.05 * jax.random.normal(kw1, (C1, 1, K1, K1), jnp.float32)
    b1 = 0.1 * jax.random.normal(kb1, (C1,), jnp.float32)
    w2 = 0.05 * jax.random.normal(kw2, (C2, C1, 1, 1), jnp.float32)
    b2 = 0.1 * jax.random.normal(kb2, (C2,), jnp.float32)
    w3 = 0.05 * jax.random.normal(kw3, (1, C2, K3, K3), jnp.float32)
    b3 = 0.1 * jax.random.normal(kb3, (1,), jnp.float32)

    out = jax.block_until_ready(srcnn_pallas(x, w1, b1, w2, b2, w3, b3, block_b=8))

    # The kernel uses bf16 MXU operands with f32 accumulation, so compare against an f32
    # reference whose weights/input are pre-rounded to bf16 (removes the dominant
    # quantization term; the residual is intermediate-activation rounding only).
    rt = lambda a: a.astype(jnp.bfloat16).astype(jnp.float32)
    ref = jax.block_until_ready(srcnn_ref(rt(x), rt(w1), b1, rt(w2), b2, rt(w3), b3))

    assert out.shape == (N, 1, H, W), out.shape
    err = float(jnp.max(jnp.abs(out - ref)))
    assert err < 2e-2, err
    print("KERNEL_OK")
</pallas_src>

<mosaic_0001>
module attributes {stable_mosaic.version = 11 : i64} {
  func.func @srcnn_kernel(%arg0: i32, %arg1: memref<8x24x24xf32, #tpu.memory_space<vmem>>, %arg2: memref<224x1024xbf16, #tpu.memory_space<vmem>>, %arg3: memref<1x1024xf32, #tpu.memory_space<vmem>>, %arg4: memref<256x128xbf16, #tpu.memory_space<vmem>>, %arg5: memref<1x512xf32, #tpu.memory_space<vmem>>, %arg6: memref<4096x64xbf16, #tpu.memory_space<vmem>>, %arg7: memref<1x1xf32, #tpu.memory_space<smem>>, %arg8: memref<8x256xf32, #tpu.memory_space<vmem>>, %arg9: memref<8x16x512xf32, #tpu.memory_space<vmem>>) attributes {dimension_semantics = [#tpu.dimension_semantics<parallel>], iteration_bounds = array<i64: 2>, scalar_prefetch = 0 : i64, scratch_operands = 1 : i64, tpu.core_type = #tpu.core_type<tc>, window_params = [{transform_indices = @transform_0, window_bounds = array<i64: 8, 24, 24>}, {pipeline_mode = #tpu.pipeline_mode<synchronous>, transform_indices = @transform_1, window_bounds = array<i64: 224, 1024>}, {pipeline_mode = #tpu.pipeline_mode<synchronous>, transform_indices = @transform_2, window_bounds = array<i64: 1, 1024>}, {pipeline_mode = #tpu.pipeline_mode<synchronous>, transform_indices = @transform_3, window_bounds = array<i64: 256, 128>}, {pipeline_mode = #tpu.pipeline_mode<synchronous>, transform_indices = @transform_4, window_bounds = array<i64: 1, 512>}, {pipeline_mode = #tpu.pipeline_mode<synchronous>, transform_indices = @transform_5, window_bounds = array<i64: 4096, 64>}, {transform_indices = @transform_6, window_bounds = array<i64: 1, 1>}, {transform_indices = @transform_7, window_bounds = array<i64: 8, 256>}]} {
    %c0 = arith.constant 0 : index
    %c0_0 = arith.constant 0 : index
    %c0_1 = arith.constant 0 : index
    %0 = vector.load %arg1[%c0, %c0_0, %c0_1] : memref<8x24x24xf32, #tpu.memory_space<vmem>>, vector<8x24x24xf32>
    %1 = vector.extract_strided_slice %0 {offsets = [0, 0, 0], sizes = [8, 16, 24], strides = [1, 1, 1]} : vector<8x24x24xf32> to vector<8x16x24xf32>
    %2 = vector.extract_strided_slice %0 {offsets = [0, 1, 0], sizes = [8, 16, 24], strides = [1, 1, 1]} : vector<8x24x24xf32> to vector<8x16x24xf32>
    %3 = vector.extract_strided_slice %0 {offsets = [0, 2, 0], sizes = [8, 16, 24], strides = [1, 1, 1]} : vector<8x24x24xf32> to vector<8x16x24xf32>
    %4 = vector.extract_strided_slice %0 {offsets = [0, 3, 0], sizes = [8, 16, 24], strides = [1, 1, 1]} : vector<8x24x24xf32> to vector<8x16x24xf32>
    %5 = vector.extract_strided_slice %0 {offsets = [0, 4, 0], sizes = [8, 16, 24], strides = [1, 1, 1]} : vector<8x24x24xf32> to vector<8x16x24xf32>
    %6 = vector.extract_strided_slice %0 {offsets = [0, 5, 0], sizes = [8, 16, 24], strides = [1, 1, 1]} : vector<8x24x24xf32> to vector<8x16x24xf32>
    %7 = vector.extract_strided_slice %0 {offsets = [0, 6, 0], sizes = [8, 16, 24], strides = [1, 1, 1]} : vector<8x24x24xf32> to vector<8x16x24xf32>
    %8 = vector.extract_strided_slice %0 {offsets = [0, 7, 0], sizes = [8, 16, 24], strides = [1, 1, 1]} : vector<8x24x24xf32> to vector<8x16x24xf32>
    %9 = vector.extract_strided_slice %0 {offsets = [0, 8, 0], sizes = [8, 16, 24], strides = [1, 1, 1]} : vector<8x24x24xf32> to vector<8x16x24xf32>
    %cst = arith.constant 0.000000e+00 : f32
    %10 = vector.broadcast %cst : f32 to vector<8x16x8xf32>
    %11 = tpu.concatenate %1, %2, %3, %4, %5, %6, %7, %8, %9, %10 in 2 : vector<8x16x24xf32>, vector<8x16x24xf32>, vector<8x16x24xf32>, vector<8x16x24xf32>, vector<8x16x24xf32>, vector<8x16x24xf32>, vector<8x16x24xf32>, vector<8x16x24xf32>, vector<8x16x24xf32>, vector<8x16x8xf32> -> vector<8x16x224xf32>
    %12 = vector.shape_cast %11 : vector<8x16x224xf32> to vector<128x224xf32>
    %13 = arith.truncf %12 : vector<128x224xf32> to vector<128x224xbf16>
    %c0_2 = arith.constant 0 : index
    %c0_3 = arith.constant 0 : index
    %14 = vector.load %arg2[%c0_2, %c0_3] : memref<224x1024xbf16, #tpu.memory_space<vmem>>, vector<224x1024xbf16>
    %cst_4 = arith.constant dense<0.000000e+00> : vector<128x1024xf32>
    %15 = tpu.matmul %13, %14, %cst_4 {dimension_numbers = #tpu.dot_dimension_numbers<[1], [0], [0], [1], [0, 0, 1, 1], [], []>} : vector<128x224xbf16>, vector<224x1024xbf16>, vector<128x1024xf32> -> vector<128x1024xf32>
    %c0_5 = arith.constant 0 : index
    %c0_6 = arith.constant 0 : index
    %16 = vector.load %arg3[%c0_5, %c0_6] : memref<1x1024xf32, #tpu.memory_space<vmem>>, vector<1x1024xf32>
    %17 = vector.broadcast %16 : vector<1x1024xf32> to vector<128x1024xf32>
    %18 = arith.addf %15, %17 : vector<128x1024xf32>
    %cst_7 = arith.constant 0.000000e+00 : f32
    %19 = vector.broadcast %cst_7 : f32 to vector<128x1024xf32>
    %20 = arith.maximumf %18, %19 : vector<128x1024xf32>
    %21 = arith.truncf %20 : vector<128x1024xf32> to vector<128x1024xbf16>
    %c0_8 = arith.constant 0 : index
    %c0_9 = arith.constant 0 : index
    %22 = vector.load %arg4[%c0_8, %c0_9] : memref<256x128xbf16, #tpu.memory_space<vmem>>, vector<256x128xbf16>
    %23 = vector.extract_strided_slice %21 {offsets = [0, 0], sizes = [128, 256], strides = [1, 1]} : vector<128x1024xbf16> to vector<128x256xbf16>
    %cst_10 = arith.constant dense<0.000000e+00> : vector<128x128xf32>
    %24 = tpu.matmul %23, %22, %cst_10 {dimension_numbers = #tpu.dot_dimension_numbers<[1], [0], [0], [1], [0, 0, 1, 1], [], []>} : vector<128x256xbf16>, vector<256x128xbf16>, vector<128x128xf32> -> vector<128x128xf32>
    %25 = vector.extract_strided_slice %21 {offsets = [0, 256], sizes = [128, 256], strides = [1, 1]} : vector<128x1024xbf16> to vector<128x256xbf16>
    %cst_11 = arith.constant dense<0.000000e+00> : vector<128x128xf32>
    %26 = tpu.matmul %25, %22, %cst_11 {dimension_numbers = #tpu.dot_dimension_numbers<[1], [0], [0], [1], [0, 0, 1, 1], [], []>} : vector<128x256xbf16>, vector<256x128xbf16>, vector<128x128xf32> -> vector<128x128xf32>
    %27 = vector.extract_strided_slice %21 {offsets = [0, 512], sizes = [128, 256], strides = [1, 1]} : vector<128x1024xbf16> to vector<128x256xbf16>
    %cst_12 = arith.constant dense<0.000000e+00> : vector<128x128xf32>
    %28 = tpu.matmul %27, %22, %cst_12 {dimension_numbers = #tpu.dot_dimension_numbers<[1], [0], [0], [1], [0, 0, 1, 1], [], []>} : vector<128x256xbf16>, vector<256x128xbf16>, vector<128x128xf32> -> vector<128x128xf32>
    %29 = vector.extract_strided_slice %21 {offsets = [0, 768], sizes = [128, 256], strides = [1, 1]} : vector<128x1024xbf16> to vector<128x256xbf16>
    %cst_13 = arith.constant dense<0.000000e+00> : vector<128x128xf32>
    %30 = tpu.matmul %29, %22, %cst_13 {dimension_numbers = #tpu.dot_dimension_numbers<[1], [0], [0], [1], [0, 0, 1, 1], [], []>} : vector<128x256xbf16>, vector<256x128xbf16>, vector<128x128xf32> -> vector<128x128xf32>
    %31 = tpu.concatenate %24, %26, %28, %30 in 1 : vector<128x128xf32>, vector<128x128xf32>, vector<128x128xf32>, vector<128x128xf32> -> vector<128x512xf32>
    %c0_14 = arith.constant 0 : index
    %c0_15 = arith.constant 0 : index
    %32 = vector.load %arg5[%c0_14, %c0_15] : memref<1x512xf32, #tpu.memory_space<vmem>>, vector<1x512xf32>
    %33 = vector.broadcast %32 : vector<1x512xf32> to vector<128x512xf32>
    %34 = arith.addf %31, %33 : vector<128x512xf32>
    %cst_16 = arith.constant 0.000000e+00 : f32
    %35 = vector.broadcast %cst_16 : f32 to vector<128x512xf32>
    %36 = arith.maximumf %34, %35 : vector<128x512xf32>
    %37 = vector.shape_cast %36 : vector<128x512xf32> to vector<8x16x512xf32>
    %c0_17 = arith.constant 0 : index
    %c0_18 = arith.constant 0 : index
    %c0_19 = arith.constant 0 : index
    %38 = vector.load %arg9[%c0_17, %c0_18, %c0_19] : memref<8x16x512xf32, #tpu.memory_space<vmem>>, vector<8x16x512xf32>
    tpu.vector_store %arg9[%c0_17, %c0_18, %c0_19], %37 {strides = array<i32>} : memref<8x16x512xf32, #tpu.memory_space<vmem>>, vector<8x16x512xf32>,
    %cst_20 = arith.constant 0.000000e+00 : f32
    %39 = vector.broadcast %cst_20 : f32 to vector<8x512xf32>
    %c0_21 = arith.constant 0 : index
    %c0_22 = arith.constant 0 : index
    %c0_23 = arith.constant 0 : index
    %40 = vector.load %arg9[%c0_21, %c0_22, %c0_23] : memref<8x16x512xf32, #tpu.memory_space<vmem>>, vector<8x1x512xf32>
    %41 = vector.shape_cast %40 : vector<8x1x512xf32> to vector<8x512xf32>
    %c0_24 = arith.constant 0 : index
    %c1 = arith.constant 1 : index
    %c0_25 = arith.constant 0 : index
    %42 = vector.load %arg9[%c0_24, %c1, %c0_25] : memref<8x16x512xf32, #tpu.memory_space<vmem>>, vector<8x1x512xf32>
    %43 = vector.shape_cast %42 : vector<8x1x512xf32> to vector<8x512xf32>
    %c0_26 = arith.constant 0 : index
    %c2 = arith.constant 2 : index
    %c0_27 = arith.constant 0 : index
    %44 = vector.load %arg9[%c0_26, %c2, %c0_27] : memref<8x16x512xf32, #tpu.memory_space<vmem>>, vector<8x1x512xf32>
    %45 = vector.shape_cast %44 : vector<8x1x512xf32> to vector<8x512xf32>
    %c0_28 = arith.constant 0 : index
    %c3 = arith.constant 3 : index
    %c0_29 = arith.constant 0 : index
    %46 = vector.load %arg9[%c0_28, %c3, %c0_29] : memref<8x16x512xf32, #tpu.memory_space<vmem>>, vector<8x1x512xf32>
    %47 = vector.shape_cast %46 : vector<8x1x512xf32> to vector<8x512xf32>
    %c0_30 = arith.constant 0 : index
    %c4 = arith.constant 4 : index
    %c0_31 = arith.constant 0 : index
    %48 = vector.load %arg9[%c0_30, %c4, %c0_31] : memref<8x16x512xf32, #tpu.memory_space<vmem>>, vector<8x1x512xf32>
    %49 = vector.shape_cast %48 : vector<8x1x512xf32> to vector<8x512xf32>
    %c0_32 = arith.constant 0 : index
    %c5 = arith.constant 5 : index
    %c0_33 = arith.constant 0 : index
    %50 = vector.load %arg9[%c0_32, %c5, %c0_33] : memref<8x16x512xf32, #tpu.memory_space<vmem>>, vector<8x1x512xf32>
    %51 = vector.shape_cast %50 : vector<8x1x512xf32> to vector<8x512xf32>
    %52 = tpu.concatenate %39, %39, %41, %43, %45, %47, %49, %51 in 1 : vector<8x512xf32>, vector<8x512xf32>, vector<8x512xf32>, vector<8x512xf32>, vector<8x512xf32>, vector<8x512xf32>, vector<8x512xf32>, vector<8x512xf32> -> vector<8x4096xf32>
    %c0_34 = arith.constant 0 : index
    %c2_35 = arith.constant 2 : index
    %c0_36 = arith.constant 0 : index
    %53 = vector.load %arg9[%c0_34, %c2_35, %c0_36] : memref<8x16x512xf32, #tpu.memory_space<vmem>>, vector<8x1x512xf32>
    %54 = vector.shape_cast %53 : vector<8x1x512xf32> to vector<8x512xf32>
    %c0_37 = arith.constant 0 : index
    %c3_38 = arith.constant 3 : index
    %c0_39 = arith.constant 0 : index
    %55 = vector.load %arg9[%c0_37, %c3_38, %c0_39] : memref<8x16x512xf32, #tpu.memory_space<vmem>>, vector<8x1x512xf32>
    %56 = vector.shape_cast %55 : vector<8x1x512xf32> to vector<8x512xf32>
    %c0_40 = arith.constant 0 : index
    %c4_41 = arith.constant 4 : index
    %c0_42 = arith.constant 0 : index
    %57 = vector.load %arg9[%c0_40, %c4_41, %c0_42] : memref<8x16x512xf32, #tpu.memory_space<vmem>>, vector<8x1x512xf32>
    %58 = vector.shape_cast %57 : vector<8x1x512xf32> to vector<8x512xf32>
    %c0_43 = arith.constant 0 : index
    %c5_44 = arith.constant 5 : index
    %c0_45 = arith.constant 0 : index
    %59 = vector.load %arg9[%c0_43, %c5_44, %c0_45] : memref<8x16x512xf32, #tpu.memory_space<vmem>>, vector<8x1x512xf32>
    %60 = vector.shape_cast %59 : vector<8x1x512xf32> to vector<8x512xf32>
    %c0_46 = arith.constant 0 : index
    %c6 = arith.constant 6 : index
    %c0_47 = arith.constant 0 : index
    %61 = vector.load %arg9[%c0_46, %c6, %c0_47] : memref<8x16x512xf32, #tpu.memory_space<vmem>>, vector<8x1x512xf32>
    %62 = vector.shape_cast %61 : vector<8x1x512xf32> to vector<8x512xf32>
    %c0_48 = arith.constant 0 : index
    %c7 = arith.constant 7 : index
    %c0_49 = arith.constant 0 : index
    %63 = vector.load %arg9[%c0_48, %c7, %c0_49] : memref<8x16x512xf32, #tpu.memory_space<vmem>>, vector<8x1x512xf32>
    %64 = vector.shape_cast %63 : vector<8x1x512xf32> to vector<8x512xf32>
    %c0_50 = arith.constant 0 : index
    %c8 = arith.constant 8 : index
    %c0_51 = arith.constant 0 : index
    %65 = vector.load %arg9[%c0_50, %c8, %c0_51] : memref<8x16x512xf32, #tpu.memory_space<vmem>>, vector<8x1x512xf32>
    %66 = vector.shape_cast %65 : vector<8x1x512xf32> to vector<8x512xf32>
    %c0_52 = arith.constant 0 : index
    %c9 = arith.constant 9 : index
    %c0_53 = arith.constant 0 : index
    %67 = vector.load %arg9[%c0_52, %c9, %c0_53] : memref<8x16x512xf32, #tpu.memory_space<vmem>>, vector<8x1x512xf32>
    %68 = vector.shape_cast %67 : vector<8x1x512xf32> to vector<8x512xf32>
    %69 = tpu.concatenate %54, %56, %58, %60, %62, %64, %66, %68 in 1 : vector<8x512xf32>, vector<8x512xf32>, vector<8x512xf32>, vector<8x512xf32>, vector<8x512xf32>, vector<8x512xf32>, vector<8x512xf32>, vector<8x512xf32> -> vector<8x4096xf32>
    %c0_54 = arith.constant 0 : index
    %c6_55 = arith.constant 6 : index
    %c0_56 = arith.constant 0 : index
    %70 = vector.load %arg9[%c0_54, %c6_55, %c0_56] : memref<8x16x512xf32, #tpu.memory_space<vmem>>, vector<8x1x512xf32>
    %71 = vector.shape_cast %70 : vector<8x1x512xf32> to vector<8x512xf32>
    %c0_57 = arith.constant 0 : index
    %c7_58 = arith.constant 7 : index
    %c0_59 = arith.constant 0 : index
    %72 = vector.load %arg9[%c0_57, %c7_58, %c0_59] : memref<8x16x512xf32, #tpu.memory_space<vmem>>, vector<8x1x512xf32>
    %73 = vector.shape_cast %72 : vector<8x1x512xf32> to vector<8x512xf32>
    %c0_60 = arith.constant 0 : index
    %c8_61 = arith.constant 8 : index
    %c0_62 = arith.constant 0 : index
    %74 = vector.load %arg9[%c0_60, %c8_61, %c0_62] : memref<8x16x512xf32, #tpu.memory_space<vmem>>, vector<8x1x512xf32>
    %75 = vector.shape_cast %74 : vector<8x1x512xf32> to vector<8x512xf32>
    %c0_63 = arith.constant 0 : index
    %c9_64 = arith.constant 9 : index
    %c0_65 = arith.constant 0 : index
    %76 = vector.load %arg9[%c0_63, %c9_64, %c0_65] : memref<8x16x512xf32, #tpu.memory_space<vmem>>, vector<8x1x512xf32>
    %77 = vector.shape_cast %76 : vector<8x1x512xf32> to vector<8x512xf32>
    %c0_66 = arith.constant 0 : index
    %c10 = arith.constant 10 : index
    %c0_67 = arith.constant 0 : index
    %78 = vector.load %arg9[%c0_66, %c10, %c0_67] : memref<8x16x512xf32, #tpu.memory_space<vmem>>, vector<8x1x512xf32>
    %79 = vector.shape_cast %78 : vector<8x1x512xf32> to vector<8x512xf32>
    %c0_68 = arith.constant 0 : index
    %c11 = arith.constant 11 : index
    %c0_69 = arith.constant 0 : index
    %80 = vector.load %arg9[%c0_68, %c11, %c0_69] : memref<8x16x512xf32, #tpu.memory_space<vmem>>, vector<8x1x512xf32>
    %81 = vector.shape_cast %80 : vector<8x1x512xf32> to vector<8x512xf32>
    %c0_70 = arith.constant 0 : index
    %c12 = arith.constant 12 : index
    %c0_71 = arith.constant 0 : index
    %82 = vector.load %arg9[%c0_70, %c12, %c0_71] : memref<8x16x512xf32, #tpu.memory_space<vmem>>, vector<8x1x512xf32>
    %83 = vector.shape_cast %82 : vector<8x1x512xf32> to vector<8x512xf32>
    %c0_72 = arith.constant 0 : index
    %c13 = arith.constant 13 : index
    %c0_73 = arith.constant 0 : index
    %84 = vector.load %arg9[%c0_72, %c13, %c0_73] : memref<8x16x512xf32, #tpu.memory_space<vmem>>, vector<8x1x512xf32>
    %85 = vector.shape_cast %84 : vector<8x1x512xf32> to vector<8x512xf32>
    %86 = tpu.concatenate %71, %73, %75, %77, %79, %81, %83, %85 in 1 : vector<8x512xf32>, vector<8x512xf32>, vector<8x512xf32>, vector<8x512xf32>, vector<8x512xf32>, vector<8x512xf32>, vector<8x512xf32>, vector<8x512xf32> -> vector<8x4096xf32>
    %c0_74 = arith.constant 0 : index
    %c10_75 = arith.constant 10 : index
    %c0_76 = arith.constant 0 : index
    %87 = vector.load %arg9[%c0_74, %c10_75, %c0_76] : memref<8x16x512xf32, #tpu.memory_space<vmem>>, vector<8x1x512xf32>
    %88 = vector.shape_cast %87 : vector<8x1x512xf32> to vector<8x512xf32>
    %c0_77 = arith.constant 0 : index
    %c11_78 = arith.constant 11 : index
    %c0_79 = arith.constant 0 : index
    %89 = vector.load %arg9[%c0_77, %c11_78, %c0_79] : memref<8x16x512xf32, #tpu.memory_space<vmem>>, vector<8x1x512xf32>
    %90 = vector.shape_cast %89 : vector<8x1x512xf32> to vector<8x512xf32>
    %c0_80 = arith.constant 0 : index
    %c12_81 = arith.constant 12 : index
    %c0_82 = arith.constant 0 : index
    %91 = vector.load %arg9[%c0_80, %c12_81, %c0_82] : memref<8x16x512xf32, #tpu.memory_space<vmem>>, vector<8x1x512xf32>
    %92 = vector.shape_cast %91 : vector<8x1x512xf32> to vector<8x512xf32>
    %c0_83 = arith.constant 0 : index
    %c13_84 = arith.constant 13 : index
    %c0_85 = arith.constant 0 : index
    %93 = vector.load %arg9[%c0_83, %c13_84, %c0_85] : memref<8x16x512xf32, #tpu.memory_space<vmem>>, vector<8x1x512xf32>
    %94 = vector.shape_cast %93 : vector<8x1x512xf32> to vector<8x512xf32>
    %c0_86 = arith.constant 0 : index
    %c14 = arith.constant 14 : index
    %c0_87 = arith.constant 0 : index
    %95 = vector.load %arg9[%c0_86, %c14, %c0_87] : memref<8x16x512xf32, #tpu.memory_space<vmem>>, vector<8x1x512xf32>
    %96 = vector.shape_cast %95 : vector<8x1x512xf32> to vector<8x512xf32>
    %c0_88 = arith.constant 0 : index
    %c15 = arith.constant 15 : index
    %c0_89 = arith.constant 0 : index
    %97 = vector.load %arg9[%c0_88, %c15, %c0_89] : memref<8x16x512xf32, #tpu.memory_space<vmem>>, vector<8x1x512xf32>
    %98 = vector.shape_cast %97 : vector<8x1x512xf32> to vector<8x512xf32>
    %99 = tpu.concatenate %88, %90, %92, %94, %96, %98, %39, %39 in 1 : vector<8x512xf32>, vector<8x512xf32>, vector<8x512xf32>, vector<8x512xf32>, vector<8x512xf32>, vector<8x512xf32>, vector<8x512xf32>, vector<8x512xf32> -> vector<8x4096xf32>
    %100 = tpu.concatenate %52, %69, %86, %99 in 0 : vector<8x4096xf32>, vector<8x4096xf32>, vector<8x4096xf32>, vector<8x4096xf32> -> vector<32x4096xf32>
    %101 = arith.truncf %100 : vector<32x4096xf32> to vector<32x4096xbf16>
    %c0_90 = arith.constant 0 : index
    %c0_91 = arith.constant 0 : index
    %102 = vector.load %arg6[%c0_90, %c0_91] : memref<4096x64xbf16, #tpu.memory_space<vmem>>, vector<4096x64xbf16>
    %cst_92 = arith.constant dense<0.000000e+00> : vector<32x64xf32>
    %103 = tpu.matmul %101, %102, %cst_92 {dimension_numbers = #tpu.dot_dimension_numbers<[1], [0], [0], [1], [0, 0, 1, 1], [], []>} : vector<32x4096xbf16>, vector<4096x64xbf16>, vector<32x64xf32> -> vector<32x64xf32>
    %c0_93 = arith.constant 0 : index
    %c0_94 = arith.constant 0 : index
    %104 = memref.load %arg7[%c0_93, %c0_94] : memref<1x1xf32, #tpu.memory_space<smem>>
    %105 = vector.broadcast %104 : f32 to vector<32x64xf32>
    %106 = arith.addf %103, %105 : vector<32x64xf32>
    %cst_95 = arith.constant 0.000000e+00 : f32
    %107 = vector.broadcast %cst_95 : f32 to vector<32x64xf32>
    %108 = arith.maximumf %106, %107 : vector<32x64xf32>
    %109 = vector.extract_strided_slice %108 {offsets = [0, 0], sizes = [8, 64], strides = [1, 1]} : vector<32x64xf32> to vector<8x64xf32>
    %110 = vector.extract_strided_slice %108 {offsets = [8, 0], sizes = [8, 64], strides = [1, 1]} : vector<32x64xf32> to vector<8x64xf32>
    %111 = vector.extract_strided_slice %108 {offsets = [16, 0], sizes = [8, 64], strides = [1, 1]} : vector<32x64xf32> to vector<8x64xf32>
    %112 = vector.extract_strided_slice %108 {offsets = [24, 0], sizes = [8, 64], strides = [1, 1]} : vector<32x64xf32> to vector<8x64xf32>
    %113 = tpu.concatenate %109, %110, %111, %112 in 1 : vector<8x64xf32>, vector<8x64xf32>, vector<8x64xf32>, vector<8x64xf32> -> vector<8x256xf32>
    %c0_96 = arith.constant 0 : index
    %c0_97 = arith.constant 0 : index
    %114 = vector.load %arg8[%c0_96, %c0_97] : memref<8x256xf32, #tpu.memory_space<vmem>>, vector<8x256xf32>
    tpu.vector_store %arg8[%c0_96, %c0_97], %113 {strides = array<i32>} : memref<8x256xf32, #tpu.memory_space<vmem>>, vector<8x256xf32>,
    return
  }
  func.func @transform_0(%arg0: i32) -> (i32, i32, i32) {
    %c0_i32 = arith.constant 0 : i32
    %c0_i32_0 = arith.constant 0 : i32
    %c0_i32_1 = arith.constant 0 : i32
    return %arg0, %c0_i32, %c0_i32_0 : i32, i32, i32
  }
  func.func @transform_1(%arg0: i32) -> (i32, i32) {
    %c0_i32 = arith.constant 0 : i32
    %c0_i32_0 = arith.constant 0 : i32
    %c0_i32_1 = arith.constant 0 : i32
    return %c0_i32, %c0_i32_0 : i32, i32
  }
  func.func @transform_2(%arg0: i32) -> (i32, i32) {
    %c0_i32 = arith.constant 0 : i32
    %c0_i32_0 = arith.constant 0 : i32
    %c0_i32_1 = arith.constant 0 : i32
    return %c0_i32, %c0_i32_0 : i32, i32
  }
  func.func @transform_3(%arg0: i32) -> (i32, i32) {
    %c0_i32 = arith.constant 0 : i32
    %c0_i32_0 = arith.constant 0 : i32
    %c0_i32_1 = arith.constant 0 : i32
    return %c0_i32, %c0_i32_0 : i32, i32
  }
  func.func @transform_4(%arg0: i32) -> (i32, i32) {
    %c0_i32 = arith.constant 0 : i32
    %c0_i32_0 = arith.constant 0 : i32
    %c0_i32_1 = arith.constant 0 : i32
    return %c0_i32, %c0_i32_0 : i32, i32
  }
  func.func @transform_5(%arg0: i32) -> (i32, i32) {
    %c0_i32 = arith.constant 0 : i32
    %c0_i32_0 = arith.constant 0 : i32
    %c0_i32_1 = arith.constant 0 : i32
    return %c0_i32, %c0_i32_0 : i32, i32
  }
  func.func @transform_6(%arg0: i32) -> (i32, i32) {
    %c0_i32 = arith.constant 0 : i32
    %c0_i32_0 = arith.constant 0 : i32
    %c0_i32_1 = arith.constant 0 : i32
    return %c0_i32, %c0_i32_0 : i32, i32
  }
  func.func @transform_7(%arg0: i32) -> (i32, i32) {
    %c0_i32 = arith.constant 0 : i32
    %c0_i32_0 = arith.constant 0 : i32
    return %arg0, %c0_i32 : i32, i32
  }
}

</mosaic_0001>

<bundles_post_ra>
// kernel: tile.13
= control target key start
LH: loop header
LB: loop body
LE: loop exit
PB: predicated region body
PF: predicated region fallthrough
CT: control target
= control target key end

     0   :  { %s28_s0 = inlined_call_operand.vmem [shape: f32[64], index: 0, kind: input, shape index: {}]   ;;  %s29_s1 = inlined_call_operand.vmem [shape: f32[16,64], index: 1, kind: output, shape index: {}]  }
   0x1   :  { %v4_v0 = vld [vmem:[%s28_s0] ss:$0 sm:$0xff] }
   0x2   :  { %5 = vst [vmem:[%s29_s1] sm:$0xff] %v4_v0  ;;  %8 = vst [vmem:[%s29_s1 + $0x8] sm:$0xff] %v4_v0 }

// kernel: tile.14
= control target key start
LH: loop header
LB: loop body
LE: loop exit
PB: predicated region body
PF: predicated region fallthrough
CT: control target
= control target key end

     0   :  { %vm3_vm0 = vcmask 523264   ;;  %vm10_vm1 = vcmask 1048064   ;;  %s116_s0 = inlined_call_operand.vmem [shape: f32[16,64], index: 0, kind: input, shape index: {}]   ;;  %s117_s1 = inlined_call_operand.vmem [shape: f32[1,1024], index: 1, kind: output, shape index: {}]  }
   0x1   :  { %v66_v0 = vld [vmem:[%s116_s0 + $0x1] ss:$2 sm:$0xff]   ;;  %v2_v1 = vld [vmem:[%s116_s0] ss:$2 sm:$0xff]   ;;  %s75_s0 = smov 64  }
   0x2   :  { %8 = vrot.lane.b32.xlu0 %v66_v0, %s75_s0  ;;  %4 = vst.msk [vmem:[#allocation0] ss:$8 sm:$0xf] %vm3_vm0, %v2_v1   ;;  %5 = vst.msk [vmem:[#allocation0] ss:$8 sm:$0xf0] %vm3_vm0, %v2_v1  }
  0x74   :  { %v9_v2 = vpop.permute.xlu0 %8  }
  0x75   :  { %11 = vst.msk [vmem:[#allocation0] ss:$8 sm:$0xf] %vm10_vm1, %v9_v2   ;;  %12 = vst.msk [vmem:[#allocation0] ss:$8 sm:$0xf0] %vm10_vm1, %v9_v2  }
  0x7c   :  { %v16_v3 = vld [vmem:[#allocation0] sm:$0x1]  ;;  %v20_v4 = vld [vmem:[#allocation0 + $0x8] sm:$0x1]  ;;  %v25_v5 = vld [vmem:[#allocation0 + $0x10] sm:$0x1] }
  0x7d   :  { %18 = vst [vmem:[%s117_s1] sm:$0x1] %v16_v3  ;;  %67 = vst [vmem:[%s117_s1 + $0x1] sm:$0x1] %v20_v4  ;;  %v31_v6 = vld [vmem:[#allocation0 + $0x18] sm:$0x1] }
  0x7e   :  { %68 = vst [vmem:[%s117_s1 + $0x2] sm:$0x1] %v25_v5  ;;  %v37_v7 = vld [vmem:[#allocation0 + $0x20] sm:$0x1]  ;;  %v43_v8 = vld [vmem:[#allocation0 + $0x28] sm:$0x1] }
  0x7f   :  { %69 = vst [vmem:[%s117_s1 + $0x3] sm:$0x1] %v31_v6  ;;  %70 = vst [vmem:[%s117_s1 + $0x4] sm:$0x1] %v37_v7  ;;  %v49_v9 = vld [vmem:[#allocation0 + $0x30] sm:$0x1] }
  0x80   :  { %71 = vst [vmem:[%s117_s1 + $0x5] sm:$0x1] %v43_v8  ;;  %v55_v10 = vld [vmem:[#allocation0 + $0x38] sm:$0x1]  ;;  %72 = vst [vmem:[%s117_s1 + $0x6] sm:$0x1] %v49_v9 }
  0x81   :  { %73 = vst [vmem:[%s117_s1 + $0x7] sm:$0x1] %v55_v10 }

// kernel: tile.18
= control target key start
LH: loop header
LB: loop body
LE: loop exit
PB: predicated region body
PF: predicated region fallthrough
CT: control target
= control target key end

     0   :  { %s28_s0 = inlined_call_operand.vmem [shape: f32[32], index: 0, kind: input, shape index: {}]   ;;  %s29_s1 = inlined_call_operand.vmem [shape: f32[16,32], index: 1, kind: output, shape index: {}]  }
   0x1   :  { %v4_v0 = vld [vmem:[%s28_s0] ss:$0 sm:$0xff] }
   0x2   :  { %5 = vst [vmem:[%s29_s1] sm:$0xff] %v4_v0  ;;  %8 = vst [vmem:[%s29_s1 + $0x8] sm:$0xff] %v4_v0 }

// kernel: tile.19
= control target key start
LH: loop header
LB: loop body
LE: loop exit
PB: predicated region body
PF: predicated region fallthrough
CT: control target
= control target key end

     0   :  { %s57_s8 = smov 96   ;;  %vm3_vm0 = vcmask 261120   ;;  %s59_s15 = smov 64   ;;  %vm9_vm1 = vcmask 1048320   ;;  %vm15_vm2 = vcmask 785920   ;;  %vm21_vm3 = vcmask 523520   ;;  %s94_s0 = inlined_call_operand.vmem [shape: f32[16,32], index: 0, kind: input, shape index: {}]   ;;  %s95_s1 = inlined_call_operand.vmem [shape: f32[1,512], index: 1, kind: output, shape index: {}]  }
   0x1   :  { %v48_v0 = vld [vmem:[%s94_s0 + $0x3] ss:$4 sm:$0xf]   ;;  %v49_v1 = vld [vmem:[%s94_s0 + $0x2] ss:$4 sm:$0xf]  }
   0x2   :  { %7 = vrot.lane.b32.xlu0 %v48_v0, %s57_s8  ;;  %v50_v2 = vld [vmem:[%s94_s0 + $0x1] ss:$4 sm:$0xf]   ;;  %v2_v3 = vld [vmem:[%s94_s0] ss:$4 sm:$0xf]  }
   0x3   :  { %s58_s0 = smov 32   ;;  %4 = vst.msk [vmem:[#allocation0] ss:$8 sm:$0xf] %vm3_vm0, %v2_v3  }
   0x4   :  { %19 = vrot.lane.b32.xlu1 %v50_v2, %s58_s0 }
   0x6   :  { %13 = vrot.lane.b32.xlu0 %v49_v1, %s59_s15 }
  0x74   :  { %v8_v4 = vpop.permute.xlu0 %7  }
  0x75   :  { %10 = vst.msk [vmem:[#allocation0] ss:$8 sm:$0xf] %vm9_vm1, %v8_v4  }
  0x76   :  { %v20_v5 = vpop.permute.xlu1 %19  }
  0x78   :  { %v14_v6 = vpop.permute.xlu0 %13  }
  0x79   :  { %16 = vst.msk [vmem:[#allocation0] ss:$8 sm:$0xf] %vm15_vm2, %v14_v6  }
  0x7a   :  { %22 = vst.msk [vmem:[#allocation0] ss:$8 sm:$0xf] %vm21_vm3, %v20_v5  }
  0x81   :  { %v26_v7 = vld [vmem:[#allocation0] sm:$0x1]  ;;  %v30_v8 = vld [vmem:[#allocation0 + $0x8] sm:$0x1]  ;;  %v35_v9 = vld [vmem:[#allocation0 + $0x10] sm:$0x1] }
  0x82   :  { %28 = vst [vmem:[%s95_s1] sm:$0x1] %v26_v7  ;;  %51 = vst [vmem:[%s95_s1 + $0x1] sm:$0x1] %v30_v8  ;;  %v41_v10 = vld [vmem:[#allocation0 + $0x18] sm:$0x1] }
  0x83   :  { %52 = vst [vmem:[%s95_s1 + $0x2] sm:$0x1] %v35_v9  ;;  %53 = vst [vmem:[%s95_s1 + $0x3] sm:$0x1] %v41_v10 }

// kernel: srcnn_pallas.1
= control target key start
LH: loop header
LB: loop body
LE: loop exit
PB: predicated region body
PF: predicated region fallthrough
CT: control target
= control target key end

     0   :  { %s9610_s26 = smov 0   ;;  %s12861_s0 = inlined_call_operand.vmem [shape: f32[16,24,24], index: 0, kind: input, shape index: {}]   ;;  %s12862_s1 = inlined_call_operand.vmem [shape: bf16[224,1024], index: 1, kind: input, shape index: {}]   ;;  %s12863_s2 = inlined_call_operand.vmem [shape: f32[1,1024], index: 2, kind: input, shape index: {}]   ;;  %s12864_s3 = inlined_call_operand.vmem [shape: bf16[256,128], index: 3, kind: input, shape index: {}]   ;;  %s12865_s4 = inlined_call_operand.vmem [shape: f32[1,512], index: 4, kind: input, shape index: {}]   ;;  %s12866_s5 = inlined_call_operand.vmem [shape: bf16[4096,64], index: 5, kind: input, shape index: {}]   ;;  %s12867_s6 = inlined_call_operand.<no memory space> [shape: f32[1,1], index: 6, kind: input, shape index: {}]   ;;  %s12868_s7 = inlined_call_operand.vmem [shape: f32[16,256], index: 7, kind: output, shape index: {}]  }
   0x1   :  { %12 = sst [smem:[#allocation3]] %s12867_s6 }
   0x2 LB: > { %s9616_s27 = sadd.s32 4294967295, %s9555_s26   ;;  %p7794_p0 = scmp.ge.s32.totalorder %s9555_s26, 1  ;;  %s9555_s26 = sphi %s9610_s26, %s18_s26  }
   0x3   : > { %p240_p1 = scmp.lt.s32.totalorder %s9555_s26, 3 }
   0x5   : > { %p241_p2 = pnand %p7794_p0, %p240_p1 }
   0x7   : > { %244 = sbr.rel (%p241_p2) target bundleno = 1379 (0x563), region = 48 }
   0xe   : > { %s7795_s28 = sshll.u32 %s9616_s27, 3  ;;  %v1174_v0 = vld [vmem:[%s12862_s1] sm:$0xff]  ;;  %v1175_v2 = vld [vmem:[%s12862_s1 + $0x8] sm:$0xff]  ;;  %vm779_vm0 = vcmask 1041408   ;;  %vm334_vm1 = vcmask 1046528   ;;  %vm423_vm2 = vcmask 1045504  }
   0xf   : > { %p274_p3 = scmp.lt.s32.totalorder %s7795_s28, 15  ;;  %v1178_v1 = vld [vmem:[%s12862_s1 + $0x20] sm:$0xff]  ;;  %v1179_v3 = vld [vmem:[%s12862_s1 + $0x28] sm:$0xff]  ;;  %vm690_vm3 = vcmask 1042432   ;;  %vm512_vm4 = vcmask 1044480   ;;  %vm868_vm5 = vcmask 1040384  }
  0x10   : > { %v7800_v4 = vcombine.high %v1174_v0, %v1178_v1  ;;  %v7802_v5 = vcombine.high %v1175_v2, %v1179_v3  ;;  %v7799_v6 = vcombine.low %v1174_v0, %v1178_v1  ;;  %v7801_v7 = vcombine.low %v1175_v2, %v1179_v3  ;;  %v1182_v8 = vld [vmem:[%s12862_s1 + $0x40] sm:$0xff]  ;;  %v1183_v10 = vld [vmem:[%s12862_s1 + $0x48] sm:$0xff]  ;;  %s9557_s23 = smov 64   ;;  %s9558_s24 = smov 16  }
  0x11   : > { %s12910_s28 = smov (!%p274_p3, %s7795_s28), 15  ;;  %v1186_v9 = vld [vmem:[%s12862_s1 + $0x60] sm:$0xff]  ;;  %v1187_v12 = vld [vmem:[%s12862_s1 + $0x68] sm:$0xff]  ;;  %vm601_vm6 = vcmask 1043456   ;;  %s9560_s6 = smov 48   ;;  %vm1005_vm7 = vcmask 195584  }
  0x12   : > { %v7808_v11 = vcombine.high %v1182_v8, %v1186_v9  ;;  %v9650_v13 = vld [vmem:[%s12862_s1 + $0x80] sm:$0xff]  ;;  %s8922_s25 = smul.u32 24, %s12910_s28  ;;  %1912 = vmatprep.subr.bf16.mxu0 %v7800_v4  ;;  %2025 = vmatprep.subr.bf16.mxu1 %v7802_v5  ;;  %v7810_v15 = vcombine.high %v1183_v10, %v1187_v12  ;;  %v7807_v16 = vcombine.low %v1182_v8, %v1186_v9  ;;  %v9661_v18 = vld [vmem:[%s12862_s1 + $0x88] sm:$0xff]  ;;  %s9561_s29 = smov 120   ;;  %vm1022_vm8 = vcmask 392192  }
  0x13   : > { %v9655_v14 = vld [vmem:[%s12862_s1 + $0xa0] sm:$0xff]  ;;  %v7809_v17 = vcombine.low %v1183_v10, %v1187_v12  ;;  %v9666_v19 = vld [vmem:[%s12862_s1 + $0xa8] sm:$0xff]  ;;  %1913 = vmatpush1.bf16.msra.mxu0 %v7799_v6  ;;  %2026 = vmatpush1.bf16.msra.mxu1 %v7801_v7  ;;  %s9562_s30 = smov 72   ;;  %s9563_s8 = smov 40   ;;  %vm1090_vm9 = vcmask 130048   ;;  %vm1039_vm10 = vcmask 588800  }
  0x14   : > { %v9671_v20 = vld [vmem:[%s12862_s1 + $0xc0] sm:$0xff]  ;;  %v7816_v21 = vcombine.high %v9650_v13, %v9655_v14  ;;  %v7818_v22 = vcombine.high %v9661_v18, %v9666_v19  ;;  %v7815_v23 = vcombine.low %v9650_v13, %v9655_v14  ;;  %v9687_v25 = vld [vmem:[%s12862_s1 + $0xc8] sm:$0xff]  ;;  %s9697_s18 = scalar_lea.vmem %s12861_s0, %s8922_s25  ;;  %1914 = vmatprep.subr.bf16.mxu0 %v7808_v11  ;;  %2027 = vmatprep.subr.bf16.mxu1 %v7810_v15  ;;  %s9559_s25 = smov 24   ;;  %vm1107_vm11 = vcmask 326656  }
  0x15   : > { %v9682_v24 = vld [vmem:[%s12862_s1 + $0xe0] sm:$0xff]  ;;  %v9692_v26 = vld [vmem:[%s12862_s1 + $0xe8] sm:$0xff]  ;;  %v7817_v27 = vcombine.low %v9661_v18, %v9666_v19  ;;  %v9719_v33 = vld [vmem:[%s9697_s18 + $0x10] sm:$0xff]  ;;  %s9564_s9 = smov 96   ;;  %vm1124_vm12 = vcmask 523264   ;;  %vm1056_vm13 = vcmask 785408  }
  0x16   : > { %v7824_v28 = vcombine.high %v9671_v20, %v9682_v24  ;;  %v7826_v29 = vcombine.high %v9687_v25, %v9692_v26  ;;  %v9708_v30 = vld [vmem:[%s12862_s1 + $0x100] sm:$0xff]  ;;  %v9716_v32 = vld [vmem:[%s9697_s18 + $0x8] sm:$0xff]  ;;  %v7823_v35 = vcombine.low %v9671_v20, %v9682_v24  ;;  %v7825_v36 = vcombine.low %v9687_v25, %v9692_v26  ;;  %v9762_v3 = vld [vmem:[%s9697_s18 + $0x18] sm:$0xff]  ;;  %s5397_s20 = sld [smem:[#allocation3]]  ;;  %p280_p4 = scmp.lt.s32.totalorder %s9616_s27, 1 }
  0x17   : > { %v9713_v31 = vld [vmem:[%s12862_s1 + $0x120] sm:$0xff]  ;;  %v8941_v39 = vpack.i.bf16 %v9719_v33, %v9716_v32  ;;  %v781_v41 = vrot.slane %v9716_v32, 6  ;;  %v783_v42 = vrot.slane %v9719_v33, 6  ;;  %v336_v44 = vrot.slane %v9716_v32, 1  ;;  %1915 = vmatpush1.bf16.msra.mxu0 %v7807_v16  ;;  %2028 = vmatpush1.bf16.msra.mxu1 %v7809_v17  ;;  %v9772_v9 = vld [vmem:[%s9697_s18 + $0x28] sm:$0xff] }
  0x18   : > { %v9722_v34 = vld [vmem:[%s9697_s18] sm:$0xff]  ;;  %v7832_v37 = vcombine.high %v9708_v30, %v9713_v31  ;;  %v7831_v38 = vcombine.low %v9708_v30, %v9713_v31  ;;  %v338_v45 = vrot.slane %v9719_v33, 1  ;;  %v425_v49 = vrot.slane %v9716_v32, 2  ;;  %1916 = vmatprep.subr.bf16.mxu0 %v7816_v21  ;;  %2029 = vmatprep.subr.bf16.mxu1 %v7818_v22  ;;  %s12912_s27 = smov (!%p280_p4, %s9616_s27), 1 }
  0x19   : > { %v780_v40 = vrot.slane %v9722_v34, 6  ;;  %v335_v43 = vrot.slane %v9722_v34, 1  ;;  %v424_v46 = vrot.slane %v9722_v34, 2  ;;  %8942 = vrot.lane.b32.xlu0 %v8941_v39, %s9557_s23  ;;  %v784_v48 = vsel %vm779_vm0, %v781_v41, %v783_v42  ;;  %v9769_v8 = vld [vmem:[%s9697_s18 + $0x20] sm:$0xff] }
  0x1a   : > { %v427_v50 = vrot.slane %v9719_v33, 2  ;;  %v339_v53 = vsel %vm334_vm1, %v336_v44, %v338_v45  ;;  %v691_v54 = vrot.slane %v9722_v34, 5  ;;  %v692_v58 = vrot.slane %v9716_v32, 5 }
  0x1b   : > { %v782_v47 = vsel %vm779_vm0, %v780_v40, %v781_v41  ;;  %v337_v52 = vsel %vm334_vm1, %v335_v43, %v336_v44  ;;  %v426_v56 = vsel %vm423_vm2, %v424_v46, %v425_v49  ;;  %v694_v60 = vrot.slane %v9719_v33, 5  ;;  %1917 = vmatpush1.bf16.msra.mxu0 %v7815_v23  ;;  %2030 = vmatpush1.bf16.msra.mxu1 %v7817_v27 }
  0x1c   : > { %v8956_v51 = vpack.i.bf16 %v784_v48, %v782_v47  ;;  %v8946_v55 = vpack.i.bf16 %v339_v53, %v337_v52  ;;  %v428_v57 = vsel %vm423_vm2, %v425_v49, %v427_v50  ;;  %v513_v61 = vrot.slane %v9722_v34, 3  ;;  %1918 = vmatprep.subr.bf16.mxu0 %v7824_v28  ;;  %2031 = vmatprep.subr.bf16.mxu1 %v7826_v29  ;;  %v9821_v48 = vld [vmem:[%s9697_s18 + $0x30] sm:$0xff]  ;;  %v9829_v52 = vld [vmem:[%s9697_s18 + $0x40] sm:$0xff] }
  0x1d   : > { %v8961_v59 = vpack.i.bf16 %v428_v57, %v426_v56  ;;  %v514_v62 = vrot.slane %v9716_v32, 3  ;;  %v693_v63 = vsel %vm690_vm3, %v691_v54, %v692_v58  ;;  %v516_v0 = vrot.slane %v9719_v33, 3 }
  0x1e   : > { %8957 = vrot.lane.b32.xlu1 %v8956_v51, %s9558_s24  ;;  %8947 = vrot.lane.b32.xlu0 %v8946_v55, %s9559_s25  ;;  %v869_v1 = vrot.slane %v9722_v34, 7  ;;  %v870_v2 = vrot.slane %v9716_v32, 7  ;;  %v695_v4 = vsel %vm690_vm3, %v692_v58, %v694_v60  ;;  %v872_v6 = vrot.slane %v9719_v33, 7  ;;  %v9826_v51 = vld [vmem:[%s9697_s18 + $0x38] sm:$0xff] }
  0x1f   : > { %v515_v5 = vsel %vm512_vm4, %v513_v61, %v514_v62  ;;  %v602_v7 = vrot.slane %v9722_v34, 4  ;;  %v8951_v10 = vpack.i.bf16 %v695_v4, %v693_v63  ;;  %v517_v11 = vsel %vm512_vm4, %v514_v62, %v516_v0  ;;  %1919 = vmatpush1.bf16.msra.mxu0 %v7823_v35  ;;  %2032 = vmatpush1.bf16.msra.mxu1 %v7825_v36 }
  0x20   : > { %v871_v12 = vsel %vm868_vm5, %v869_v1, %v870_v2  ;;  %v603_v13 = vrot.slane %v9716_v32, 4  ;;  %v8971_v14 = vpack.i.bf16 %v517_v11, %v515_v5  ;;  %v873_v15 = vsel %vm868_vm5, %v870_v2, %v872_v6  ;;  %1920 = vmatprep.subr.bf16.mxu0 %v7832_v37 }
  0x21   : > { %v605_v16 = vrot.slane %v9719_v33, 4  ;;  %v340_v17 = vrot.slane %v9762_v3, 1  ;;  %v8966_v18 = vpack.i.bf16 %v873_v15, %v871_v12  ;;  %v341_v20 = vrot.slane %v9769_v8, 1 }
  0x22   : > { %8962 = vrot.lane.b32.xlu1 %v8961_v59, %s9560_s6  ;;  %8952 = vrot.lane.b32.xlu0 %v8951_v10, %s9561_s29  ;;  %v604_v19 = vsel %vm601_vm6, %v602_v7, %v603_v13  ;;  %v343_v21 = vrot.slane %v9772_v9, 1  ;;  %v696_v23 = vrot.slane %v9762_v3, 5  ;;  %v697_v24 = vrot.slane %v9769_v8, 5 }
  0x23   : > { %v606_v22 = vsel %vm601_vm6, %v603_v13, %v605_v16  ;;  %v699_v27 = vrot.slane %v9772_v9, 5  ;;  %v342_v28 = vsel %vm334_vm1, %v340_v17, %v341_v20  ;;  %v785_v32 = vrot.slane %v9762_v3, 6  ;;  %1921 = vmatpush1.bf16.msra.mxu0 %v7831_v38 }
  0x24   : > { %v344_v29 = vsel %vm334_vm1, %v341_v20, %v343_v21  ;;  %v8976_v25 = vpack.i.bf16 %v606_v22, %v604_v19  ;;  %v698_v33 = vsel %vm690_vm3, %v696_v23, %v697_v24  ;;  %v786_v34 = vrot.slane %v9769_v8, 6 }
  0x25   : > { %v8981_v26 = vpack.i.bf16 %v344_v29, %v342_v28  ;;  %v700_v35 = vsel %vm690_vm3, %v697_v24, %v699_v27  ;;  %v788_v36 = vrot.slane %v9772_v9, 6  ;;  %v429_v37 = vrot.slane %v9762_v3, 2 }
  0x26   : > { %8972 = vrot.lane.b32.xlu1 %v8971_v14, %s9562_s30  ;;  %8967 = vrot.lane.b32.xlu0 %v8966_v18, %s9563_s8  ;;  %v430_v39 = vrot.slane %v9769_v8, 2  ;;  %v787_v40 = vsel %vm779_vm0, %v785_v32, %v786_v34  ;;  %v432_v41 = vrot.slane %v9772_v9, 2  ;;  %v874_v30 = vrot.slane %v9762_v3, 7 }
  0x27   : > { %v875_v31 = vrot.slane %v9769_v8, 7  ;;  %v789_v38 = vsel %vm779_vm0, %v786_v34, %v788_v36  ;;  %v877_v43 = vrot.slane %v9772_v9, 7  ;;  %v8986_v44 = vpack.i.bf16 %v700_v35, %v698_v33 }
  0x28   : > { %v431_v42 = vsel %vm423_vm2, %v429_v37, %v430_v39  ;;  %v433_v45 = vsel %vm423_vm2, %v430_v39, %v432_v41  ;;  %v518_v46 = vrot.slane %v9762_v3, 3  ;;  %v519_v47 = vrot.slane %v9769_v8, 3  ;;  %v9882_v37 = vld [vmem:[%s9697_s18 + $0x50] sm:$0xff]  ;;  %v9885_v39 = vld [vmem:[%s9697_s18 + $0x58] sm:$0xff] }
  0x29   : > { %v8991_v49 = vpack.i.bf16 %v789_v38, %v787_v40  ;;  %v521_v50 = vrot.slane %v9772_v9, 3  ;;  %v8996_v53 = vpack.i.bf16 %v433_v45, %v431_v42  ;;  %v876_v54 = vsel %vm868_vm5, %v874_v30, %v875_v31 }
  0x2a   : > { %8977 = vrot.lane.b32.xlu1 %v8976_v25, %s9564_s9  ;;  %8982 = vrot.lane.b32.xlu0 %v8981_v26, %s9559_s25  ;;  %v878_v55 = vsel %vm868_vm5, %v875_v31, %v877_v43  ;;  %v607_v56 = vrot.slane %v9762_v3, 4  ;;  %v608_v57 = vrot.slane %v9769_v8, 4  ;;  %v610_v58 = vrot.slane %v9772_v9, 4  ;;  %v9874_v26 = vld [vmem:[%s9697_s18 + $0x48] sm:$0xff] }
  0x2b   : > { %v345_v59 = vrot.slane %v9821_v48, 1  ;;  %v520_v60 = vsel %vm512_vm4, %v518_v46, %v519_v47  ;;  %v522_v61 = vsel %vm512_vm4, %v519_v47, %v521_v50  ;;  %v346_v62 = vrot.slane %v9826_v51, 1 }
  0x2c   : > { %v348_v63 = vrot.slane %v9829_v52, 1  ;;  %v9001_v0 = vpack.i.bf16 %v878_v55, %v876_v54  ;;  %v9006_v1 = vpack.i.bf16 %v522_v61, %v520_v60  ;;  %v609_v2 = vsel %vm601_vm6, %v607_v56, %v608_v57 }
  0x2d   : > { %v611_v3 = vsel %vm601_vm6, %v608_v57, %v610_v58  ;;  %v701_v4 = vrot.slane %v9821_v48, 5  ;;  %v347_v5 = vsel %vm334_vm1, %v345_v59, %v346_v62  ;;  %v702_v7 = vrot.slane %v9826_v51, 5 }
  0x2e   : > { %8987 = vrot.lane.b32.xlu1 %v8986_v44, %s9561_s29  ;;  %8992 = vrot.lane.b32.xlu0 %v8991_v49, %s9558_s24  ;;  %v349_v6 = vsel %vm334_vm1, %v346_v62, %v348_v63  ;;  %v704_v10 = vrot.slane %v9829_v52, 5  ;;  %v9011_v11 = vpack.i.bf16 %v9772_v9, %v9769_v8  ;;  %v790_v12 = vrot.slane %v9821_v48, 6 }
  0x2f   : > { %v791_v13 = vrot.slane %v9826_v51, 6  ;;  %v793_v14 = vrot.slane %v9829_v52, 6  ;;  %v9016_v15 = vpack.i.bf16 %v611_v3, %v609_v2  ;;  %v9021_v16 = vpack.i.bf16 %v349_v6, %v347_v5 }
  0x30   : > { %v434_v17 = vrot.slane %v9821_v48, 2  ;;  %v435_v18 = vrot.slane %v9826_v51, 2  ;;  %v703_v19 = vsel %vm690_vm3, %v701_v4, %v702_v7  ;;  %v705_v20 = vsel %vm690_vm3, %v702_v7, %v704_v10 }
  0x31   : > { %v437_v8 = vrot.slane %v9829_v52, 2  ;;  %v879_v9 = vrot.slane %v9821_v48, 7  ;;  %v792_v21 = vsel %vm779_vm0, %v790_v12, %v791_v13  ;;  %v794_v22 = vsel %vm779_vm0, %v791_v13, %v793_v14  ;;  %v9928_v13 = vld [vmem:[%s9697_s18 + $0x60] sm:$0xff] }
  0x32   : > { %8997 = vrot.lane.b32.xlu1 %v8996_v53, %s9560_s6  ;;  %9002 = vrot.lane.b32.xlu0 %v9001_v0, %s9563_s8  ;;  %v880_v23 = vrot.slane %v9826_v51, 7  ;;  %v882_v24 = vrot.slane %v9829_v52, 7  ;;  %v9026_v27 = vpack.i.bf16 %v705_v20, %v703_v19  ;;  %v9031_v28 = vpack.i.bf16 %v794_v22, %v792_v21 }
  0x33   : > { %v436_v29 = vsel %vm423_vm2, %v434_v17, %v435_v18  ;;  %v438_v32 = vsel %vm423_vm2, %v435_v18, %v437_v8  ;;  %v523_v25 = vrot.slane %v9821_v48, 3  ;;  %v524_v35 = vrot.slane %v9826_v51, 3  ;;  %v9937_v18 = vld [vmem:[%s9697_s18 + $0x70] sm:$0xff] }
  0x34   : > { %v881_v33 = vsel %vm868_vm5, %v879_v9, %v880_v23  ;;  %v883_v34 = vsel %vm868_vm5, %v880_v23, %v882_v24  ;;  %v526_v36 = vrot.slane %v9829_v52, 3  ;;  %v9036_v40 = vpack.i.bf16 %v438_v32, %v436_v29 }
  0x35   : > { %v9041_v41 = vpack.i.bf16 %v883_v34, %v881_v33  ;;  %v612_v30 = vrot.slane %v9821_v48, 4  ;;  %v613_v31 = vrot.slane %v9826_v51, 4  ;;  %v525_v38 = vsel %vm512_vm4, %v523_v25, %v524_v35 }
  0x36   : > { %9007 = vrot.lane.b32.xlu1 %v9006_v1, %s9562_s30  ;;  %9012 = vrot.lane.b32.xlu0 %v9011_v11, %s9557_s23  ;;  %v527_v42 = vsel %vm512_vm4, %v524_v35, %v526_v36  ;;  %v615_v43 = vrot.slane %v9829_v52, 4  ;;  %v350_v44 = vrot.slane %v9874_v26, 1  ;;  %v351_v45 = vrot.slane %v9882_v37, 1 }
  0x37   : > { %v353_v46 = vrot.slane %v9885_v39, 1  ;;  %v9051_v47 = vpack.i.bf16 %v9829_v52, %v9826_v51  ;;  %v9046_v48 = vpack.i.bf16 %v527_v42, %v525_v38  ;;  %v614_v49 = vsel %vm601_vm6, %v612_v30, %v613_v31 }
  0x38   : > { %v706_v50 = vrot.slane %v9874_v26, 5  ;;  %v707_v53 = vrot.slane %v9882_v37, 5  ;;  %v616_v54 = vsel %vm601_vm6, %v613_v31, %v615_v43  ;;  %v709_v55 = vrot.slane %v9885_v39, 5 }
  0x39   : > { %v795_v56 = vrot.slane %v9874_v26, 6  ;;  %v796_v57 = vrot.slane %v9882_v37, 6  ;;  %v352_v51 = vsel %vm334_vm1, %v350_v44, %v351_v45  ;;  %v354_v52 = vsel %vm334_vm1, %v351_v45, %v353_v46  ;;  %v1207_v44 = vld [vmem:[%s12862_s1 + $0x108] sm:$0xff] }
  0x3a   : > { %9017 = vrot.lane.b32.xlu1 %v9016_v15, %s9564_s9  ;;  %9022 = vrot.lane.b32.xlu0 %v9021_v16, %s9559_s25  ;;  %v798_v58 = vrot.slane %v9885_v39, 6  ;;  %v439_v59 = vrot.slane %v9874_v26, 2  ;;  %v440_v60 = vrot.slane %v9882_v37, 2  ;;  %v442_v61 = vrot.slane %v9885_v39, 2  ;;  %v9933_v16 = vld [vmem:[%s9697_s18 + $0x68] sm:$0xff] }
  0x3b   : > { %v9056_v62 = vpack.i.bf16 %v616_v54, %v614_v49  ;;  %v9061_v63 = vpack.i.bf16 %v354_v52, %v352_v51  ;;  %v708_v0 = vsel %vm690_vm3, %v706_v50, %v707_v53  ;;  %v710_v1 = vsel %vm690_vm3, %v707_v53, %v709_v55  ;;  %v1214_v52 = vld [vmem:[%s12862_s1 + $0x140] sm:$0xff] }
  0x3c   : > { %v884_v2 = vrot.slane %v9874_v26, 7  ;;  %v797_v3 = vsel %vm779_vm0, %v795_v56, %v796_v57  ;;  %v799_v4 = vsel %vm779_vm0, %v796_v57, %v798_v58  ;;  %v885_v5 = vrot.slane %v9882_v37, 7  ;;  %v1218_v58 = vld [vmem:[%s12862_s1 + $0x160] sm:$0xff] }
  0x3d   : > { %v887_v6 = vrot.slane %v9885_v39, 7  ;;  %v441_v7 = vsel %vm423_vm2, %v439_v59, %v440_v60  ;;  %v443_v10 = vsel %vm423_vm2, %v440_v60, %v442_v61  ;;  %v528_v11 = vrot.slane %v9874_v26, 3  ;;  %v1215_v59 = vld [vmem:[%s12862_s1 + $0x148] sm:$0xff] }
  0x3e   : > { %9027 = vrot.lane.b32.xlu1 %v9026_v27, %s9561_s29  ;;  %9032 = vrot.lane.b32.xlu0 %v9031_v28, %s9558_s24  ;;  %v529_v12 = vrot.slane %v9882_v37, 3  ;;  %v9066_v14 = vpack.i.bf16 %v710_v1, %v708_v0  ;;  %v531_v15 = vrot.slane %v9885_v39, 3  ;;  %v9071_v17 = vpack.i.bf16 %v799_v4, %v797_v3  ;;  %v10003_v0 = vld [vmem:[%s9697_s18 + $0x80] sm:$0xff]  ;;  %v1219_v3 = vld [vmem:[%s12862_s1 + $0x168] sm:$0xff] }
  0x3f   : > { %v9076_v19 = vpack.i.bf16 %v443_v10, %v441_v7  ;;  %v886_v20 = vsel %vm868_vm5, %v884_v2, %v885_v5  ;;  %v888_v8 = vsel %vm868_vm5, %v885_v5, %v887_v6  ;;  %v617_v21 = vrot.slane %v9874_v26, 4  ;;  %v10013_v7 = vld [vmem:[%s9697_s18 + $0x88] sm:$0xff] }
  0x40   : > { %v530_v9 = vsel %vm512_vm4, %v528_v11, %v529_v12  ;;  %v618_v22 = vrot.slane %v9882_v37, 4  ;;  %v620_v23 = vrot.slane %v9885_v39, 4  ;;  %v532_v24 = vsel %vm512_vm4, %v529_v12, %v531_v15 }
  0x41   : > { %v355_v27 = vrot.slane %v9928_v13, 1  ;;  %v356_v28 = vrot.slane %v9933_v16, 1  ;;  %v358_v29 = vrot.slane %v9937_v18, 1  ;;  %v9081_v32 = vpack.i.bf16 %v888_v8, %v886_v20 }
  0x42   : > { %9037 = vrot.lane.b32.xlu1 %v9036_v40, %s9560_s6  ;;  %9042 = vrot.lane.b32.xlu0 %v9041_v41, %s9563_s8  ;;  %v9091_v25 = vpack.i.bf16 %v9885_v39, %v9882_v37  ;;  %v711_v26 = vrot.slane %v9928_v13, 5  ;;  %v9086_v33 = vpack.i.bf16 %v532_v24, %v530_v9  ;;  %v619_v34 = vsel %vm601_vm6, %v617_v21, %v618_v22  ;;  %v1226_v24 = vld [vmem:[%s12862_s1 + $0x1a0] sm:$0xff] }
  0x43   : > { %v621_v35 = vsel %vm601_vm6, %v618_v22, %v620_v23  ;;  %v712_v36 = vrot.slane %v9933_v16, 5  ;;  %v357_v40 = vsel %vm334_vm1, %v355_v27, %v356_v28  ;;  %v359_v41 = vsel %vm334_vm1, %v356_v28, %v358_v29  ;;  %v1223_v27 = vld [vmem:[%s12862_s1 + $0x188] sm:$0xff] }
  0x44   : > { %v714_v30 = vrot.slane %v9937_v18, 5  ;;  %v800_v31 = vrot.slane %v9928_v13, 6  ;;  %v801_v37 = vrot.slane %v9933_v16, 6  ;;  %v803_v39 = vrot.slane %v9937_v18, 6  ;;  %v1227_v28 = vld [vmem:[%s12862_s1 + $0x1a8] sm:$0xff] }
  0x45   : > { %v444_v38 = vrot.slane %v9928_v13, 2  ;;  %v445_v42 = vrot.slane %v9933_v16, 2  ;;  %v447_v43 = vrot.slane %v9937_v18, 2  ;;  %v9096_v45 = vpack.i.bf16 %v621_v35, %v619_v34 }
  0x46   : > { %9047 = vrot.lane.b32.xlu1 %v9046_v48, %s9562_s30  ;;  %9052 = vrot.lane.b32.xlu0 %v9051_v47, %s9557_s23  ;;  %v9101_v46 = vpack.i.bf16 %v359_v41, %v357_v40  ;;  %v889_v47 = vrot.slane %v9928_v13, 7  ;;  %v1211_v48 = vld [vmem:[%s12862_s1 + $0x128] sm:$0xff]  ;;  %v713_v49 = vsel %vm690_vm3, %v711_v26, %v712_v36  ;;  %v715_v50 = vsel %vm690_vm3, %v712_v36, %v714_v30 }
  0x47   : > { %v890_v53 = vrot.slane %v9933_v16, 7  ;;  %v892_v54 = vrot.slane %v9937_v18, 7  ;;  %v802_v55 = vsel %vm779_vm0, %v800_v31, %v801_v37  ;;  %v804_v56 = vsel %vm779_vm0, %v801_v37, %v803_v39  ;;  %v1230_v31 = vld [vmem:[%s12862_s1 + $0x1c0] sm:$0xff]  ;;  %v1231_v39 = vld [vmem:[%s12862_s1 + $0x1c8] sm:$0xff] }
  0x48   : > { %v9984_v57 = vsel %vm423_vm2, %v444_v38, %v445_v42  ;;  %v533_v51 = vrot.slane %v9928_v13, 3  ;;  %v448_v60 = vsel %vm423_vm2, %v445_v42, %v447_v43  ;;  %v534_v61 = vrot.slane %v9933_v16, 3  ;;  %v1234_v37 = vld [vmem:[%s12862_s1 + $0x1e0] sm:$0xff] }
  0x49   : > { %v7834_v1 = vcombine.high %v1207_v44, %v1211_v48  ;;  %v9106_v2 = vpack.i.bf16 %v715_v50, %v713_v49  ;;  %v891_v4 = vsel %vm868_vm5, %v889_v47, %v890_v53  ;;  %v893_v5 = vsel %vm868_vm5, %v890_v53, %v892_v54  ;;  %v10073_v50 = vld [vmem:[%s12862_s1 + $0x200] sm:$0xff]  ;;  %v10083_v54 = vld [vmem:[%s12862_s1 + $0x208] sm:$0xff] }
  0x4a   : > { %9057 = vrot.lane.b32.xlu1 %v9056_v62, %s9564_s9  ;;  %9062 = vrot.lane.b32.xlu0 %v9061_v63, %s9559_s25  ;;  %v536_v62 = vrot.slane %v9937_v18, 3  ;;  %v10000_v63 = vld [vmem:[%s9697_s18 + $0x78] sm:$0xff]  ;;  %v622_v6 = vrot.slane %v9928_v13, 4  ;;  %v7833_v10 = vcombine.low %v1207_v44, %v1211_v48  ;;  %v9111_v11 = vpack.i.bf16 %v804_v56, %v802_v55  ;;  %v10078_v53 = vld [vmem:[%s12862_s1 + $0x220] sm:$0xff] }
  0x4b   : > { %2033 = vmatprep.subr.bf16.mxu1 %v7834_v1  ;;  %v9116_v12 = vpack.i.bf16 %v448_v60, %v9984_v57  ;;  %v625_v15 = vrot.slane %v9937_v18, 4  ;;  %v7840_v20 = vcombine.high %v1214_v52, %v1218_v58  ;;  %v7842_v8 = vcombine.high %v1215_v59, %v1219_v3  ;;  %v10088_v55 = vld [vmem:[%s12862_s1 + $0x228] sm:$0xff] }
  0x4c   : > { %v537_v13 = vsel %vm512_vm4, %v534_v61, %v536_v62  ;;  %2034 = vmatpush1.bf16.msra.mxu1 %v7833_v10  ;;  %v9121_v9 = vpack.i.bf16 %v893_v5, %v891_v4  ;;  %v9131_v21 = vpack.i.bf16 %v9937_v18, %v9933_v16  ;;  %v360_v22 = vrot.slane %v10000_v63, 1  ;;  %v1247_v18 = vld [vmem:[%s12862_s1 + $0x248] sm:$0xff] }
  0x4d   : > { %v361_v23 = vrot.slane %v10003_v0, 1  ;;  %v363_v29 = vrot.slane %v10013_v7, 1  ;;  %1922 = vmatprep.subr.bf16.mxu0 %v7840_v20  ;;  %v7841_v26 = vcombine.low %v1215_v59, %v1219_v3  ;;  %v717_v35 = vrot.slane %v10003_v0, 5  ;;  %2035 = vmatprep.subr.bf16.mxu1 %v7842_v8 }
  0x4e   : > { %9067 = vrot.lane.b32.xlu1 %v9066_v14, %s9561_s29  ;;  %9072 = vrot.lane.b32.xlu0 %v9071_v17, %s9558_s24  ;;  %v623_v14 = vrot.slane %v9933_v16, 4  ;;  %v1222_v17 = vld [vmem:[%s12862_s1 + $0x180] sm:$0xff]  ;;  %v719_v36 = vrot.slane %v10013_v7, 5  ;;  %v7850_v30 = vcombine.high %v1223_v27, %v1227_v28  ;;  %v805_v42 = vrot.slane %v10000_v63, 6 }
  0x4f   : > { %v7848_v41 = vcombine.high %v1222_v17, %v1226_v24  ;;  %v10059_v38 = vsel %vm334_vm1, %v360_v22, %v361_v23  ;;  %v806_v43 = vrot.slane %v10003_v0, 6  ;;  %v808_v44 = vrot.slane %v10013_v7, 6  ;;  %v1250_v16 = vld [vmem:[%s12862_s1 + $0x260] sm:$0xff] }
  0x50   : > { %v10042_v34 = vsel %vm601_vm6, %v622_v6, %v623_v14  ;;  %v10047_v40 = vsel %vm601_vm6, %v623_v14, %v625_v15  ;;  %2036 = vmatpush1.bf16.msra.mxu1 %v7841_v26  ;;  %v449_v47 = vrot.slane %v10000_v63, 2  ;;  %v7847_v48 = vcombine.low %v1222_v17, %v1226_v24  ;;  %v10109_v6 = vld [vmem:[%s9697_s18 + $0x90] sm:$0xff]  ;;  %v10121_v14 = vld [vmem:[%s9697_s18 + $0xa0] sm:$0xff] }
  0x51   : > { %v7849_v49 = vcombine.low %v1223_v27, %v1227_v28  ;;  %v10095_v57 = vsel %vm690_vm3, %v717_v35, %v719_v36  ;;  %2037 = vmatprep.subr.bf16.mxu1 %v7850_v30  ;;  %v895_v59 = vrot.slane %v10003_v0, 7  ;;  %v7856_v60 = vcombine.high %v1230_v31, %v1234_v37  ;;  %v10153_v28 = vld [vmem:[%s12862_s1 + $0x280] sm:$0xff] }
  0x52   : > { %9077 = vrot.lane.b32.xlu1 %v9076_v19, %s9560_s6  ;;  %9082 = vrot.lane.b32.xlu0 %v9081_v32, %s9563_s8  ;;  %v535_v19 = vsel %vm512_vm4, %v533_v51, %v534_v61  ;;  %v716_v32 = vrot.slane %v10000_v63, 5  ;;  %v450_v51 = vrot.slane %v10003_v0, 2  ;;  %v807_v62 = vsel %vm779_vm0, %v805_v42, %v806_v43 }
  0x53   : > { %v809_v1 = vsel %vm779_vm0, %v806_v43, %v808_v44  ;;  %v9136_v3 = vpack.i.bf16 %v10047_v40, %v10042_v34  ;;  %v897_v5 = vrot.slane %v10013_v7, 7  ;;  %v7864_v15 = vcombine.high %v10073_v50, %v10078_v53  ;;  %v1258_v40 = vld [vmem:[%s12862_s1 + $0x2a0] sm:$0xff] }
  0x54   : > { %v10092_v56 = vsel %vm690_vm3, %v716_v32, %v717_v35  ;;  %2038 = vmatpush1.bf16.msra.mxu1 %v7849_v49  ;;  %v7866_v17 = vcombine.high %v10083_v54, %v10088_v55  ;;  %v10137_v20 = vsel %vm423_vm2, %v449_v47, %v450_v51  ;;  %v538_v8 = vrot.slane %v10000_v63, 3 }
  0x55   : > { %v539_v24 = vrot.slane %v10003_v0, 3  ;;  %v7865_v27 = vcombine.low %v10083_v54, %v10088_v55  ;;  %v541_v32 = vrot.slane %v10013_v7, 3  ;;  %v630_v34 = vrot.slane %v10013_v7, 4 }
  0x56   : > { %9087 = vrot.lane.b32.xlu1 %v9086_v33, %s9562_s30  ;;  %9092 = vrot.lane.b32.xlu0 %v9091_v25, %s9557_s23  ;;  %v7839_v25 = vcombine.low %v1214_v52, %v1218_v58  ;;  %v9126_v33 = vpack.i.bf16 %v537_v13, %v535_v19  ;;  %v452_v52 = vrot.slane %v10013_v7, 2  ;;  %v894_v58 = vrot.slane %v10000_v63, 7  ;;  %v1246_v19 = vld [vmem:[%s12862_s1 + $0x240] sm:$0xff] }
  0x57   : > { %v9151_v13 = vpack.i.bf16 %v809_v1, %v807_v62  ;;  %v7872_v26 = vcombine.high %v1246_v19, %v1250_v16  ;;  %v365_v35 = vrot.slane %v10109_v6, 1  ;;  %v540_v43 = vsel %vm512_vm4, %v538_v8, %v539_v24  ;;  %v10217_v62 = vld [vmem:[%s12862_s1 + $0x320] sm:$0xff]  ;;  %v10222_v1 = vld [vmem:[%s12862_s1 + $0x308] sm:$0xff] }
  0x58   : > { %1923 = vmatpush1.bf16.msra.mxu0 %v7839_v25  ;;  %v453_v22 = vsel %vm423_vm2, %v450_v51, %v452_v52  ;;  %v627_v25 = vrot.slane %v10000_v63, 4  ;;  %v1259_v63 = vld [vmem:[%s12862_s1 + $0x2a8] sm:$0xff]  ;;  %v542_v44 = vsel %vm512_vm4, %v539_v24, %v541_v32  ;;  %v721_v49 = vrot.slane %v10109_v6, 5 }
  0x59   : > { %1924 = vmatprep.subr.bf16.mxu0 %v7848_v41  ;;  %v1255_v41 = vld [vmem:[%s12862_s1 + $0x288] sm:$0xff]  ;;  %v899_v24 = vrot.slane %v10109_v6, 7  ;;  %vm1141_vm14 = vcmask 719872   ;;  %vm1073_vm15 = vcmask 982016  }
  0x5a   : > { %9097 = vrot.lane.b32.xlu1 %v9096_v45, %s9564_s9  ;;  %9102 = vrot.lane.b32.xlu0 %v9101_v46, %s9559_s25  ;;  %v1235_v45 = vld [vmem:[%s12862_s1 + $0x1e8] sm:$0xff]  ;;  %v364_v46 = vsel %vm334_vm1, %v361_v23, %v363_v29  ;;  %v896_v23 = vsel %vm868_vm5, %v894_v58, %v895_v59  ;;  %v898_v29 = vsel %vm868_vm5, %v895_v59, %v897_v5  ;;  %v724_v58 = vrot.slane %v10121_v14, 5 }
  0x5b   : > { %v7858_v61 = vcombine.high %v1231_v39, %v1235_v45  ;;  %v9141_v4 = vpack.i.bf16 %v364_v46, %v10059_v38  ;;  %v7857_v10 = vcombine.low %v1231_v39, %v1235_v45  ;;  %v9156_v39 = vpack.i.bf16 %v453_v22, %v10137_v20  ;;  %v1262_v46 = vld [vmem:[%s12862_s1 + $0x2c0] sm:$0xff]  ;;  %v1263_v51 = vld [vmem:[%s12862_s1 + $0x2c8] sm:$0xff] }
  0x5c   : > { %1925 = vmatpush1.bf16.msra.mxu0 %v7847_v48  ;;  %v9161_v42 = vpack.i.bf16 %v898_v29, %v896_v23  ;;  %v7880_v45 = vcombine.high %v10153_v28, %v1258_v40  ;;  %v1267_v52 = vld [vmem:[%s12862_s1 + $0x2e8] sm:$0xff]  ;;  %v810_v59 = vrot.slane %v10109_v6, 6  ;;  %v813_v5 = vrot.slane %v10121_v14, 6  ;;  %v10243_v20 = vld [vmem:[%s12862_s1 + $0x340] sm:$0xff] }
  0x5d   : > { %1926 = vmatprep.subr.bf16.mxu0 %v7856_v60  ;;  %2039 = vmatprep.subr.bf16.mxu1 %v7858_v61  ;;  %v7881_v60 = vcombine.low %v1255_v41, %v1259_v63  ;;  %v10212_v61 = vld [vmem:[%s12862_s1 + $0x300] sm:$0xff]  ;;  %v457_v22 = vrot.slane %v10121_v14, 2  ;;  %v1283_v23 = vld [vmem:[%s12862_s1 + $0x368] sm:$0xff] }
  0x5e   : > { %9107 = vrot.lane.b32.xlu1 %v9106_v2, %s9561_s29  ;;  %9112 = vrot.lane.b32.xlu0 %v9111_v11, %s9558_s24  ;;  %v7855_v2 = vcombine.low %v1230_v31, %v1234_v37  ;;  %v9146_v11 = vpack.i.bf16 %v10095_v57, %v10092_v56  ;;  %v368_v31 = vrot.slane %v10121_v14, 1  ;;  %v7871_v37 = vcombine.low %v1246_v19, %v1250_v16 }
  0x5f   : > { %2040 = vmatpush1.bf16.msra.mxu1 %v7857_v10  ;;  %v7879_v57 = vcombine.low %v10153_v28, %v1258_v40  ;;  %v7890_v19 = vcombine.high %v1263_v51, %v1267_v52  ;;  %v7896_v28 = vcombine.high %v10212_v61, %v10217_v62  ;;  %v7895_v40 = vcombine.low %v10212_v61, %v10217_v62 }
  0x60   : > { %1927 = vmatpush1.bf16.msra.mxu0 %v7855_v2  ;;  %2041 = vmatprep.subr.bf16.mxu1 %v7866_v17  ;;  %v10227_v2 = vld [vmem:[%s12862_s1 + $0x328] sm:$0xff] }
  0x61   : > { %1928 = vmatprep.subr.bf16.mxu0 %v7864_v15  ;;  %v7898_v29 = vcombine.high %v10222_v1, %v10227_v2 }
  0x62   : > { %9117 = vrot.lane.b32.xlu1 %v9116_v12, %s9560_s6  ;;  %9122 = vrot.lane.b32.xlu0 %v9121_v9, %s9563_s8  ;;  %v10118_v12 = vld [vmem:[%s9697_s18 + $0x98] sm:$0xff]  ;;  %v7863_v9 = vcombine.low %v10073_v50, %v10078_v53  ;;  %v7882_v50 = vcombine.high %v1255_v41, %v1259_v63  ;;  %v1266_v53 = vld [vmem:[%s12862_s1 + $0x2e0] sm:$0xff]  ;;  %v7897_v41 = vcombine.low %v10222_v1, %v10227_v2 }
  0x63   : > { %v366_v30 = vrot.slane %v10118_v12, 1  ;;  %2042 = vmatpush1.bf16.msra.mxu1 %v7865_v27  ;;  %v722_v56 = vrot.slane %v10118_v12, 5  ;;  %v7888_v10 = vcombine.high %v1262_v46, %v1266_v53  ;;  %v900_v27 = vrot.slane %v10118_v12, 7  ;;  %v10286_v63 = vld [vmem:[%s12862_s1 + $0x10] sm:$0xff] }
  0x64   : > { %1929 = vmatpush1.bf16.msra.mxu0 %v7863_v9  ;;  %v454_v9 = vrot.slane %v10109_v6, 2 }
  0x65   : > { %1930 = vmatprep.subr.bf16.mxu0 %v7872_v26  ;;  %v10194_v54 = vsel %vm334_vm1, %v365_v35, %v366_v30  ;;  %v10197_v55 = vsel %vm334_vm1, %v366_v30, %v368_v31  ;;  %v723_v16 = vsel %vm690_vm3, %v721_v49, %v722_v56  ;;  %v725_v8 = vsel %vm690_vm3, %v722_v56, %v724_v58  ;;  %v10291_v30 = vld [vmem:[%s12862_s1 + $0x30] sm:$0xff]  ;;  %v10296_v31 = vld [vmem:[%s12862_s1 + $0x18] sm:$0xff] }
  0x66   : > { %9127 = vrot.lane.b32.xlu1 %v9126_v33, %s9562_s30  ;;  %9132 = vrot.lane.b32.xlu0 %v9131_v21, %s9557_s23  ;;  %v1251_v21 = vld [vmem:[%s12862_s1 + $0x268] sm:$0xff]  ;;  %v628_v33 = vrot.slane %v10003_v0, 4  ;;  %v9181_v17 = vpack.i.bf16 %v10197_v55, %v10194_v54  ;;  %v902_v26 = vrot.slane %v10121_v14, 7  ;;  %v546_v35 = vrot.slane %v10121_v14, 3 }
  0x67   : > { %v7874_v36 = vcombine.high %v1247_v18, %v1251_v21  ;;  %v7873_v38 = vcombine.low %v1247_v18, %v1251_v21  ;;  %v7887_v18 = vcombine.low %v1262_v46, %v1266_v53  ;;  %v455_v21 = vrot.slane %v10118_v12, 2 }
  0x68   : > { %v10184_v47 = vsel %vm601_vm6, %v627_v25, %v628_v33  ;;  %v10187_v48 = vsel %vm601_vm6, %v628_v33, %v630_v34  ;;  %1931 = vmatpush1.bf16.msra.mxu0 %v7871_v37  ;;  %v543_v33 = vrot.slane %v10109_v6, 3  ;;  %v544_v34 = vrot.slane %v10118_v12, 3  ;;  %v10301_v37 = vld [vmem:[%s12862_s1 + $0x38] sm:$0xff] }
  0x69   : > { %2043 = vmatprep.subr.bf16.mxu1 %v7874_v36  ;;  %1932 = vmatprep.subr.bf16.mxu0 %v7880_v45  ;;  %v9176_v15 = vpack.i.bf16 %v10187_v48, %v10184_v47  ;;  %v10277_v36 = vld [vmem:[%s9697_s18 + $0xa8] sm:$0xff]  ;;  %v9186_v46 = vpack.i.bf16 %v725_v8, %v723_v16  ;;  %v458_v48 = vsel %vm423_vm2, %v455_v21, %v457_v22  ;;  %v635_v55 = vrot.slane %v10121_v14, 4 }
  0x6a   : > { %9137 = vrot.lane.b32.xlu1 %v9136_v3, %s9564_s9  ;;  %9142 = vrot.lane.b32.xlu0 %v9141_v4, %s9559_s25  ;;  %v9166_v3 = vpack.i.bf16 %v542_v44, %v540_v43  ;;  %v811_v4 = vrot.slane %v10118_v12, 6  ;;  %v10309_v43 = vld [vmem:[%s9697_s18 + $0xb8] sm:$0xff]  ;;  %v901_v49 = vsel %vm868_vm5, %v899_v24, %v900_v27  ;;  %v370_v56 = vrot.slane %v10277_v36, 1 }
  0x6b   : > { %2044 = vmatpush1.bf16.msra.mxu1 %v7873_v38  ;;  %v633_v38 = vrot.slane %v10118_v12, 4  ;;  %v545_v61 = vsel %vm512_vm4, %v543_v33, %v544_v34  ;;  %v547_v62 = vsel %vm512_vm4, %v544_v34, %v546_v35  ;;  %v726_v1 = vrot.slane %v10277_v36, 5 }
  0x6c   : > { %2045 = vmatprep.subr.bf16.mxu1 %v7882_v50  ;;  %1933 = vmatpush1.bf16.msra.mxu0 %v7879_v57  ;;  %v812_v32 = vsel %vm779_vm0, %v810_v59, %v811_v4  ;;  %v814_v25 = vsel %vm779_vm0, %v811_v4, %v813_v5  ;;  %v903_v50 = vsel %vm868_vm5, %v900_v27, %v902_v26  ;;  %v373_v59 = vrot.slane %v10309_v43, 1 }
  0x6d   : > { %1934 = vmatprep.subr.bf16.mxu0 %v7888_v10  ;;  %v9191_v47 = vpack.i.bf16 %v814_v25, %v812_v32  ;;  %v7804_v57 = vcombine.high %v10286_v63, %v10291_v30  ;;  %v815_v4 = vrot.slane %v10277_v36, 6  ;;  %v818_v10 = vrot.slane %v10309_v43, 6 }
  0x6e   : > { %9147 = vrot.lane.b32.xlu1 %v9146_v11, %s9561_s29  ;;  %9152 = vrot.lane.b32.xlu0 %v9151_v13, %s9558_s24  ;;  %v9171_v11 = vpack.i.bf16 %v10013_v7, %v10003_v0  ;;  %v7889_v13 = vcombine.low %v1263_v51, %v1267_v52  ;;  %v10248_v0 = vld [vmem:[%s12862_s1 + $0x360] sm:$0xff]  ;;  %v10253_v7 = vld [vmem:[%s12862_s1 + $0x348] sm:$0xff]  ;;  %v7806_v51 = vcombine.high %v10296_v31, %v10301_v37  ;;  %v548_v27 = vrot.slane %v10277_v36, 3 }
  0x6f   : > { %2046 = vmatpush1.bf16.msra.mxu1 %v7881_v60  ;;  %v7904_v44 = vcombine.high %v10243_v20, %v10248_v0  ;;  %v7906_v45 = vcombine.high %v10253_v7, %v1283_v23  ;;  %v7903_v53 = vcombine.low %v10243_v20, %v10248_v0  ;;  %v7905_v54 = vcombine.low %v10253_v7, %v1283_v23 }
  0x70   : > { %2047 = vmatprep.subr.bf16.mxu1 %v7890_v19  ;;  %1935 = vmatpush1.bf16.msra.mxu0 %v7887_v18  ;;  %v9201_v60 = vpack.i.bf16 %v903_v50, %v901_v49  ;;  %v636_v19 = vsel %vm601_vm6, %v633_v38, %v635_v55  ;;  %v462_v0 = vrot.slane %v10309_v43, 2  ;;  %v904_v7 = vrot.slane %v10277_v36, 7 }
  0x71   : > { %1936 = vmatprep.subr.bf16.mxu0 %v7896_v28  ;;  %v551_v32 = vrot.slane %v10309_v43, 3 }
  0x72   : > { %9157 = vrot.lane.b32.xlu1 %v9156_v39, %s9560_s6  ;;  %9162 = vrot.lane.b32.xlu0 %v9161_v42, %s9563_s8  ;;  %v632_v39 = vrot.slane %v10109_v6, 4  ;;  %v10306_v42 = vld [vmem:[%s9697_s18 + $0xb0] sm:$0xff]  ;;  %v456_v6 = vsel %vm423_vm2, %v454_v9, %v455_v21 }
  0x73   : > { %2048 = vmatpush1.bf16.msra.mxu1 %v7889_v13  ;;  %v9196_v52 = vpack.i.bf16 %v458_v48, %v456_v6  ;;  %v371_v58 = vrot.slane %v10306_v42, 1  ;;  %v727_v2 = vrot.slane %v10306_v42, 5  ;;  %v816_v5 = vrot.slane %v10306_v42, 6 }
  0x74   : > { %2049 = vmatprep.subr.bf16.mxu1 %v7898_v29  ;;  %1937 = vmatpush1.bf16.msra.mxu0 %v7895_v40  ;;  %v459_v13 = vrot.slane %v10277_v36, 2  ;;  %v460_v20 = vrot.slane %v10306_v42, 2  ;;  %v549_v29 = vrot.slane %v10306_v42, 3  ;;  %v9251_v49 = vpack.i.bf16 %v10309_v43, %v10306_v42 }
  0x75   : > { %1938 = vmatprep.subr.bf16.mxu0 %v7904_v44  ;;  %v372_v16 = vsel %vm334_vm1, %v370_v56, %v371_v58  ;;  %v374_v18 = vsel %vm334_vm1, %v371_v58, %v373_v59  ;;  %v728_v21 = vsel %vm690_vm3, %v726_v1, %v727_v2  ;;  %v817_v23 = vsel %vm779_vm0, %v815_v4, %v816_v5 }
  0x76   : > { %9167 = vrot.lane.b32.xlu1 %v9166_v3, %s9562_s30  ;;  %9172 = vrot.lane.b32.xlu0 %v9171_v11, %s9557_s23  ;;  %v729_v3 = vrot.slane %v10309_v43, 5  ;;  %v9206_v11 = vpack.i.bf16 %v547_v62, %v545_v61  ;;  %v9221_v9 = vpack.i.bf16 %v374_v18, %v372_v16  ;;  %v819_v24 = vsel %vm779_vm0, %v816_v5, %v818_v10  ;;  %v9533_v62 = vld [vmem:[%s9697_s18 + $0x8] sm:$0xff] }
  0x77   : > { %2050 = vmatpush1.bf16.msra.mxu1 %v7897_v41  ;;  %v9231_v25 = vpack.i.bf16 %v819_v24, %v817_v23  ;;  %v461_v26 = vsel %vm423_vm2, %v459_v13, %v460_v20  ;;  %v463_v33 = vsel %vm423_vm2, %v460_v20, %v462_v0  ;;  %v637_v41 = vrot.slane %v10277_v36, 4 }
  0x78   : > { %2051 = vmatprep.subr.bf16.mxu1 %v7906_v45  ;;  %1939 = vmatpush1.bf16.msra.mxu0 %v7903_v53  ;;  %v730_v22 = vsel %vm690_vm3, %v727_v2, %v729_v3  ;;  %v640_v44 = vrot.slane %v10309_v43, 4  ;;  %v9534_v2 = vld [vmem:[%s9697_s18] sm:$0xff] }
  0x79   : > { %2138 = vmatprep.subr.bf16.mxu0 %v7804_v57  ;;  %v9226_v28 = vpack.i.bf16 %v730_v22, %v728_v21  ;;  %v1189_v21 = vld [vmem:[%s12862_s1 + $0x78] sm:$0xff] }
  0x7a   : > { %9177 = vrot.lane.b32.xlu1 %v9176_v15, %s9564_s9  ;;  %9182 = vrot.lane.b32.xlu0 %v9181_v17, %s9559_s25  ;;  %v9211_v15 = vpack.i.bf16 %v10121_v14, %v10118_v12  ;;  %v634_v17 = vsel %vm601_vm6, %v632_v39, %v633_v38  ;;  %v905_v12 = vrot.slane %v10306_v42, 7  ;;  %v907_v14 = vrot.slane %v10309_v43, 7 }
  0x7b   : > { %2052 = vmatpush1.bf16.msra.mxu1 %v7905_v54  ;;  %v9216_v8 = vpack.i.bf16 %v636_v19, %v634_v17  ;;  %v9236_v39 = vpack.i.bf16 %v463_v33, %v461_v26  ;;  %v638_v38 = vrot.slane %v10306_v42, 4 }
  0x7c   : > { %2251 = vmatprep.subr.bf16.mxu1 %v7806_v51  ;;  %v906_v34 = vsel %vm868_vm5, %v904_v7, %v905_v12  ;;  %v908_v35 = vsel %vm868_vm5, %v905_v12, %v907_v14  ;;  %v10403_v12 = vld [vmem:[%s12862_s1 + $0x50] sm:$0xff] }
  0x7d   : > { %v9241_v45 = vpack.i.bf16 %v908_v35, %v906_v34  ;;  %v639_v50 = vsel %vm601_vm6, %v637_v41, %v638_v38  ;;  %v641_v53 = vsel %vm601_vm6, %v638_v38, %v640_v44  ;;  %v10408_v14 = vld [vmem:[%s12862_s1 + $0x70] sm:$0xff]  ;;  %v10448_v38 = vld [vmem:[%s12862_s1 + $0xb8] sm:$0xff] }
  0x7e   : > { %9187 = vrot.lane.b32.xlu1 %v9186_v46, %s9561_s29  ;;  %9192 = vrot.lane.b32.xlu0 %v9191_v47, %s9558_s24  ;;  %v550_v46 = vsel %vm512_vm4, %v548_v27, %v549_v29  ;;  %v552_v47 = vsel %vm512_vm4, %v549_v29, %v551_v32  ;;  %v9256_v51 = vpack.i.bf16 %v641_v53, %v639_v50  ;;  %v10438_v41 = vld [vmem:[%s12862_s1 + $0xb0] sm:$0xff]  ;;  %v10489_v53 = vld [vmem:[%s12862_s1 + $0xf8] sm:$0xff] }
  0x7f   : > { %v9246_v36 = vpack.i.bf16 %v552_v47, %v550_v46  ;;  %v7803_v47 = vcombine.low %v10286_v63, %v10291_v30  ;;  %v10470_v63 = vld [vmem:[%s12862_s1 + $0xd0] sm:$0xff] }
  0x80   : > { %v10475_v30 = vld [vmem:[%s12862_s1 + $0xf0] sm:$0xff] }
  0x82   : > { %9197 = vrot.lane.b32.xlu1 %v9196_v52, %s9560_s6  ;;  %9202 = vrot.lane.b32.xlu0 %v9201_v60, %s9563_s8 }
  0x86   : > { %9207 = vrot.lane.b32.xlu1 %v9206_v11, %s9562_s30  ;;  %9212 = vrot.lane.b32.xlu0 %v9211_v15, %s9557_s23 }
  0x8a   : > { %9217 = vrot.lane.b32.xlu1 %v9216_v8, %s9564_s9  ;;  %9222 = vrot.lane.b32.xlu0 %v9221_v9, %s9559_s25  ;;  %v10413_v9 = vld [vmem:[%s12862_s1 + $0x58] sm:$0xff] }
  0x8b   : > { %v10370_v40 = vpop.permute.xlu0 %8942  ;;  %v7814_v50 = vcombine.high %v10413_v9, %v1189_v21 }
  0x8c   : > { %v8945_v17 = vunpack.i.h.bf16 %v10370_v40  ;;  %v8944_v19 = vunpack.i.l.bf16 %v10370_v40  ;;  %v10433_v40 = vld [vmem:[%s12862_s1 + $0x90] sm:$0xff] }
  0x8e   : > { %9227 = vrot.lane.b32.xlu1 %v9226_v28, %s9561_s29  ;;  %9232 = vrot.lane.b32.xlu0 %v9231_v25, %s9558_s24 }
  0x90   : > { %v8958_v6 = vpop.permute.xlu1 %8957  ;;  %v8948_v48 = vpop.permute.xlu0 %8947 }
  0x91   : > { %v8950_v55 = vunpack.i.h.bf16 %v8948_v48  ;;  %v8949_v56 = vunpack.i.l.bf16 %v8948_v48  ;;  %v8960_v60 = vunpack.i.h.bf16 %v8958_v6  ;;  %v8959_v61 = vunpack.i.l.bf16 %v8958_v6 }
  0x92   : > { %9237 = vrot.lane.b32.xlu1 %v9236_v39, %s9560_s6  ;;  %9242 = vrot.lane.b32.xlu0 %v9241_v45, %s9563_s8  ;;  %v10443_v39 = vld [vmem:[%s12862_s1 + $0x98] sm:$0xff]  ;;  %v7805_v6 = vcombine.low %v10296_v31, %v10301_v37  ;;  %v7811_v31 = vcombine.low %v10403_v12, %v10408_v14 }
  0x93   : > { %v1007_v1 = vsel %vm1005_vm7, %v9533_v62, %v8950_v55  ;;  %v1006_v3 = vsel %vm1005_vm7, %v9534_v2, %v8949_v56  ;;  %v10484_v37 = vld [vmem:[%s12862_s1 + $0xd8] sm:$0xff]  ;;  %v10499_v55 = vld [vmem:[%s12862_s1 + $0x130] sm:$0xff]  ;;  %v7819_v62 = vcombine.low %v10433_v40, %v10438_v41  ;;  %v7827_v2 = vcombine.low %v10470_v63, %v10475_v30 }
  0x94   : > { %v8963_v54 = vpop.permute.xlu1 %8962  ;;  %v8953_v57 = vpop.permute.xlu0 %8952 }
  0x95   : > { %v8955_v42 = vunpack.i.h.bf16 %v8953_v57  ;;  %v8954_v43 = vunpack.i.l.bf16 %v8953_v57  ;;  %v8965_v52 = vunpack.i.h.bf16 %v8963_v54  ;;  %v8964_v58 = vunpack.i.l.bf16 %v8963_v54  ;;  %v10494_v54 = vld [vmem:[%s12862_s1 + $0x110] sm:$0xff] }
  0x96   : > { %9247 = vrot.lane.b32.xlu1 %v9246_v36, %s9562_s30  ;;  %9252 = vrot.lane.b32.xlu0 %v9251_v49, %s9557_s23  ;;  %v7812_v49 = vcombine.high %v10403_v12, %v10408_v14  ;;  %v10535_v12 = vld [vmem:[%s12862_s1 + $0x118] sm:$0xff] }
  0x97   : > { %v1092_v16 = vsel %vm1090_vm9, %v8955_v42, %v8960_v60  ;;  %v1091_v18 = vsel %vm1090_vm9, %v8954_v43, %v8959_v61  ;;  %v1023_v13 = vsel %vm1022_vm8, %v1006_v3, %v8964_v58  ;;  %v1024_v20 = vsel %vm1022_vm8, %v1007_v1, %v8965_v52  ;;  %v10540_v14 = vld [vmem:[%s12862_s1 + $0x138] sm:$0xff] }
  0x98   : > { %v8973_v59 = vpop.permute.xlu1 %8972  ;;  %v8968_v4 = vpop.permute.xlu0 %8967  ;;  %v7821_v1 = vcombine.low %v10443_v39, %v10448_v38  ;;  %v7828_v3 = vcombine.high %v10470_v63, %v10475_v30  ;;  %v10634_v63 = vld [vmem:[%s12862_s1 + $0x1d8] sm:$0xff] }
  0x99   : > { %v8975_v5 = vunpack.i.h.bf16 %v8973_v59  ;;  %v8974_v10 = vunpack.i.l.bf16 %v8973_v59  ;;  %v8970_v11 = vunpack.i.h.bf16 %v8968_v4  ;;  %v8969_v15 = vunpack.i.l.bf16 %v8968_v4  ;;  %v10639_v30 = vld [vmem:[%s12862_s1 + $0x1f8] sm:$0xff] }
  0x9a   : > { %9257 = vrot.lane.b32.xlu1 %v9256_v51, %s9564_s9  ;;  %v7813_v51 = vcombine.low %v10413_v9, %v1189_v21  ;;  %s8217_s9 = sshll.u32 %s12912_s27, 4 }
  0x9b   : > { %v1108_v0 = vsel %vm1107_vm11, %v1091_v18, %v8969_v15  ;;  %v1109_v7 = vsel %vm1107_vm11, %v1092_v16, %v8970_v11  ;;  %v1040_v29 = vsel %vm1039_vm10, %v1023_v13, %v8974_v10  ;;  %v1041_v32 = vsel %vm1039_vm10, %v1024_v20, %v8975_v5  ;;  %v9535_v13 = vld [vmem:[%s9697_s18 + $0x18] sm:$0xff]  ;;  %s284_s17 = scalar_lea.vmem %s12868_s7, %s8217_s9 }
  0x9c   : > { %v8978_v8 = vpop.permute.xlu1 %8977  ;;  %v1125_v22 = vsel %vm1124_vm12, %v1108_v0, %v8944_v19  ;;  %v1126_v23 = vsel %vm1124_vm12, %v1109_v7, %v8945_v17  ;;  %v10420_v28 = vpop.permute.xlu0 %8982  ;;  %v7829_v19 = vcombine.low %v10484_v37, %v10489_v53  ;;  %v7830_v16 = vcombine.high %v10484_v37, %v10489_v53  ;;  %v10583_v53 = vld [vmem:[%s12862_s1 + $0x190] sm:$0xff] }
  0x9d   : > { %v8980_v24 = vunpack.i.h.bf16 %v8978_v8  ;;  %v8979_v27 = vunpack.i.l.bf16 %v8978_v8  ;;  %v1142_v25 = vsel %vm1141_vm14, %v1125_v22, 0.0  ;;  %v1143_v26 = vsel %vm1141_vm14, %v1126_v23, 0.0 }
  0x9e   : > { %v10428_v35 = vpack.c.bf16 %v1143_v26, %v1142_v25  ;;  %v8984_v56 = vunpack.i.l.bf16 %v10420_v28  ;;  %v8985_v4 = vunpack.i.h.bf16 %v10420_v28  ;;  %v7836_v18 = vcombine.high %v10494_v54, %v10499_v55 }
  0x9f   : > { %v1057_v33 = vsel %vm1056_vm13, %v1040_v29, %v8979_v27  ;;  %v1058_v34 = vsel %vm1056_vm13, %v1041_v32, %v8980_v24  ;;  %v9536_v24 = vld [vmem:[%s9697_s18 + $0x20] sm:$0xff]  ;;  %v7838_v37 = vcombine.high %v10535_v12, %v10540_v14 }
  0xa0   : > { %v10450_v44 = vpop.permute.xlu1 %8987  ;;  %v1074_v45 = vsel %vm1073_vm15, %v1057_v33, %v8954_v43  ;;  %v1075_v46 = vsel %vm1073_vm15, %v1058_v34, %v8955_v42  ;;  %v8993_v48 = vpop.permute.xlu0 %8992  ;;  %7911 = vmatprep.mubr.msk.bf16.mxu0 %vm1056_vm13, %v10428_v35  ;;  %7919 = vmatprep.mubr.msk.bf16.mxu1 %vm1056_vm13, %v10428_v35  ;;  %v7820_v42 = vcombine.high %v10433_v40, %v10438_v41 }
  0xa1   : > { %v10462_v36 = vpack.c.bf16 %v1075_v46, %v1074_v45  ;;  %v7822_v43 = vcombine.high %v10443_v39, %v10448_v38  ;;  %v8990_v52 = vunpack.i.h.bf16 %v10450_v44  ;;  %v8989_v58 = vunpack.i.l.bf16 %v10450_v44  ;;  %v10557_v46 = vld [vmem:[%s12862_s1 + $0x150] sm:$0xff] }
  0xa2   : > { %v8995_v59 = vunpack.i.h.bf16 %v8993_v48  ;;  %v8994_v60 = vunpack.i.l.bf16 %v8993_v48  ;;  %v1008_v20 = vsel %vm1005_vm7, %v9535_v13, %v8984_v56  ;;  %v1009_v27 = vsel %vm1005_vm7, %v9536_v24, %v8985_v4  ;;  %v10572_v48 = vld [vmem:[%s12862_s1 + $0x178] sm:$0xff]  ;;  %v10588_v56 = vld [vmem:[%s12862_s1 + $0x1b0] sm:$0xff] }
  0xa3   : > { %1945 = vmatmul.mubr.bf16.vlgmr.msra.gmra.mrb[0].mxu0 %v10462_v36  ;;  %2058 = vmatmul.mubr.bf16.vlgmr.msra.gmra.mrb[0].mxu1 %v10462_v36  ;;  %v10629_v44 = vld [vmem:[%s12862_s1 + $0x1f0] sm:$0xff]  ;;  %v10679_v13 = vld [vmem:[%s12862_s1 + $0x238] sm:$0xff] }
  0xa4   : > { %v8998_v57 = vpop.permute.xlu1 %8997  ;;  %2139 = vmatpush1.bf16.msra.mxu0 %v7803_v47  ;;  %2252 = vmatpush1.bf16.msra.mxu1 %v7805_v6  ;;  %v9003_v61 = vpop.permute.xlu0 %9002  ;;  %v1094_v0 = vsel %vm1090_vm9, %v8990_v52, %v8995_v59  ;;  %v1093_v7 = vsel %vm1090_vm9, %v8989_v58, %v8994_v60  ;;  %v10562_v47 = vld [vmem:[%s12862_s1 + $0x170] sm:$0xff]  ;;  %v10567_v6 = vld [vmem:[%s12862_s1 + $0x158] sm:$0xff] }
  0xa5   : > { %2140 = vmatprep.subr.bf16.mxu0 %v7812_v49  ;;  %2253 = vmatprep.subr.bf16.mxu1 %v7814_v50  ;;  %v8999_v5 = vunpack.i.l.bf16 %v8998_v57  ;;  %v9005_v10 = vunpack.i.h.bf16 %v9003_v61  ;;  %v9004_v11 = vunpack.i.l.bf16 %v9003_v61  ;;  %v9000_v15 = vunpack.i.h.bf16 %v8998_v57 }
  0xa6   : > { %v7845_v4 = vcombine.low %v10567_v6, %v10572_v48 }
  0xa7   : > { %v1025_v28 = vsel %vm1022_vm8, %v1008_v20, %v8999_v5  ;;  %v1110_v29 = vsel %vm1107_vm11, %v1093_v7, %v9004_v11  ;;  %v1111_v32 = vsel %vm1107_vm11, %v1094_v0, %v9005_v10  ;;  %v1026_v25 = vsel %vm1022_vm8, %v1009_v27, %v9000_v15  ;;  %v10656_v10 = vld [vmem:[%s12862_s1 + $0x210] sm:$0xff] }
  0xa8   : > { %v9008_v17 = vpop.permute.xlu1 %9007  ;;  %2141 = vmatpush1.bf16.msra.mxu0 %v7811_v31  ;;  %2254 = vmatpush1.bf16.msra.mxu1 %v7813_v51  ;;  %v9013_v8 = vpop.permute.xlu0 %9012  ;;  %v7851_v5 = vcombine.low %v10583_v53, %v10588_v56  ;;  %v10661_v11 = vld [vmem:[%s12862_s1 + $0x230] sm:$0xff] }
  0xa9   : > { %2142 = vmatprep.subr.bf16.mxu0 %v7820_v42  ;;  %2255 = vmatprep.subr.bf16.mxu1 %v7822_v43  ;;  %v9010_v9 = vunpack.i.h.bf16 %v9008_v17  ;;  %v9009_v21 = vunpack.i.l.bf16 %v9008_v17  ;;  %v9015_v22 = vunpack.i.h.bf16 %v9013_v8  ;;  %v9014_v23 = vunpack.i.l.bf16 %v9013_v8  ;;  %v10595_v42 = vld [vmem:[%s12862_s1 + $0x198] sm:$0xff] }
  0xaa   : > { %v10600_v43 = vld [vmem:[%s12862_s1 + $0x1b8] sm:$0xff]  ;;  %v7852_v17 = vcombine.high %v10583_v53, %v10588_v56 }
  0xab   : > { %v1127_v26 = vsel %vm1124_vm12, %v1110_v29, %v9014_v23  ;;  %v1128_v33 = vsel %vm1124_vm12, %v1111_v32, %v9015_v22  ;;  %v1042_v49 = vsel %vm1039_vm10, %v1025_v28, %v9009_v21  ;;  %v1043_v50 = vsel %vm1039_vm10, %v1026_v25, %v9010_v9 }
  0xac   : > { %v9018_v34 = vpop.permute.xlu1 %9017  ;;  %2143 = vmatpush1.bf16.msra.mxu0 %v7819_v62  ;;  %2256 = vmatpush1.bf16.msra.mxu1 %v7821_v1  ;;  %v1144_v40 = vsel %vm1141_vm14, %v1127_v26, 0.0  ;;  %v1145_v41 = vsel %vm1141_vm14, %v1128_v33, 0.0  ;;  %v10552_v45 = vpop.permute.xlu0 %9022  ;;  %v7835_v1 = vcombine.low %v10494_v54, %v10499_v55  ;;  %v7844_v55 = vcombine.high %v10557_v46, %v10562_v47 }
  0xad   : > { %v9020_v39 = vunpack.i.h.bf16 %v9018_v34  ;;  %v9019_v38 = vunpack.i.l.bf16 %v9018_v34  ;;  %2144 = vmatprep.subr.bf16.mxu0 %v7828_v3  ;;  %2257 = vmatprep.subr.bf16.mxu1 %v7830_v16  ;;  %v10576_v31 = vpack.c.bf16 %v1145_v41, %v1144_v40  ;;  %v7837_v3 = vcombine.low %v10535_v12, %v10540_v14 }
  0xae   : > { %v7854_v16 = vcombine.high %v10595_v42, %v10600_v43  ;;  %v7861_v21 = vcombine.low %v10634_v63, %v10639_v30  ;;  %v9025_v22 = vunpack.i.h.bf16 %v10552_v45  ;;  %v9024_v23 = vunpack.i.l.bf16 %v10552_v45 }
  0xaf   : > { %v1059_v57 = vsel %vm1056_vm13, %v1042_v49, %v9019_v38  ;;  %v1060_v51 = vsel %vm1056_vm13, %v1043_v50, %v9020_v39  ;;  %7912 = vmatprep.mubr.msk.bf16.mxu0 %vm1056_vm13, %v10576_v31  ;;  %7920 = vmatprep.mubr.msk.bf16.mxu1 %vm1056_vm13, %v10576_v31  ;;  %v7862_v25 = vcombine.high %v10634_v63, %v10639_v30  ;;  %v10725_v63 = vld [vmem:[%s12862_s1 + $0x270] sm:$0xff]  ;;  %v10730_v30 = vld [vmem:[%s12862_s1 + $0x258] sm:$0xff] }
  0xb0   : > { %v10602_v59 = vpop.permute.xlu1 %9027  ;;  %v1076_v60 = vsel %vm1073_vm15, %v1059_v57, %v8989_v58  ;;  %v9033_v61 = vpop.permute.xlu0 %9032  ;;  %v1077_v62 = vsel %vm1073_vm15, %v1060_v51, %v8990_v52  ;;  %2145 = vmatpush1.bf16.msra.mxu0 %v7827_v2  ;;  %2258 = vmatpush1.bf16.msra.mxu1 %v7829_v19  ;;  %v10624_v58 = vld [vmem:[%s12862_s1 + $0x1d0] sm:$0xff]  ;;  %v7846_v52 = vcombine.high %v10567_v6, %v10572_v48 }
  0xb1   : > { %v10641_v54 = vpack.c.bf16 %v1077_v62, %v1076_v60  ;;  %2146 = vmatprep.subr.bf16.mxu0 %v7836_v18  ;;  %2259 = vmatprep.subr.bf16.mxu1 %v7838_v37  ;;  %v7843_v2 = vcombine.low %v10557_v46, %v10562_v47  ;;  %v7853_v19 = vcombine.low %v10595_v42, %v10600_v43  ;;  %v10674_v18 = vld [vmem:[%s12862_s1 + $0x218] sm:$0xff]  ;;  %v9030_v20 = vunpack.i.h.bf16 %v10602_v59  ;;  %v9538_v48 = vld [vmem:[%s9697_s18 + $0x30] sm:$0xff] }
  0xb2   : > { %v9029_v0 = vunpack.i.l.bf16 %v10602_v59  ;;  %v9035_v7 = vunpack.i.h.bf16 %v9033_v61  ;;  %v9034_v8 = vunpack.i.l.bf16 %v9033_v61  ;;  %v7859_v14 = vcombine.low %v10624_v58, %v10629_v44  ;;  %v9537_v47 = vld [vmem:[%s9697_s18 + $0x38] sm:$0xff]  ;;  %v10790_v59 = vld [vmem:[%s12862_s1 + $0x2f0] sm:$0xff] }
  0xb3   : > { %1955 = vmatmul.mubr.bf16.gmra.mrb[4].mxu0 %v10641_v54  ;;  %2068 = vmatmul.mubr.bf16.gmra.mrb[4].mxu1 %v10641_v54  ;;  %v7860_v9 = vcombine.high %v10624_v58, %v10629_v44  ;;  %v7868_v26 = vcombine.high %v10656_v10, %v10661_v11  ;;  %v7870_v41 = vcombine.high %v10674_v18, %v10679_v13  ;;  %v10795_v58 = vld [vmem:[%s12862_s1 + $0x2d8] sm:$0xff] }
  0xb4   : > { %v9038_v15 = vpop.permute.xlu1 %9037  ;;  %v9043_v12 = vpop.permute.xlu0 %9042  ;;  %2147 = vmatpush1.bf16.msra.mxu0 %v7835_v1  ;;  %2260 = vmatpush1.bf16.msra.mxu1 %v7837_v3  ;;  %v1096_v33 = vsel %vm1090_vm9, %v9030_v20, %v9035_v7  ;;  %v1095_v34 = vsel %vm1090_vm9, %v9029_v0, %v9034_v8  ;;  %v1011_v6 = vsel %vm1005_vm7, %v9537_v47, %v9025_v22  ;;  %v10720_v3 = vld [vmem:[%s12862_s1 + $0x250] sm:$0xff]  ;;  %v10761_v7 = vld [vmem:[%s12862_s1 + $0x2b8] sm:$0xff] }
  0xb5   : > { %2148 = vmatprep.subr.bf16.mxu0 %v7844_v55  ;;  %2261 = vmatprep.subr.bf16.mxu1 %v7846_v52  ;;  %v9045_v24 = vunpack.i.h.bf16 %v9043_v12  ;;  %v9044_v27 = vunpack.i.l.bf16 %v9043_v12  ;;  %v9040_v28 = vunpack.i.h.bf16 %v9038_v15  ;;  %v9039_v29 = vunpack.i.l.bf16 %v9038_v15  ;;  %v10735_v55 = vld [vmem:[%s12862_s1 + $0x278] sm:$0xff]  ;;  %v10749_v15 = vld [vmem:[%s12862_s1 + $0x2b0] sm:$0xff] }
  0xb6   : > { %v1010_v49 = vsel %vm1005_vm7, %v9538_v48, %v9024_v23  ;;  %v7867_v23 = vcombine.low %v10656_v10, %v10661_v11  ;;  %v10800_v44 = vld [vmem:[%s12862_s1 + $0x2f8] sm:$0xff]  ;;  %v7876_v11 = vcombine.high %v10720_v3, %v10725_v63 }
  0xb7   : > { %v1112_v50 = vsel %vm1107_vm11, %v1095_v34, %v9044_v27  ;;  %v1113_v37 = vsel %vm1107_vm11, %v1096_v33, %v9045_v24  ;;  %v1027_v53 = vsel %vm1022_vm8, %v1010_v49, %v9039_v29  ;;  %v1028_v56 = vsel %vm1022_vm8, %v1011_v6, %v9040_v28  ;;  %v10822_v27 = vld [vmem:[%s12862_s1 + $0x330] sm:$0xff]  ;;  %v10840_v33 = vld [vmem:[%s12862_s1 + $0x338] sm:$0xff] }
  0xb8   : > { %v9048_v32 = vpop.permute.xlu1 %9047  ;;  %v9053_v40 = vpop.permute.xlu0 %9052  ;;  %2149 = vmatpush1.bf16.msra.mxu0 %v7843_v2  ;;  %2262 = vmatpush1.bf16.msra.mxu1 %v7845_v4  ;;  %v7869_v24 = vcombine.low %v10674_v18, %v10679_v13  ;;  %v7878_v18 = vcombine.high %v10730_v30, %v10735_v55  ;;  %v7875_v13 = vcombine.low %v10720_v3, %v10725_v63 }
  0xb9   : > { %v9050_v39 = vunpack.i.h.bf16 %v9048_v32  ;;  %v9049_v38 = vunpack.i.l.bf16 %v9048_v32  ;;  %v9055_v45 = vunpack.i.h.bf16 %v9053_v40  ;;  %v9054_v46 = vunpack.i.l.bf16 %v9053_v40  ;;  %2150 = vmatprep.subr.bf16.mxu0 %v7852_v17  ;;  %2263 = vmatprep.subr.bf16.mxu1 %v7854_v16  ;;  %v10756_v16 = vld [vmem:[%s12862_s1 + $0x298] sm:$0xff] }
  0xba   : > { %v7885_v32 = vcombine.low %v10756_v16, %v10761_v7  ;;  %v7893_v47 = vcombine.low %v10795_v58, %v10800_v44 }
  0xbb   : > { %v1129_v57 = vsel %vm1124_vm12, %v1112_v50, %v9054_v46  ;;  %v1130_v51 = vsel %vm1124_vm12, %v1113_v37, %v9055_v45  ;;  %v1044_v52 = vsel %vm1039_vm10, %v1027_v53, %v9049_v38  ;;  %v1045_v2 = vsel %vm1039_vm10, %v1028_v56, %v9050_v39 }
  0xbc   : > { %v9058_v42 = vpop.permute.xlu1 %9057  ;;  %v1146_v43 = vsel %vm1141_vm14, %v1129_v57, 0.0  ;;  %v1147_v60 = vsel %vm1141_vm14, %v1130_v51, 0.0  ;;  %v10715_v1 = vpop.permute.xlu0 %9062  ;;  %2151 = vmatpush1.bf16.msra.mxu0 %v7851_v5  ;;  %2264 = vmatpush1.bf16.msra.mxu1 %v7853_v19  ;;  %v10744_v5 = vld [vmem:[%s12862_s1 + $0x290] sm:$0xff]  ;;  %v7894_v57 = vcombine.high %v10795_v58, %v10800_v44  ;;  %v1281_v44 = vld [vmem:[%s12862_s1 + $0x358] sm:$0xff] }
  0xbd   : > { %v9060_v61 = vunpack.i.h.bf16 %v9058_v42  ;;  %v9059_v62 = vunpack.i.l.bf16 %v9058_v42  ;;  %v10739_v4 = vpack.c.bf16 %v1147_v60, %v1146_v43  ;;  %2152 = vmatprep.subr.bf16.mxu0 %v7860_v9  ;;  %2265 = vmatprep.subr.bf16.mxu1 %v7862_v25  ;;  %v7883_v29 = vcombine.low %v10744_v5, %v10749_v15  ;;  %v1284_v58 = vld [vmem:[%s12862_s1 + $0x370] sm:$0xff] }
  0xbe   : > { %v7886_v25 = vcombine.high %v10756_v16, %v10761_v7  ;;  %v9065_v6 = vunpack.i.h.bf16 %v10715_v1  ;;  %v9064_v48 = vunpack.i.l.bf16 %v10715_v1 }
  0xbf   : > { %v1061_v17 = vsel %vm1056_vm13, %v1044_v52, %v9059_v62  ;;  %v1062_v19 = vsel %vm1056_vm13, %v1045_v2, %v9060_v61  ;;  %7913 = vmatprep.mubr.msk.bf16.mxu0 %vm1056_vm13, %v10739_v4  ;;  %7921 = vmatprep.mubr.msk.bf16.mxu1 %vm1056_vm13, %v10739_v4  ;;  %v9540_v52 = vld [vmem:[%s9697_s18 + $0x48] sm:$0xff] }
  0xc0   : > { %v10763_v8 = vpop.permute.xlu1 %9067  ;;  %v1078_v12 = vsel %vm1073_vm15, %v1061_v17, %v9029_v0  ;;  %v9073_v9 = vpop.permute.xlu0 %9072  ;;  %v1079_v22 = vsel %vm1073_vm15, %v1062_v19, %v9030_v20  ;;  %2153 = vmatpush1.bf16.msra.mxu0 %v7859_v14  ;;  %2266 = vmatpush1.bf16.msra.mxu1 %v7861_v21  ;;  %v10785_v0 = vld [vmem:[%s12862_s1 + $0x2d0] sm:$0xff]  ;;  %v7877_v20 = vcombine.low %v10730_v30, %v10735_v55 }
  0xc1   : > { %v10802_v10 = vpack.c.bf16 %v1079_v22, %v1078_v12  ;;  %2154 = vmatprep.subr.bf16.mxu0 %v7868_v26  ;;  %2267 = vmatprep.subr.bf16.mxu1 %v7870_v41  ;;  %v7884_v14 = vcombine.high %v10744_v5, %v10749_v15  ;;  %v10817_v21 = vld [vmem:[%s12862_s1 + $0x310] sm:$0xff]  ;;  %v10835_v26 = vld [vmem:[%s12862_s1 + $0x318] sm:$0xff]  ;;  %v9070_v34 = vunpack.i.h.bf16 %v10763_v8  ;;  %v9069_v40 = vunpack.i.l.bf16 %v10763_v8 }
  0xc2   : > { %v9075_v41 = vunpack.i.h.bf16 %v9073_v9  ;;  %v9074_v39 = vunpack.i.l.bf16 %v9073_v9  ;;  %v7891_v45 = vcombine.low %v10785_v0, %v10790_v59  ;;  %v7892_v46 = vcombine.high %v10785_v0, %v10790_v59  ;;  %v9539_v30 = vld [vmem:[%s9697_s18 + $0x50] sm:$0xff] }
  0xc3   : > { %1965 = vmatmul.mubr.bf16.gmra.mrb[8].mxu0 %v10802_v10  ;;  %2078 = vmatmul.mubr.bf16.gmra.mrb[8].mxu1 %v10802_v10  ;;  %v7900_v51 = vcombine.high %v10817_v21, %v10822_v27  ;;  %v7902_v61 = vcombine.high %v10835_v26, %v10840_v33  ;;  %v1013_v55 = vsel %vm1005_vm7, %v9539_v30, %v9065_v6  ;;  %v1280_v59 = vld [vmem:[%s12862_s1 + $0x350] sm:$0xff] }
  0xc4   : > { %v9078_v28 = vpop.permute.xlu1 %9077  ;;  %v9083_v38 = vpop.permute.xlu0 %9082  ;;  %2155 = vmatpush1.bf16.msra.mxu0 %v7867_v23  ;;  %2268 = vmatpush1.bf16.msra.mxu1 %v7869_v24  ;;  %v1098_v42 = vsel %vm1090_vm9, %v9070_v34, %v9075_v41  ;;  %v1097_v43 = vsel %vm1090_vm9, %v9069_v40, %v9074_v39  ;;  %v1012_v2 = vsel %vm1005_vm7, %v9540_v52, %v9064_v48 }
  0xc5   : > { %2156 = vmatprep.subr.bf16.mxu0 %v7876_v11  ;;  %2269 = vmatprep.subr.bf16.mxu1 %v7878_v18  ;;  %v9085_v49 = vunpack.i.h.bf16 %v9083_v38  ;;  %v9084_v50 = vunpack.i.l.bf16 %v9083_v38  ;;  %v9080_v37 = vunpack.i.h.bf16 %v9078_v28  ;;  %v9079_v53 = vunpack.i.l.bf16 %v9078_v28  ;;  %v1285_v11 = vld [vmem:[%s12862_s1 + $0x378] sm:$0xff] }
  0xc6   : > { %v7899_v39 = vcombine.low %v10817_v21, %v10822_v27  ;;  %v7901_v38 = vcombine.low %v10835_v26, %v10840_v33  ;;  %v7908_v6 = vcombine.high %v1280_v59, %v1284_v58  ;;  %v7910_v48 = vcombine.high %v1281_v44, %v1285_v11  ;;  %v10921_v33 = vld [vmem:[%s12864_s3 + $0x40] sm:$0xff]  }
  0xc7   : > { %v1114_v5 = vsel %vm1107_vm11, %v1097_v43, %v9084_v50  ;;  %v1115_v15 = vsel %vm1107_vm11, %v1098_v42, %v9085_v49  ;;  %v1029_v17 = vsel %vm1022_vm8, %v1012_v2, %v9079_v53  ;;  %v1030_v19 = vsel %vm1022_vm8, %v1013_v55, %v9080_v37  ;;  %v9542_v55 = vld [vmem:[%s9697_s18 + $0x60] sm:$0xff] }
  0xc8   : > { %v9088_v56 = vpop.permute.xlu1 %9087  ;;  %v9093_v60 = vpop.permute.xlu0 %9092  ;;  %2157 = vmatpush1.bf16.msra.mxu0 %v7875_v13  ;;  %2270 = vmatpush1.bf16.msra.mxu1 %v7877_v20 }
  0xc9   : > { %v9090_v62 = vunpack.i.h.bf16 %v9088_v56  ;;  %v9089_v1 = vunpack.i.l.bf16 %v9088_v56  ;;  %v9095_v3 = vunpack.i.h.bf16 %v9093_v60  ;;  %v9094_v63 = vunpack.i.l.bf16 %v9093_v60  ;;  %2158 = vmatprep.subr.bf16.mxu0 %v7884_v14  ;;  %2271 = vmatprep.subr.bf16.mxu1 %v7886_v25 }
  0xcb   : > { %v1131_v16 = vsel %vm1124_vm12, %v1114_v5, %v9094_v63  ;;  %v1132_v7 = vsel %vm1124_vm12, %v1115_v15, %v9095_v3  ;;  %v1046_v18 = vsel %vm1039_vm10, %v1029_v17, %v9089_v1  ;;  %v1047_v13 = vsel %vm1039_vm10, %v1030_v19, %v9090_v62  ;;  %v9541_v63 = vld [vmem:[%s9697_s18 + $0x68] sm:$0xff] }
  0xcc   : > { %v9098_v12 = vpop.permute.xlu1 %9097  ;;  %v1148_v9 = vsel %vm1141_vm14, %v1131_v16, 0.0  ;;  %v1149_v22 = vsel %vm1141_vm14, %v1132_v7, 0.0  ;;  %v10876_v0 = vpop.permute.xlu0 %9102  ;;  %2159 = vmatpush1.bf16.msra.mxu0 %v7883_v29  ;;  %2272 = vmatpush1.bf16.msra.mxu1 %v7885_v32 }
  0xcd   : > { %v9100_v23 = vunpack.i.h.bf16 %v9098_v12  ;;  %v9099_v24 = vunpack.i.l.bf16 %v9098_v12  ;;  %v10892_v20 = vpack.c.bf16 %v1149_v22, %v1148_v9  ;;  %2160 = vmatprep.subr.bf16.mxu0 %v7892_v46  ;;  %2273 = vmatprep.subr.bf16.mxu1 %v7894_v57  ;;  %v9105_v49 = vunpack.i.h.bf16 %v10876_v0 }
  0xce   : > { %v9104_v50 = vunpack.i.l.bf16 %v10876_v0 }
  0xcf   : > { %v1063_v14 = vsel %vm1056_vm13, %v1046_v18, %v9099_v24  ;;  %v1064_v28 = vsel %vm1056_vm13, %v1047_v13, %v9100_v23  ;;  %7914 = vmatprep.mubr.msk.bf16.mxu0 %vm1056_vm13, %v10892_v20  ;;  %7922 = vmatprep.mubr.msk.bf16.mxu1 %vm1056_vm13, %v10892_v20  ;;  %v1015_v30 = vsel %vm1005_vm7, %v9541_v63, %v9105_v49 }
  0xd0   : > { %v10896_v29 = vpop.permute.xlu1 %9107  ;;  %v1080_v32 = vsel %vm1073_vm15, %v1063_v14, %v9069_v40  ;;  %v9113_v25 = vpop.permute.xlu0 %9112  ;;  %v1081_v41 = vsel %vm1073_vm15, %v1064_v28, %v9070_v34  ;;  %2161 = vmatpush1.bf16.msra.mxu0 %v7891_v45  ;;  %2274 = vmatpush1.bf16.msra.mxu1 %v7893_v47  ;;  %v7907_v34 = vcombine.low %v1280_v59, %v1284_v58 }
  0xd1   : > { %v10912_v46 = vpack.c.bf16 %v1081_v41, %v1080_v32  ;;  %2162 = vmatprep.subr.bf16.mxu0 %v7900_v51  ;;  %2275 = vmatprep.subr.bf16.mxu1 %v7902_v61  ;;  %v7909_v40 = vcombine.low %v1281_v44, %v1285_v11  ;;  %v9110_v45 = vunpack.i.h.bf16 %v10896_v29  ;;  %v9109_v21 = vunpack.i.l.bf16 %v10896_v29 }
  0xd2   : > { %v9115_v27 = vunpack.i.h.bf16 %v9113_v25  ;;  %v9114_v47 = vunpack.i.l.bf16 %v9113_v25  ;;  %v1014_v52 = vsel %vm1005_vm7, %v9542_v55, %v9104_v50 }
  0xd3   : > { %1975 = vmatmul.mubr.bf16.gmra.mrb[12].mxu0 %v10912_v46  ;;  %2088 = vmatmul.mubr.bf16.gmra.mrb[12].mxu1 %v10912_v46 }
  0xd4   : > { %v9118_v8 = vpop.permute.xlu1 %9117  ;;  %v9123_v26 = vpop.permute.xlu0 %9122  ;;  %2163 = vmatpush1.bf16.msra.mxu0 %v7899_v39  ;;  %2276 = vmatpush1.bf16.msra.mxu1 %v7901_v38  ;;  %v1100_v42 = vsel %vm1090_vm9, %v9110_v45, %v9115_v27  ;;  %v1099_v43 = vsel %vm1090_vm9, %v9109_v21, %v9114_v47 }
  0xd5   : > { %2164 = vmatprep.subr.bf16.mxu0 %v7908_v6  ;;  %2277 = vmatprep.subr.bf16.mxu1 %v7910_v48  ;;  %v9125_v37 = vunpack.i.h.bf16 %v9123_v26  ;;  %v9124_v53 = vunpack.i.l.bf16 %v9123_v26  ;;  %v9120_v56 = vunpack.i.h.bf16 %v9118_v8  ;;  %v9119_v57 = vunpack.i.l.bf16 %v9118_v8 }
  0xd7   : > { %v1116_v2 = vsel %vm1107_vm11, %v1099_v43, %v9124_v53  ;;  %v1117_v5 = vsel %vm1107_vm11, %v1100_v42, %v9125_v37  ;;  %v1031_v15 = vsel %vm1022_vm8, %v1014_v52, %v9119_v57  ;;  %v1032_v17 = vsel %vm1022_vm8, %v1015_v30, %v9120_v56  ;;  %v9543_v57 = vld [vmem:[%s9697_s18 + $0x80] sm:$0xff]  ;;  %v9544_v42 = vld [vmem:[%s9697_s18 + $0x78] sm:$0xff] }
  0xd8   : > { %v9128_v51 = vpop.permute.xlu1 %9127  ;;  %v9133_v60 = vpop.permute.xlu0 %9132  ;;  %2165 = vmatpush1.bf16.msra.mxu0 %v7907_v34  ;;  %2278 = vmatpush1.bf16.msra.mxu1 %v7909_v40 }
  0xd9   : > { %v9130_v61 = vunpack.i.h.bf16 %v9128_v51  ;;  %v9129_v62 = vunpack.i.l.bf16 %v9128_v51  ;;  %v9135_v1 = vunpack.i.h.bf16 %v9133_v60  ;;  %v9134_v3 = vunpack.i.l.bf16 %v9133_v60  ;;  %8218 = vmatprep.subr.bf16.mxu0 %v10921_v33  ;;  %8282 = vmatprep.subr.bf16.mxu1 %v10921_v33 }
  0xdb   : > { %v1133_v19 = vsel %vm1124_vm12, %v1116_v2, %v9134_v3  ;;  %v1134_v16 = vsel %vm1124_vm12, %v1117_v5, %v9135_v1  ;;  %v1048_v0 = vsel %vm1039_vm10, %v1031_v15, %v9129_v62  ;;  %v1049_v59 = vsel %vm1039_vm10, %v1032_v17, %v9130_v61 }
  0xdc   : > { %v9138_v7 = vpop.permute.xlu1 %9137  ;;  %v1150_v12 = vsel %vm1141_vm14, %v1133_v19, 0.0  ;;  %v1151_v9 = vsel %vm1141_vm14, %v1134_v16, 0.0  ;;  %v9143_v24 = vpop.permute.xlu0 %9142 }
  0xdd   : > { %v9140_v22 = vunpack.i.h.bf16 %v9138_v7  ;;  %v9139_v23 = vunpack.i.l.bf16 %v9138_v7  ;;  %v10943_v58 = vpack.c.bf16 %v1151_v9, %v1150_v12  ;;  %v9145_v48 = vunpack.i.h.bf16 %v9143_v24 }
  0xde   : > { %v9144_v8 = vunpack.i.l.bf16 %v9143_v24 }
  0xdf   : > { %v1065_v44 = vsel %vm1056_vm13, %v1048_v0, %v9139_v23  ;;  %v1066_v11 = vsel %vm1056_vm13, %v1049_v59, %v9140_v22  ;;  %7915 = vmatprep.mubr.msk.bf16.mxu0 %vm1056_vm13, %v10943_v58  ;;  %7923 = vmatprep.mubr.msk.bf16.mxu1 %vm1056_vm13, %v10943_v58  ;;  %v1017_v51 = vsel %vm1005_vm7, %v9543_v57, %v9145_v48 }
  0xe0   : > { %v9148_v18 = vpop.permute.xlu1 %9147  ;;  %v1082_v13 = vsel %vm1073_vm15, %v1065_v44, %v9109_v21  ;;  %v9153_v14 = vpop.permute.xlu0 %9152  ;;  %v1083_v28 = vsel %vm1073_vm15, %v1066_v11, %v9110_v45  ;;  %v1016_v43 = vsel %vm1005_vm7, %v9544_v42, %v9144_v8 }
  0xe1   : > { %v10953_v29 = vpack.c.bf16 %v1083_v28, %v1082_v13  ;;  %v9150_v25 = vunpack.i.h.bf16 %v9148_v18  ;;  %v9149_v41 = vunpack.i.l.bf16 %v9148_v18  ;;  %v9155_v39 = vunpack.i.h.bf16 %v9153_v14 }
  0xe2   : > { %v9154_v38 = vunpack.i.l.bf16 %v9153_v14 }
  0xe3   : > { %1985 = vmatmul.mubr.bf16.gmra.mrb[16].mxu0 %v10953_v29  ;;  %2098 = vmatmul.mubr.bf16.gmra.mrb[16].mxu1 %v10953_v29  ;;  %v1102_v47 = vsel %vm1090_vm9, %v9150_v25, %v9155_v39 }
  0xe4   : > { %v9158_v32 = vpop.permute.xlu1 %9157  ;;  %v9163_v6 = vpop.permute.xlu0 %9162  ;;  %v1101_v26 = vsel %vm1090_vm9, %v9149_v41, %v9154_v38 }
  0xe5   : > { %v9165_v34 = vunpack.i.h.bf16 %v9163_v6  ;;  %v9164_v40 = vunpack.i.l.bf16 %v9163_v6  ;;  %v9160_v21 = vunpack.i.h.bf16 %v9158_v32  ;;  %v9159_v45 = vunpack.i.l.bf16 %v9158_v32 }
  0xe7   : > { %v1118_v60 = vsel %vm1107_vm11, %v1101_v26, %v9164_v40  ;;  %v1119_v61 = vsel %vm1107_vm11, %v1102_v47, %v9165_v34  ;;  %v1033_v62 = vsel %vm1022_vm8, %v1016_v43, %v9159_v45  ;;  %v1034_v1 = vsel %vm1022_vm8, %v1017_v51, %v9160_v21  ;;  %v9545_v47 = vld [vmem:[%s9697_s18 + $0x98] sm:$0xff] }
  0xe8   : > { %v9168_v27 = vpop.permute.xlu1 %9167  ;;  %v9173_v49 = vpop.permute.xlu0 %9172 }
  0xe9   : > { %v9170_v50 = vunpack.i.h.bf16 %v9168_v27  ;;  %v9169_v37 = vunpack.i.l.bf16 %v9168_v27  ;;  %v9175_v53 = vunpack.i.h.bf16 %v9173_v49  ;;  %v9174_v56 = vunpack.i.l.bf16 %v9173_v49  ;;  %v9546_v49 = vld [vmem:[%s9697_s18 + $0x90] sm:$0xff] }
  0xeb   : > { %v1135_v3 = vsel %vm1124_vm12, %v1118_v60, %v9174_v56  ;;  %v1136_v63 = vsel %vm1124_vm12, %v1119_v61, %v9175_v53  ;;  %v1050_v17 = vsel %vm1039_vm10, %v1033_v62, %v9169_v37  ;;  %v1051_v19 = vsel %vm1039_vm10, %v1034_v1, %v9170_v50 }
  0xec   : > { %v9178_v30 = vpop.permute.xlu1 %9177  ;;  %v1152_v55 = vsel %vm1141_vm14, %v1135_v3, 0.0  ;;  %v1153_v52 = vsel %vm1141_vm14, %v1136_v63, 0.0  ;;  %v9183_v15 = vpop.permute.xlu0 %9182 }
  0xed   : > { %v9180_v2 = vunpack.i.h.bf16 %v9178_v30  ;;  %v9179_v5 = vunpack.i.l.bf16 %v9178_v30  ;;  %v10973_v16 = vpack.c.bf16 %v1153_v52, %v1152_v55  ;;  %v9185_v28 = vunpack.i.h.bf16 %v9183_v15 }
  0xee   : > { %v9184_v32 = vunpack.i.l.bf16 %v9183_v15 }
  0xef   : > { %v1067_v7 = vsel %vm1056_vm13, %v1050_v17, %v9179_v5  ;;  %v1068_v12 = vsel %vm1056_vm13, %v1051_v19, %v9180_v2  ;;  %7916 = vmatprep.mubr.msk.bf16.mxu0 %vm1056_vm13, %v10973_v16  ;;  %7924 = vmatprep.mubr.msk.bf16.mxu1 %vm1056_vm13, %v10973_v16  ;;  %v1019_v26 = vsel %vm1005_vm7, %v9545_v47, %v9185_v28 }
  0xf0   : > { %v9188_v9 = vpop.permute.xlu1 %9187  ;;  %v1084_v22 = vsel %vm1073_vm15, %v1067_v7, %v9149_v41  ;;  %v9193_v23 = vpop.permute.xlu0 %9192  ;;  %v1085_v24 = vsel %vm1073_vm15, %v1068_v12, %v9150_v25  ;;  %v1018_v50 = vsel %vm1005_vm7, %v9546_v49, %v9184_v32 }
  0xf1   : > { %v10983_v0 = vpack.c.bf16 %v1085_v24, %v1084_v22  ;;  %v9190_v44 = vunpack.i.h.bf16 %v9188_v9  ;;  %v9189_v11 = vunpack.i.l.bf16 %v9188_v9  ;;  %v9195_v18 = vunpack.i.h.bf16 %v9193_v23 }
  0xf2   : > { %v9194_v13 = vunpack.i.l.bf16 %v9193_v23 }
  0xf3   : > { %1995 = vmatmul.mubr.bf16.gmra.mrb[20].mxu0 %v10983_v0  ;;  %2108 = vmatmul.mubr.bf16.gmra.mrb[20].mxu1 %v10983_v0  ;;  %v1104_v48 = vsel %vm1090_vm9, %v9190_v44, %v9195_v18 }
  0xf4   : > { %v9198_v59 = vpop.permute.xlu1 %9197  ;;  %v9203_v14 = vpop.permute.xlu0 %9202  ;;  %v1103_v8 = vsel %vm1090_vm9, %v9189_v11, %v9194_v13 }
  0xf5   : > { %v9205_v41 = vunpack.i.h.bf16 %v9203_v14  ;;  %v9204_v39 = vunpack.i.l.bf16 %v9203_v14  ;;  %v9200_v38 = vunpack.i.h.bf16 %v9198_v59  ;;  %v9199_v25 = vunpack.i.l.bf16 %v9198_v59 }
  0xf7   : > { %v1120_v37 = vsel %vm1107_vm11, %v1103_v8, %v9204_v39  ;;  %v1121_v53 = vsel %vm1107_vm11, %v1104_v48, %v9205_v41  ;;  %v1035_v56 = vsel %vm1022_vm8, %v1018_v50, %v9199_v25  ;;  %v1036_v57 = vsel %vm1022_vm8, %v1019_v26, %v9200_v38 }
  0xf8   : > { %v9208_v6 = vpop.permute.xlu1 %9207  ;;  %v9213_v34 = vpop.permute.xlu0 %9212 }
  0xf9   : > { %v9210_v40 = vunpack.i.h.bf16 %v9208_v6  ;;  %v9209_v21 = vunpack.i.l.bf16 %v9208_v6  ;;  %v9215_v45 = vunpack.i.h.bf16 %v9213_v34  ;;  %v9214_v27 = vunpack.i.l.bf16 %v9213_v34  ;;  %v9547_v34 = vld [vmem:[%s9697_s18 + $0xb0] sm:$0xff] }
  0xfb   : > { %v1137_v51 = vsel %vm1124_vm12, %v1120_v37, %v9214_v27  ;;  %v1138_v42 = vsel %vm1124_vm12, %v1121_v53, %v9215_v45  ;;  %v1052_v63 = vsel %vm1039_vm10, %v1035_v56, %v9209_v21  ;;  %v1053_v30 = vsel %vm1039_vm10, %v1036_v57, %v9210_v40  ;;  %v9548_v21 = vld [vmem:[%s9697_s18 + $0xa8] sm:$0xff] }
  0xfc   : > { %v9218_v43 = vpop.permute.xlu1 %9217  ;;  %v1154_v60 = vsel %vm1141_vm14, %v1137_v51, 0.0  ;;  %v1155_v61 = vsel %vm1141_vm14, %v1138_v42, 0.0  ;;  %v9223_v3 = vpop.permute.xlu0 %9222 }
  0xfd   : > { %v9220_v62 = vunpack.i.h.bf16 %v9218_v43  ;;  %v9219_v1 = vunpack.i.l.bf16 %v9218_v43  ;;  %v11003_v55 = vpack.c.bf16 %v1155_v61, %v1154_v60  ;;  %v9225_v18 = vunpack.i.h.bf16 %v9223_v3 }
  0xfe   : > { %v9224_v13 = vunpack.i.l.bf16 %v9223_v3 }
  0xff   : > { %v1069_v52 = vsel %vm1056_vm13, %v1052_v63, %v9219_v1  ;;  %v1070_v2 = vsel %vm1056_vm13, %v1053_v30, %v9220_v62  ;;  %7917 = vmatprep.mubr.msk.bf16.mxu0 %vm1056_vm13, %v11003_v55  ;;  %7925 = vmatprep.mubr.msk.bf16.mxu1 %vm1056_vm13, %v11003_v55  ;;  %v1021_v40 = vsel %vm1005_vm7, %v9547_v34, %v9225_v18 }
 0x100   : > { %v9228_v5 = vpop.permute.xlu1 %9227  ;;  %v1086_v15 = vsel %vm1073_vm15, %v1069_v52, %v9189_v11  ;;  %v9233_v17 = vpop.permute.xlu0 %9232  ;;  %v1087_v19 = vsel %vm1073_vm15, %v1070_v2, %v9190_v44  ;;  %v1020_v45 = vsel %vm1005_vm7, %v9548_v21, %v9224_v13  ;;  %v11054_v52 = vld [vmem:[%s12864_s3] sm:$0xff]   ;;  %v11059_v2 = vld [vmem:[%s12864_s3 + $0x48] sm:$0xff]  }
 0x101   : > { %v11013_v7 = vpack.c.bf16 %v1087_v19, %v1086_v15  ;;  %v9230_v9 = vunpack.i.h.bf16 %v9228_v5  ;;  %v9229_v22 = vunpack.i.l.bf16 %v9228_v5  ;;  %v9235_v23 = vunpack.i.h.bf16 %v9233_v17  ;;  %v11093_v5 = vld [vmem:[%s12864_s3 + $0x58] sm:$0xff]   ;;  %v11140_v19 = vld [vmem:[%s12864_s3 + $0x28] sm:$0xff]  }
 0x102   : > { %v9234_v24 = vunpack.i.l.bf16 %v9233_v17  ;;  %v11106_v15 = vld [vmem:[%s12864_s3 + $0x18] sm:$0xff]   ;;  %v11127_v17 = vld [vmem:[%s12864_s3 + $0x68] sm:$0xff]  }
 0x103   : > { %2005 = vmatmul.mubr.bf16.gmra.mrb[24].mxu0 %v11013_v7  ;;  %2118 = vmatmul.mubr.bf16.gmra.mrb[24].mxu1 %v11013_v7  ;;  %v1106_v41 = vsel %vm1090_vm9, %v9230_v9, %v9235_v23 }
 0x104   : > { %v9238_v12 = vpop.permute.xlu1 %9237  ;;  %v9243_v59 = vpop.permute.xlu0 %9242  ;;  %v1105_v39 = vsel %vm1090_vm9, %v9229_v22, %v9234_v24 }
 0x105   : > { %v9245_v11 = vunpack.i.h.bf16 %v9243_v59  ;;  %v9244_v14 = vunpack.i.l.bf16 %v9243_v59  ;;  %v9240_v28 = vunpack.i.h.bf16 %v9238_v12  ;;  %v9239_v44 = vunpack.i.l.bf16 %v9238_v12  ;;  %v11161_v12 = vld [vmem:[%s12864_s3 + $0x78] sm:$0xff]  }
 0x107   : > { %v1122_v27 = vsel %vm1107_vm11, %v1105_v39, %v9244_v14  ;;  %v1123_v47 = vsel %vm1107_vm11, %v1106_v41, %v9245_v11  ;;  %v1037_v26 = vsel %vm1022_vm8, %v1020_v45, %v9239_v44  ;;  %v1038_v49 = vsel %vm1022_vm8, %v1021_v40, %v9240_v28 }
 0x108   : > { %v9248_v32 = vpop.permute.xlu1 %9247  ;;  %v9253_v38 = vpop.permute.xlu0 %9252 }
 0x109   : > { %v9250_v25 = vunpack.i.h.bf16 %v9248_v32  ;;  %v9249_v6 = vunpack.i.l.bf16 %v9248_v32  ;;  %v9255_v48 = vunpack.i.h.bf16 %v9253_v38  ;;  %v9254_v8 = vunpack.i.l.bf16 %v9253_v38 }
 0x10b   : > { %v1139_v50 = vsel %vm1124_vm12, %v1122_v27, %v9254_v8  ;;  %v1140_v37 = vsel %vm1124_vm12, %v1123_v47, %v9255_v48  ;;  %v1054_v43 = vsel %vm1039_vm10, %v1037_v26, %v9249_v6  ;;  %v1055_v60 = vsel %vm1039_vm10, %v1038_v49, %v9250_v25 }
 0x10c   : > { %v9258_v53 = vpop.permute.xlu1 %9257  ;;  %v1156_v56 = vsel %vm1141_vm14, %v1139_v50, 0.0  ;;  %v1157_v57 = vsel %vm1141_vm14, %v1140_v37, 0.0 }
 0x10d   : > { %v9260_v51 = vunpack.i.h.bf16 %v9258_v53  ;;  %v9259_v42 = vunpack.i.l.bf16 %v9258_v53  ;;  %v11033_v61 = vpack.c.bf16 %v1157_v57, %v1156_v56 }
 0x10f   : > { %v1071_v62 = vsel %vm1056_vm13, %v1054_v43, %v9259_v42  ;;  %v1072_v1 = vsel %vm1056_vm13, %v1055_v60, %v9260_v51  ;;  %7918 = vmatprep.mubr.msk.bf16.mxu0 %vm1056_vm13, %v11033_v61  ;;  %7926 = vmatprep.mubr.msk.bf16.mxu1 %vm1056_vm13, %v11033_v61 }
 0x110   : > { %v1088_v3 = vsel %vm1073_vm15, %v1071_v62, %v9229_v22  ;;  %v1089_v63 = vsel %vm1073_vm15, %v1072_v1, %v9230_v9  ;;  %v11174_v9 = vld [vmem:[%s12864_s3 + $0x38] sm:$0xff]  }
 0x111   : > { %v11043_v30 = vpack.c.bf16 %v1089_v63, %v1088_v3 }
 0x113   : > { %2015 = vmatmul.mubr.bf16.gmra.mrb[28].mxu0 %v11043_v30  ;;  %2128 = vmatmul.mubr.bf16.gmra.mrb[28].mxu1 %v11043_v30 }
 0x114   : > { %7927 = vmatprep.mubr.msk.bf16.mxu0 %vm1056_vm13, %v10428_v35  ;;  %7935 = vmatprep.mubr.msk.bf16.mxu1 %vm1056_vm13, %v10428_v35  ;;  %v11072_v35 = vld [vmem:[%s12864_s3 + $0x8] sm:$0xff]  }
 0x11b   : > { %2171 = vmatmul.mubr.bf16.vlgmr.msra.gmra.mrb[32].mxu0 %v10462_v36  ;;  %2284 = vmatmul.mubr.bf16.vlgmr.msra.gmra.mrb[32].mxu1 %v10462_v36  ;;  %v11079_v36 = vld [vmem:[%s12864_s3 + $0x50] sm:$0xff]  }
 0x11c   : > { %7928 = vmatprep.mubr.msk.bf16.mxu0 %vm1056_vm13, %v10576_v31  ;;  %7936 = vmatprep.mubr.msk.bf16.mxu1 %vm1056_vm13, %v10576_v31  ;;  %v11086_v31 = vld [vmem:[%s12864_s3 + $0x10] sm:$0xff]  }
 0x11d   : > { %8219 = vmatpush3.bf16.msra.mxu0 %v11054_v52  ;;  %8283 = vmatpush3.bf16.msra.mxu1 %v11054_v52 }
 0x11e   : > { %8220 = vmatprep.subr.bf16.mxu0 %v11059_v2  ;;  %8284 = vmatprep.subr.bf16.mxu1 %v11059_v2 }
 0x121   : > { %8221 = vmatpush3.bf16.msra.mxu0 %v11072_v35  ;;  %8285 = vmatpush3.bf16.msra.mxu1 %v11072_v35 }
 0x122   : > { %8222 = vmatprep.subr.bf16.mxu0 %v11079_v36  ;;  %8286 = vmatprep.subr.bf16.mxu1 %v11079_v36 }
 0x123   : > { %2181 = vmatmul.mubr.bf16.gmra.mrb[36].mxu0 %v10641_v54  ;;  %2294 = vmatmul.mubr.bf16.gmra.mrb[36].mxu1 %v10641_v54  ;;  %v11113_v54 = vld [vmem:[%s12864_s3 + $0x60] sm:$0xff]  }
 0x124   : > { %7929 = vmatprep.mubr.msk.bf16.mxu0 %vm1056_vm13, %v10739_v4  ;;  %7937 = vmatprep.mubr.msk.bf16.mxu1 %vm1056_vm13, %v10739_v4  ;;  %v11120_v4 = vld [vmem:[%s12864_s3 + $0x20] sm:$0xff]  }
 0x125   : > { %8223 = vmatpush3.bf16.msra.mxu0 %v11086_v31  ;;  %8287 = vmatpush3.bf16.msra.mxu1 %v11086_v31 }
 0x126   : > { %8224 = vmatprep.subr.bf16.mxu0 %v11093_v5  ;;  %8288 = vmatprep.subr.bf16.mxu1 %v11093_v5 }
 0x129   : > { %8225 = vmatpush3.bf16.msra.mxu0 %v11106_v15  ;;  %8289 = vmatpush3.bf16.msra.mxu1 %v11106_v15 }
 0x12a   : > { %8226 = vmatprep.subr.bf16.mxu0 %v11113_v54  ;;  %8290 = vmatprep.subr.bf16.mxu1 %v11113_v54 }
 0x12b   : > { %2191 = vmatmul.mubr.bf16.gmra.mrb[40].mxu0 %v10802_v10  ;;  %2304 = vmatmul.mubr.bf16.gmra.mrb[40].mxu1 %v10802_v10  ;;  %v11147_v10 = vld [vmem:[%s12864_s3 + $0x70] sm:$0xff]  }
 0x12c   : > { %7930 = vmatprep.mubr.msk.bf16.mxu0 %vm1056_vm13, %v10892_v20  ;;  %7938 = vmatprep.mubr.msk.bf16.mxu1 %vm1056_vm13, %v10892_v20  ;;  %v11154_v20 = vld [vmem:[%s12864_s3 + $0x30] sm:$0xff]  }
 0x12d   : > { %8227 = vmatpush3.bf16.msra.mxu0 %v11120_v4  ;;  %8291 = vmatpush3.bf16.msra.mxu1 %v11120_v4 }
 0x12e   : > { %8228 = vmatprep.subr.bf16.mxu0 %v11127_v17  ;;  %8292 = vmatprep.subr.bf16.mxu1 %v11127_v17 }
 0x131   : > { %8229 = vmatpush3.bf16.msra.mxu0 %v11140_v19  ;;  %8293 = vmatpush3.bf16.msra.mxu1 %v11140_v19 }
 0x132   : > { %8230 = vmatprep.subr.bf16.mxu0 %v11147_v10  ;;  %8294 = vmatprep.subr.bf16.mxu1 %v11147_v10 }
 0x133   : > { %2201 = vmatmul.mubr.bf16.gmra.mrb[44].mxu0 %v10912_v46  ;;  %2314 = vmatmul.mubr.bf16.gmra.mrb[44].mxu1 %v10912_v46  ;;  %v1288_v46 = vlaneseq }
 0x134   : > { %7931 = vmatprep.mubr.msk.bf16.mxu0 %vm1056_vm13, %v10943_v58  ;;  %7939 = vmatprep.mubr.msk.bf16.mxu1 %vm1056_vm13, %v10943_v58 }
 0x135   : > { %8231 = vmatpush3.bf16.msra.mxu0 %v11154_v20  ;;  %8295 = vmatpush3.bf16.msra.mxu1 %v11154_v20 }
 0x136   : > { %8232 = vmatprep.subr.bf16.mxu0 %v11161_v12  ;;  %8296 = vmatprep.subr.bf16.mxu1 %v11161_v12 }
 0x139   : > { %8233 = vmatpush3.bf16.msra.mxu0 %v11174_v9  ;;  %8297 = vmatpush3.bf16.msra.mxu1 %v11174_v9 }
 0x13a   : > { %8346 = vmatprep.subr.bf16.mxu0 %v10921_v33  ;;  %8410 = vmatprep.subr.bf16.mxu1 %v10921_v33  ;;  %v11202_v33 = vshrl.u32 %v1288_v46, 7 }
 0x13b   : > { %2211 = vmatmul.mubr.bf16.gmra.mrb[48].mxu0 %v10953_v29  ;;  %2324 = vmatmul.mubr.bf16.gmra.mrb[48].mxu1 %v10953_v29 }
 0x13c   : > { %7932 = vmatprep.mubr.msk.bf16.mxu0 %vm1056_vm13, %v10973_v16  ;;  %7940 = vmatprep.mubr.msk.bf16.mxu1 %vm1056_vm13, %v10973_v16  ;;  %v1290_v58 = vsub.s32 0, %v11202_v33  ;;  %v1298_v29 = vsub.s32 2, %v11202_v33  ;;  %v11209_v16 = vld [vmem:[%s12863_s2] sm:$0xff] }
 0x13e   : > { %v11221_v22 = vrot.slane %v11209_v16, %v1298_v29 }
 0x143   : > { %2221 = vmatmul.mubr.bf16.gmra.mrb[52].mxu0 %v10983_v0  ;;  %2334 = vmatmul.mubr.bf16.gmra.mrb[52].mxu1 %v10983_v0  ;;  %v1294_v0 = vsub.s32 1, %v11202_v33 }
 0x144   : > { %7933 = vmatprep.mubr.msk.bf16.mxu0 %vm1056_vm13, %v11003_v55  ;;  %7941 = vmatprep.mubr.msk.bf16.mxu1 %vm1056_vm13, %v11003_v55  ;;  %v1302_v55 = vsub.s32 3, %v11202_v33 }
 0x145   : > { %v11226_v23 = vrot.slane %v11209_v16, %v1294_v0 }
 0x146   : > { %v11231_v24 = vrot.slane %v11209_v16, %v1302_v55 }
 0x14b   : > { %2231 = vmatmul.mubr.bf16.gmra.mrb[56].mxu0 %v11013_v7  ;;  %2344 = vmatmul.mubr.bf16.gmra.mrb[56].mxu1 %v11013_v7  ;;  %v11216_v7 = vrot.slane %v11209_v16, %v1290_v58 }
 0x14c   : > { %7934 = vmatprep.mubr.msk.bf16.mxu0 %vm1056_vm13, %v11033_v61  ;;  %7942 = vmatprep.mubr.msk.bf16.mxu1 %vm1056_vm13, %v11033_v61 }
 0x153   : > { %2241 = vmatmul.mubr.bf16.gmra.mrb[60].mxu0 %v11043_v30  ;;  %2354 = vmatmul.mubr.bf16.gmra.mrb[60].mxu1 %v11043_v30 }
 0x176   : > { %v1946_v59 = vpop.f32.mrb[0].mxu0  ;;  %v2059_v18 = vpop.f32.mrb[0].mxu1 }
 0x177   : > { %v1947_v13 = vadd.f32 %v1946_v59, %v11216_v7  ;;  %v2060_v11 = vadd.f32 %v2059_v18, %v11221_v22  ;;  %v1948_v14 = vpop.f32.mrb[1].mxu0  ;;  %v2061_v28 = vpop.f32.mrb[1].mxu1 }
 0x178   : > { %v1949_v44 = vadd.f32 %v1948_v14, %v11226_v23  ;;  %v2062_v32 = vadd.f32 %v2061_v28, %v11231_v24  ;;  %v1950_v41 = vpop.f32.mrb[2].mxu0  ;;  %v2063_v39 = vpop.f32.mrb[2].mxu1 }
 0x179   : > { %v1951_v38 = vadd.f32 %v1950_v41, %v11216_v7  ;;  %v2064_v25 = vadd.f32 %v2063_v39, %v11221_v22  ;;  %v1952_v6 = vpop.f32.mrb[3].mxu0  ;;  %v2065_v48 = vpop.f32.mrb[3].mxu1  ;;  %v2364_v40 = vmax.f32 %v1947_v13, 0.0  ;;  %v2366_v21 = vmax.f32 %v2060_v11, 0.0 }
 0x17a   : > { %v1953_v8 = vadd.f32 %v1952_v6, %v11226_v23  ;;  %v2066_v34 = vadd.f32 %v2065_v48, %v11231_v24  ;;  %v2365_v47 = vmax.f32 %v1949_v44, 0.0  ;;  %v2367_v26 = vmax.f32 %v2062_v32, 0.0 }
 0x17b   : > { %v2372_v45 = vmax.f32 %v1951_v38, 0.0  ;;  %v2374_v27 = vmax.f32 %v2064_v25, 0.0 }
 0x17c   : > { %v2373_v49 = vmax.f32 %v1953_v8, 0.0  ;;  %v2375_v50 = vmax.f32 %v2066_v34, 0.0 }
 0x17d   : > { %v2492_v37 = vpack.c.bf16 %v2372_v45, %v2364_v40  ;;  %v2494_v53 = vpack.c.bf16 %v2374_v27, %v2366_v21 }
 0x17e   : > { %v2493_v56 = vpack.c.bf16 %v2373_v49, %v2365_v47  ;;  %v2495_v57 = vpack.c.bf16 %v2375_v50, %v2367_v26 }
 0x180   : > { %2716 = vmatprep.mubr.bf16.mxu0 %v2493_v56  ;;  %2813 = vmatprep.mubr.bf16.mxu1 %v2495_v57 }
 0x181   : > { %2717 = vmatmul.mubr.bf16.vlgmr.msra.gmra.mrb[64].mxu0 %v2492_v37  ;;  %2814 = vmatmul.mubr.bf16.vlgmr.msra.gmra.mrb[64].mxu1 %v2494_v53 }
 0x182   : > { %8347 = vmatpush3.bf16.msra.mxu0 %v11054_v52  ;;  %8411 = vmatpush3.bf16.msra.mxu1 %v11054_v52 }
 0x183   : > { %8348 = vmatprep.subr.bf16.mxu0 %v11059_v2  ;;  %8412 = vmatprep.subr.bf16.mxu1 %v11059_v2 }
 0x186   : > { %8349 = vmatpush3.bf16.msra.mxu0 %v11072_v35  ;;  %8413 = vmatpush3.bf16.msra.mxu1 %v11072_v35  ;;  %v1956_v51 = vpop.f32.mrb[4].mxu0  ;;  %v2069_v42 = vpop.f32.mrb[4].mxu1 }
 0x187   : > { %8350 = vmatprep.subr.bf16.mxu0 %v11079_v36  ;;  %8414 = vmatprep.subr.bf16.mxu1 %v11079_v36  ;;  %v1957_v43 = vadd.f32 %v1956_v51, %v11216_v7  ;;  %v2070_v60 = vadd.f32 %v2069_v42, %v11221_v22  ;;  %v1958_v61 = vpop.f32.mrb[5].mxu0  ;;  %v2071_v62 = vpop.f32.mrb[5].mxu1 }
 0x188   : > { %v1959_v1 = vadd.f32 %v1958_v61, %v11226_v23  ;;  %v2072_v3 = vadd.f32 %v2071_v62, %v11231_v24  ;;  %v1960_v63 = vpop.f32.mrb[6].mxu0  ;;  %v2073_v30 = vpop.f32.mrb[6].mxu1 }
 0x189   : > { %v1961_v52 = vadd.f32 %v1960_v63, %v11216_v7  ;;  %v2074_v2 = vadd.f32 %v2073_v30, %v11221_v22  ;;  %v1962_v35 = vpop.f32.mrb[7].mxu0  ;;  %v2075_v46 = vpop.f32.mrb[7].mxu1  ;;  %v2380_v18 = vmax.f32 %v1957_v43, 0.0  ;;  %v2382_v13 = vmax.f32 %v2070_v60, 0.0 }
 0x18a   : > { %8351 = vmatpush3.bf16.msra.mxu0 %v11086_v31  ;;  %8415 = vmatpush3.bf16.msra.mxu1 %v11086_v31  ;;  %v1963_v36 = vadd.f32 %v1962_v35, %v11226_v23  ;;  %v2076_v59 = vadd.f32 %v2075_v46, %v11231_v24  ;;  %v2381_v28 = vmax.f32 %v1959_v1, 0.0  ;;  %v2383_v44 = vmax.f32 %v2072_v3, 0.0 }
 0x18b   : > { %8352 = vmatprep.subr.bf16.mxu0 %v11093_v5  ;;  %8416 = vmatprep.subr.bf16.mxu1 %v11093_v5  ;;  %v2388_v11 = vmax.f32 %v1961_v52, 0.0  ;;  %v2390_v14 = vmax.f32 %v2074_v2, 0.0 }
 0x18c   : > { %v2389_v32 = vmax.f32 %v1963_v36, 0.0  ;;  %v2391_v41 = vmax.f32 %v2076_v59, 0.0 }
 0x18d   : > { %v2500_v39 = vpack.c.bf16 %v2388_v11, %v2380_v18  ;;  %v2502_v38 = vpack.c.bf16 %v2390_v14, %v2382_v13 }
 0x18e   : > { %8353 = vmatpush3.bf16.msra.mxu0 %v11106_v15  ;;  %8417 = vmatpush3.bf16.msra.mxu1 %v11106_v15  ;;  %v2501_v31 = vpack.c.bf16 %v2389_v32, %v2381_v28  ;;  %v2503_v25 = vpack.c.bf16 %v2391_v41, %v2383_v44 }
 0x18f   : > { %8354 = vmatprep.subr.bf16.mxu0 %v11113_v54  ;;  %8418 = vmatprep.subr.bf16.mxu1 %v11113_v54 }
 0x190   : > { %2724 = vmatprep.mubr.bf16.mxu0 %v2501_v31  ;;  %2821 = vmatprep.mubr.bf16.mxu1 %v2503_v25 }
 0x191   : > { %2725 = vmatmul.mubr.bf16.gmra.mrb[68].mxu0 %v2500_v39  ;;  %2822 = vmatmul.mubr.bf16.gmra.mrb[68].mxu1 %v2502_v38 }
 0x192   : > { %8355 = vmatpush3.bf16.msra.mxu0 %v11120_v4  ;;  %8419 = vmatpush3.bf16.msra.mxu1 %v11120_v4 }
 0x193   : > { %8356 = vmatprep.subr.bf16.mxu0 %v11127_v17  ;;  %8420 = vmatprep.subr.bf16.mxu1 %v11127_v17 }
 0x196   : > { %v1966_v5 = vpop.f32.mrb[8].mxu0  ;;  %v2079_v15 = vpop.f32.mrb[8].mxu1  ;;  %8357 = vmatpush3.bf16.msra.mxu0 %v11140_v19  ;;  %8421 = vmatpush3.bf16.msra.mxu1 %v11140_v19 }
 0x197   : > { %v1967_v54 = vadd.f32 %v1966_v5, %v11216_v7  ;;  %v2080_v6 = vadd.f32 %v2079_v15, %v11221_v22  ;;  %v1968_v48 = vpop.f32.mrb[9].mxu0  ;;  %v2081_v8 = vpop.f32.mrb[9].mxu1  ;;  %8358 = vmatprep.subr.bf16.mxu0 %v11147_v10  ;;  %8422 = vmatprep.subr.bf16.mxu1 %v11147_v10 }
 0x198   : > { %v1969_v4 = vadd.f32 %v1968_v48, %v11226_v23  ;;  %v2082_v17 = vadd.f32 %v2081_v8, %v11231_v24  ;;  %v1970_v34 = vpop.f32.mrb[10].mxu0  ;;  %v2083_v40 = vpop.f32.mrb[10].mxu1 }
 0x199   : > { %v1971_v21 = vadd.f32 %v1970_v34, %v11216_v7  ;;  %v2084_v19 = vadd.f32 %v2083_v40, %v11221_v22  ;;  %v1972_v45 = vpop.f32.mrb[11].mxu0  ;;  %v2085_v27 = vpop.f32.mrb[11].mxu1  ;;  %v2396_v10 = vmax.f32 %v1967_v54, 0.0  ;;  %v2398_v49 = vmax.f32 %v2080_v6, 0.0 }
 0x19a   : > { %v1973_v47 = vadd.f32 %v1972_v45, %v11226_v23  ;;  %v2086_v26 = vadd.f32 %v2085_v27, %v11231_v24  ;;  %8359 = vmatpush3.bf16.msra.mxu0 %v11154_v20  ;;  %8423 = vmatpush3.bf16.msra.mxu1 %v11154_v20  ;;  %v2397_v53 = vmax.f32 %v1969_v4, 0.0  ;;  %v2399_v56 = vmax.f32 %v2082_v17, 0.0 }
 0x19b   : > { %v2404_v50 = vmax.f32 %v1971_v21, 0.0  ;;  %v2406_v37 = vmax.f32 %v2084_v19, 0.0  ;;  %8360 = vmatprep.subr.bf16.mxu0 %v11161_v12  ;;  %8424 = vmatprep.subr.bf16.mxu1 %v11161_v12 }
 0x19c   : > { %v2405_v57 = vmax.f32 %v1973_v47, 0.0  ;;  %v2407_v51 = vmax.f32 %v2086_v26, 0.0 }
 0x19d   : > { %v2508_v42 = vpack.c.bf16 %v2404_v50, %v2396_v10  ;;  %v2510_v43 = vpack.c.bf16 %v2406_v37, %v2398_v49 }
 0x19e   : > { %v2509_v60 = vpack.c.bf16 %v2405_v57, %v2397_v53  ;;  %v2511_v61 = vpack.c.bf16 %v2407_v51, %v2399_v56  ;;  %8361 = vmatpush3.bf16.msra.mxu0 %v11174_v9  ;;  %8425 = vmatpush3.bf16.msra.mxu1 %v11174_v9 }
 0x1a0   : > { %2732 = vmatprep.mubr.bf16.mxu0 %v2509_v60  ;;  %2829 = vmatprep.mubr.bf16.mxu1 %v2511_v61 }
 0x1a1   : > { %2733 = vmatmul.mubr.bf16.gmra.mrb[72].mxu0 %v2508_v42  ;;  %2830 = vmatmul.mubr.bf16.gmra.mrb[72].mxu1 %v2510_v43 }
 0x1a6   : > { %v1976_v20 = vpop.f32.mrb[12].mxu0  ;;  %v2089_v62 = vpop.f32.mrb[12].mxu1 }
 0x1a7   : > { %v1977_v12 = vadd.f32 %v1976_v20, %v11216_v7  ;;  %v2090_v1 = vadd.f32 %v2089_v62, %v11221_v22  ;;  %v1978_v3 = vpop.f32.mrb[13].mxu0  ;;  %v2091_v63 = vpop.f32.mrb[13].mxu1 }
 0x1a8   : > { %v1979_v30 = vadd.f32 %v1978_v3, %v11226_v23  ;;  %v2092_v52 = vadd.f32 %v2091_v63, %v11231_v24  ;;  %v1980_v2 = vpop.f32.mrb[14].mxu0  ;;  %v2093_v35 = vpop.f32.mrb[14].mxu1 }
 0x1a9   : > { %v1981_v9 = vadd.f32 %v1980_v2, %v11216_v7  ;;  %v2094_v46 = vadd.f32 %v2093_v35, %v11221_v22  ;;  %v1982_v36 = vpop.f32.mrb[15].mxu0  ;;  %v2095_v59 = vpop.f32.mrb[15].mxu1  ;;  %v2412_v11 = vmax.f32 %v1977_v12, 0.0  ;;  %v2414_v14 = vmax.f32 %v2090_v1, 0.0 }
 0x1aa   : > { %v1983_v18 = vadd.f32 %v1982_v36, %v11226_v23  ;;  %v2096_v13 = vadd.f32 %v2095_v59, %v11231_v24  ;;  %v2413_v32 = vmax.f32 %v1979_v30, 0.0  ;;  %v2415_v41 = vmax.f32 %v2092_v52, 0.0 }
 0x1ab   : > { %v2420_v28 = vmax.f32 %v1981_v9, 0.0  ;;  %v2422_v44 = vmax.f32 %v2094_v46, 0.0 }
 0x1ac   : > { %v2421_v39 = vmax.f32 %v1983_v18, 0.0  ;;  %v2423_v38 = vmax.f32 %v2096_v13, 0.0 }
 0x1ad   : > { %v2516_v31 = vpack.c.bf16 %v2420_v28, %v2412_v11  ;;  %v2518_v25 = vpack.c.bf16 %v2422_v44, %v2414_v14 }
 0x1ae   : > { %v2517_v5 = vpack.c.bf16 %v2421_v39, %v2413_v32  ;;  %v2519_v15 = vpack.c.bf16 %v2423_v38, %v2415_v41 }
 0x1b0   : > { %2740 = vmatprep.mubr.bf16.mxu0 %v2517_v5  ;;  %2837 = vmatprep.mubr.bf16.mxu1 %v2519_v15 }
 0x1b1   : > { %2741 = vmatmul.mubr.bf16.gmra.mrb[76].mxu0 %v2516_v31  ;;  %2838 = vmatmul.mubr.bf16.gmra.mrb[76].mxu1 %v2518_v25 }
 0x1b6   : > { %v1986_v54 = vpop.f32.mrb[16].mxu0  ;;  %v2099_v6 = vpop.f32.mrb[16].mxu1 }
 0x1b7   : > { %v1987_v48 = vadd.f32 %v1986_v54, %v11216_v7  ;;  %v2100_v8 = vadd.f32 %v2099_v6, %v11221_v22  ;;  %v1988_v4 = vpop.f32.mrb[17].mxu0  ;;  %v2101_v17 = vpop.f32.mrb[17].mxu1 }
 0x1b8   : > { %v1989_v34 = vadd.f32 %v1988_v4, %v11226_v23  ;;  %v2102_v40 = vadd.f32 %v2101_v17, %v11231_v24  ;;  %v1990_v21 = vpop.f32.mrb[18].mxu0  ;;  %v2103_v19 = vpop.f32.mrb[18].mxu1 }
 0x1b9   : > { %v1991_v45 = vadd.f32 %v1990_v21, %v11216_v7  ;;  %v2104_v27 = vadd.f32 %v2103_v19, %v11221_v22  ;;  %v1992_v47 = vpop.f32.mrb[19].mxu0  ;;  %v2105_v26 = vpop.f32.mrb[19].mxu1  ;;  %v2428_v50 = vmax.f32 %v1987_v48, 0.0  ;;  %v2430_v37 = vmax.f32 %v2100_v8, 0.0 }
 0x1ba   : > { %v1993_v10 = vadd.f32 %v1992_v47, %v11226_v23  ;;  %v2106_v49 = vadd.f32 %v2105_v26, %v11231_v24  ;;  %v2429_v57 = vmax.f32 %v1989_v34, 0.0  ;;  %v2431_v51 = vmax.f32 %v2102_v40, 0.0 }
 0x1bb   : > { %v2436_v53 = vmax.f32 %v1991_v45, 0.0  ;;  %v2438_v56 = vmax.f32 %v2104_v27, 0.0 }
 0x1bc   : > { %v2437_v42 = vmax.f32 %v1993_v10, 0.0  ;;  %v2439_v43 = vmax.f32 %v2106_v49, 0.0 }
 0x1bd   : > { %v2524_v60 = vpack.c.bf16 %v2436_v53, %v2428_v50  ;;  %v2526_v61 = vpack.c.bf16 %v2438_v56, %v2430_v37 }
 0x1be   : > { %v2525_v20 = vpack.c.bf16 %v2437_v42, %v2429_v57  ;;  %v2527_v62 = vpack.c.bf16 %v2439_v43, %v2431_v51 }
 0x1c0   : > { %2748 = vmatprep.mubr.bf16.mxu0 %v2525_v20  ;;  %2845 = vmatprep.mubr.bf16.mxu1 %v2527_v62 }
 0x1c1   : > { %2749 = vmatmul.mubr.bf16.gmra.mrb[80].mxu0 %v2524_v60  ;;  %2846 = vmatmul.mubr.bf16.gmra.mrb[80].mxu1 %v2526_v61 }
 0x1c6   : > { %v1996_v12 = vpop.f32.mrb[20].mxu0  ;;  %v2109_v1 = vpop.f32.mrb[20].mxu1 }
 0x1c7   : > { %v1997_v3 = vadd.f32 %v1996_v12, %v11216_v7  ;;  %v2110_v63 = vadd.f32 %v2109_v1, %v11221_v22  ;;  %v1998_v30 = vpop.f32.mrb[21].mxu0  ;;  %v2111_v52 = vpop.f32.mrb[21].mxu1 }
 0x1c8   : > { %v1999_v2 = vadd.f32 %v1998_v30, %v11226_v23  ;;  %v2112_v35 = vadd.f32 %v2111_v52, %v11231_v24  ;;  %v2000_v9 = vpop.f32.mrb[22].mxu0  ;;  %v2113_v46 = vpop.f32.mrb[22].mxu1 }
 0x1c9   : > { %v2001_v36 = vadd.f32 %v2000_v9, %v11216_v7  ;;  %v2114_v59 = vadd.f32 %v2113_v46, %v11221_v22  ;;  %v2002_v18 = vpop.f32.mrb[23].mxu0  ;;  %v2115_v13 = vpop.f32.mrb[23].mxu1  ;;  %v2444_v28 = vmax.f32 %v1997_v3, 0.0  ;;  %v2446_v44 = vmax.f32 %v2110_v63, 0.0 }
 0x1ca   : > { %v2003_v11 = vadd.f32 %v2002_v18, %v11226_v23  ;;  %v2116_v14 = vadd.f32 %v2115_v13, %v11231_v24  ;;  %v2445_v39 = vmax.f32 %v1999_v2, 0.0  ;;  %v2447_v38 = vmax.f32 %v2112_v35, 0.0 }
 0x1cb   : > { %v2452_v32 = vmax.f32 %v2001_v36, 0.0  ;;  %v2454_v41 = vmax.f32 %v2114_v59, 0.0  ;;  %v1306_v3 = vsub.s32 4, %v11202_v33  ;;  %v1314_v63 = vsub.s32 6, %v11202_v33 }
 0x1cc   : > { %v2453_v31 = vmax.f32 %v2003_v11, 0.0  ;;  %v2455_v25 = vmax.f32 %v2116_v14, 0.0  ;;  %v1310_v2 = vsub.s32 5, %v11202_v33  ;;  %v1318_v35 = vsub.s32 7, %v11202_v33 }
 0x1cd   : > { %v2532_v5 = vpack.c.bf16 %v2452_v32, %v2444_v28  ;;  %v2534_v15 = vpack.c.bf16 %v2454_v41, %v2446_v44 }
 0x1ce   : > { %v2533_v54 = vpack.c.bf16 %v2453_v31, %v2445_v39  ;;  %v2535_v6 = vpack.c.bf16 %v2455_v25, %v2447_v38  ;;  %v11330_v39 = vrot.slane %v11209_v16, %v1306_v3  ;;  %v11333_v38 = vrot.slane %v11209_v16, %v1314_v63 }
 0x1d0   : > { %2756 = vmatprep.mubr.bf16.mxu0 %v2533_v54  ;;  %2853 = vmatprep.mubr.bf16.mxu1 %v2535_v6 }
 0x1d1   : > { %2757 = vmatmul.mubr.bf16.gmra.mrb[84].mxu0 %v2532_v5  ;;  %2854 = vmatmul.mubr.bf16.gmra.mrb[84].mxu1 %v2534_v15  ;;  %v11338_v5 = vrot.slane %v11209_v16, %v1310_v2  ;;  %v11341_v15 = vrot.slane %v11209_v16, %v1318_v35 }
 0x1d6   : > { %v2006_v48 = vpop.f32.mrb[24].mxu0  ;;  %v2119_v8 = vpop.f32.mrb[24].mxu1 }
 0x1d7   : > { %v2007_v4 = vadd.f32 %v2006_v48, %v11216_v7  ;;  %v2120_v17 = vadd.f32 %v2119_v8, %v11221_v22  ;;  %v2008_v34 = vpop.f32.mrb[25].mxu0  ;;  %v2121_v40 = vpop.f32.mrb[25].mxu1 }
 0x1d8   : > { %v2009_v21 = vadd.f32 %v2008_v34, %v11226_v23  ;;  %v2122_v19 = vadd.f32 %v2121_v40, %v11231_v24  ;;  %v2010_v45 = vpop.f32.mrb[26].mxu0  ;;  %v2123_v27 = vpop.f32.mrb[26].mxu1 }
 0x1d9   : > { %v2011_v47 = vadd.f32 %v2010_v45, %v11216_v7  ;;  %v2124_v26 = vadd.f32 %v2123_v27, %v11221_v22  ;;  %v2012_v10 = vpop.f32.mrb[27].mxu0  ;;  %v2125_v49 = vpop.f32.mrb[27].mxu1  ;;  %v2460_v53 = vmax.f32 %v2007_v4, 0.0  ;;  %v2462_v56 = vmax.f32 %v2120_v17, 0.0 }
 0x1da   : > { %v2013_v50 = vadd.f32 %v2012_v10, %v11226_v23  ;;  %v2126_v37 = vadd.f32 %v2125_v49, %v11231_v24  ;;  %v2461_v42 = vmax.f32 %v2009_v21, 0.0  ;;  %v2463_v43 = vmax.f32 %v2122_v19, 0.0 }
 0x1db   : > { %v2468_v57 = vmax.f32 %v2011_v47, 0.0  ;;  %v2470_v51 = vmax.f32 %v2124_v26, 0.0 }
 0x1dc   : > { %v2469_v60 = vmax.f32 %v2013_v50, 0.0  ;;  %v2471_v61 = vmax.f32 %v2126_v37, 0.0 }
 0x1dd   : > { %v2540_v20 = vpack.c.bf16 %v2468_v57, %v2460_v53  ;;  %v2542_v62 = vpack.c.bf16 %v2470_v51, %v2462_v56 }
 0x1de   : > { %v2541_v12 = vpack.c.bf16 %v2469_v60, %v2461_v42  ;;  %v2543_v1 = vpack.c.bf16 %v2471_v61, %v2463_v43 }
 0x1e0   : > { %2764 = vmatprep.mubr.bf16.mxu0 %v2541_v12  ;;  %2861 = vmatprep.mubr.bf16.mxu1 %v2543_v1 }
 0x1e1   : > { %2765 = vmatmul.mubr.bf16.gmra.mrb[88].mxu0 %v2540_v20  ;;  %2862 = vmatmul.mubr.bf16.gmra.mrb[88].mxu1 %v2542_v62 }
 0x1e6   : > { %v2016_v30 = vpop.f32.mrb[28].mxu0  ;;  %v2129_v52 = vpop.f32.mrb[28].mxu1 }
 0x1e7   : > { %v2017_v9 = vadd.f32 %v2016_v30, %v11216_v7  ;;  %v2130_v46 = vadd.f32 %v2129_v52, %v11221_v22  ;;  %v2018_v36 = vpop.f32.mrb[29].mxu0  ;;  %v2131_v59 = vpop.f32.mrb[29].mxu1 }
 0x1e8   : > { %v2019_v18 = vadd.f32 %v2018_v36, %v11226_v23  ;;  %v2132_v13 = vadd.f32 %v2131_v59, %v11231_v24  ;;  %v2020_v11 = vpop.f32.mrb[30].mxu0  ;;  %v2133_v14 = vpop.f32.mrb[30].mxu1 }
 0x1e9   : > { %v2021_v28 = vadd.f32 %v2020_v11, %v11216_v7  ;;  %v2134_v44 = vadd.f32 %v2133_v14, %v11221_v22  ;;  %v2022_v32 = vpop.f32.mrb[31].mxu0  ;;  %v2135_v41 = vpop.f32.mrb[31].mxu1  ;;  %v2476_v7 = vmax.f32 %v2017_v9, 0.0  ;;  %v2478_v22 = vmax.f32 %v2130_v46, 0.0 }
 0x1ea   : > { %v2023_v31 = vadd.f32 %v2022_v32, %v11226_v23  ;;  %v2136_v25 = vadd.f32 %v2135_v41, %v11231_v24  ;;  %v2477_v48 = vmax.f32 %v2019_v18, 0.0  ;;  %v2479_v8 = vmax.f32 %v2132_v13, 0.0 }
 0x1eb   : > { %v2484_v54 = vmax.f32 %v2021_v28, 0.0  ;;  %v2486_v6 = vmax.f32 %v2134_v44, 0.0 }
 0x1ec   : > { %v2485_v4 = vmax.f32 %v2023_v31, 0.0  ;;  %v2487_v17 = vmax.f32 %v2136_v25, 0.0 }
 0x1ed   : > { %v2548_v34 = vpack.c.bf16 %v2484_v54, %v2476_v7  ;;  %v2550_v40 = vpack.c.bf16 %v2486_v6, %v2478_v22 }
 0x1ee   : > { %v2549_v21 = vpack.c.bf16 %v2485_v4, %v2477_v48  ;;  %v2551_v23 = vpack.c.bf16 %v2487_v17, %v2479_v8  ;;  %v2172_v19 = vpop.f32.mrb[32].mxu0  ;;  %v2285_v24 = vpop.f32.mrb[32].mxu1 }
 0x1ef   : > { %v2173_v45 = vadd.f32 %v2172_v19, %v11330_v39  ;;  %v2286_v27 = vadd.f32 %v2285_v24, %v11333_v38  ;;  %v2174_v16 = vpop.f32.mrb[33].mxu0  ;;  %v2287_v47 = vpop.f32.mrb[33].mxu1 }
 0x1f0   : > { %v2175_v26 = vadd.f32 %v2174_v16, %v11338_v5  ;;  %v2288_v10 = vadd.f32 %v2287_v47, %v11341_v15  ;;  %v2176_v49 = vpop.f32.mrb[34].mxu0  ;;  %v2289_v50 = vpop.f32.mrb[34].mxu1  ;;  %2772 = vmatprep.mubr.bf16.mxu0 %v2549_v21  ;;  %2869 = vmatprep.mubr.bf16.mxu1 %v2551_v23 }
 0x1f1   : > { %v2177_v37 = vadd.f32 %v2176_v49, %v11330_v39  ;;  %v2290_v53 = vadd.f32 %v2289_v50, %v11333_v38  ;;  %v2178_v56 = vpop.f32.mrb[35].mxu0  ;;  %v2291_v57 = vpop.f32.mrb[35].mxu1  ;;  %2773 = vmatmul.mubr.bf16.gmra.mrb[92].mxu0 %v2548_v34  ;;  %2870 = vmatmul.mubr.bf16.gmra.mrb[92].mxu1 %v2550_v40  ;;  %v2368_v43 = vmax.f32 %v2173_v45, 0.0  ;;  %v2370_v60 = vmax.f32 %v2286_v27, 0.0 }
 0x1f2   : > { %v2179_v51 = vadd.f32 %v2178_v56, %v11338_v5  ;;  %v2292_v42 = vadd.f32 %v2291_v57, %v11341_v15  ;;  %v2369_v62 = vmax.f32 %v2175_v26, 0.0  ;;  %v2371_v12 = vmax.f32 %v2288_v10, 0.0 }
 0x1f3   : > { %v2376_v61 = vmax.f32 %v2177_v37, 0.0  ;;  %v2378_v20 = vmax.f32 %v2290_v53, 0.0 }
 0x1f4   : > { %v2377_v1 = vmax.f32 %v2179_v51, 0.0  ;;  %v2379_v3 = vmax.f32 %v2292_v42, 0.0 }
 0x1f5   : > { %v2496_v63 = vpack.c.bf16 %v2376_v61, %v2368_v43  ;;  %v2498_v30 = vpack.c.bf16 %v2378_v20, %v2370_v60 }
 0x1f6   : > { %v2497_v52 = vpack.c.bf16 %v2377_v1, %v2369_v62  ;;  %v2499_v2 = vpack.c.bf16 %v2379_v3, %v2371_v12  ;;  %v2182_v35 = vpop.f32.mrb[36].mxu0  ;;  %v2295_v9 = vpop.f32.mrb[36].mxu1 }
 0x1f7   : > { %v2183_v46 = vadd.f32 %v2182_v35, %v11330_v39  ;;  %v2296_v36 = vadd.f32 %v2295_v9, %v11333_v38  ;;  %v2184_v59 = vpop.f32.mrb[37].mxu0  ;;  %v2297_v18 = vpop.f32.mrb[37].mxu1 }
 0x1f8   : > { %v2185_v13 = vadd.f32 %v2184_v59, %v11338_v5  ;;  %v2298_v11 = vadd.f32 %v2297_v18, %v11341_v15  ;;  %v2186_v14 = vpop.f32.mrb[38].mxu0  ;;  %v2299_v28 = vpop.f32.mrb[38].mxu1  ;;  %2910 = vmatprep.mubr.bf16.mxu0 %v2497_v52  ;;  %3007 = vmatprep.mubr.bf16.mxu1 %v2499_v2 }
 0x1f9   : > { %v2187_v44 = vadd.f32 %v2186_v14, %v11330_v39  ;;  %v2300_v32 = vadd.f32 %v2299_v28, %v11333_v38  ;;  %v2188_v41 = vpop.f32.mrb[39].mxu0  ;;  %v2301_v31 = vpop.f32.mrb[39].mxu1  ;;  %2911 = vmatmul.mubr.bf16.vlgmr.msra.gmra.mrb[96].mxu0 %v2496_v63  ;;  %3008 = vmatmul.mubr.bf16.vlgmr.msra.gmra.mrb[96].mxu1 %v2498_v30  ;;  %v2384_v22 = vmax.f32 %v2183_v46, 0.0  ;;  %v2386_v54 = vmax.f32 %v2296_v36, 0.0 }
 0x1fa   : > { %v2189_v25 = vadd.f32 %v2188_v41, %v11338_v5  ;;  %v2302_v7 = vadd.f32 %v2301_v31, %v11341_v15  ;;  %v2385_v8 = vmax.f32 %v2185_v13, 0.0  ;;  %v2387_v4 = vmax.f32 %v2298_v11, 0.0 }
 0x1fb   : > { %v2392_v6 = vmax.f32 %v2187_v44, 0.0  ;;  %v2394_v48 = vmax.f32 %v2300_v32, 0.0 }
 0x1fc   : > { %v2393_v17 = vmax.f32 %v2189_v25, 0.0  ;;  %v2395_v34 = vmax.f32 %v2302_v7, 0.0 }
 0x1fd   : > { %v2504_v40 = vpack.c.bf16 %v2392_v6, %v2384_v22  ;;  %v2506_v21 = vpack.c.bf16 %v2394_v48, %v2386_v54 }
 0x1fe   : > { %v2505_v23 = vpack.c.bf16 %v2393_v17, %v2385_v8  ;;  %v2507_v19 = vpack.c.bf16 %v2395_v34, %v2387_v4  ;;  %v2192_v24 = vpop.f32.mrb[40].mxu0  ;;  %v2305_v45 = vpop.f32.mrb[40].mxu1 }
 0x1ff   : > { %v2193_v27 = vadd.f32 %v2192_v24, %v11330_v39  ;;  %v2306_v16 = vadd.f32 %v2305_v45, %v11333_v38  ;;  %v2194_v47 = vpop.f32.mrb[41].mxu0  ;;  %v2307_v26 = vpop.f32.mrb[41].mxu1 }
 0x200   : > { %v2195_v10 = vadd.f32 %v2194_v47, %v11338_v5  ;;  %v2308_v49 = vadd.f32 %v2307_v26, %v11341_v15  ;;  %v2196_v50 = vpop.f32.mrb[42].mxu0  ;;  %v2309_v37 = vpop.f32.mrb[42].mxu1  ;;  %2918 = vmatprep.mubr.bf16.mxu0 %v2505_v23  ;;  %3015 = vmatprep.mubr.bf16.mxu1 %v2507_v19 }
 0x201   : > { %v2197_v53 = vadd.f32 %v2196_v50, %v11330_v39  ;;  %v2310_v56 = vadd.f32 %v2309_v37, %v11333_v38  ;;  %v2198_v57 = vpop.f32.mrb[43].mxu0  ;;  %v2311_v51 = vpop.f32.mrb[43].mxu1  ;;  %2919 = vmatmul.mubr.bf16.gmra.mrb[100].mxu0 %v2504_v40  ;;  %3016 = vmatmul.mubr.bf16.gmra.mrb[100].mxu1 %v2506_v21  ;;  %v2400_v60 = vmax.f32 %v2193_v27, 0.0  ;;  %v2402_v61 = vmax.f32 %v2306_v16, 0.0 }
 0x202   : > { %v2199_v42 = vadd.f32 %v2198_v57, %v11338_v5  ;;  %v2312_v43 = vadd.f32 %v2311_v51, %v11341_v15  ;;  %v2401_v12 = vmax.f32 %v2195_v10, 0.0  ;;  %v2403_v1 = vmax.f32 %v2308_v49, 0.0 }
 0x203   : > { %v2408_v20 = vmax.f32 %v2197_v53, 0.0  ;;  %v2410_v62 = vmax.f32 %v2310_v56, 0.0 }
 0x204   : > { %v2409_v3 = vmax.f32 %v2199_v42, 0.0  ;;  %v2411_v63 = vmax.f32 %v2312_v43, 0.0 }
 0x205   : > { %v2512_v30 = vpack.c.bf16 %v2408_v20, %v2400_v60  ;;  %v2514_v52 = vpack.c.bf16 %v2410_v62, %v2402_v61 }
 0x206   : > { %v2513_v2 = vpack.c.bf16 %v2409_v3, %v2401_v12  ;;  %v2515_v35 = vpack.c.bf16 %v2411_v63, %v2403_v1  ;;  %v2202_v9 = vpop.f32.mrb[44].mxu0  ;;  %v2315_v46 = vpop.f32.mrb[44].mxu1 }
 0x207   : > { %v2203_v36 = vadd.f32 %v2202_v9, %v11330_v39  ;;  %v2316_v59 = vadd.f32 %v2315_v46, %v11333_v38  ;;  %v2204_v18 = vpop.f32.mrb[45].mxu0  ;;  %v2317_v13 = vpop.f32.mrb[45].mxu1 }
 0x208   : > { %v2205_v11 = vadd.f32 %v2204_v18, %v11338_v5  ;;  %v2318_v14 = vadd.f32 %v2317_v13, %v11341_v15  ;;  %v2206_v28 = vpop.f32.mrb[46].mxu0  ;;  %v2319_v44 = vpop.f32.mrb[46].mxu1  ;;  %2926 = vmatprep.mubr.bf16.mxu0 %v2513_v2  ;;  %3023 = vmatprep.mubr.bf16.mxu1 %v2515_v35 }
 0x209   : > { %v2207_v32 = vadd.f32 %v2206_v28, %v11330_v39  ;;  %v2320_v41 = vadd.f32 %v2319_v44, %v11333_v38  ;;  %v2208_v31 = vpop.f32.mrb[47].mxu0  ;;  %v2321_v25 = vpop.f32.mrb[47].mxu1  ;;  %2927 = vmatmul.mubr.bf16.gmra.mrb[104].mxu0 %v2512_v30  ;;  %3024 = vmatmul.mubr.bf16.gmra.mrb[104].mxu1 %v2514_v52  ;;  %v2416_v54 = vmax.f32 %v2203_v36, 0.0  ;;  %v2418_v6 = vmax.f32 %v2316_v59, 0.0 }
 0x20a   : > { %v2209_v7 = vadd.f32 %v2208_v31, %v11338_v5  ;;  %v2322_v22 = vadd.f32 %v2321_v25, %v11341_v15  ;;  %v2417_v4 = vmax.f32 %v2205_v11, 0.0  ;;  %v2419_v17 = vmax.f32 %v2318_v14, 0.0 }
 0x20b   : > { %v2424_v48 = vmax.f32 %v2207_v32, 0.0  ;;  %v2426_v8 = vmax.f32 %v2320_v41, 0.0 }
 0x20c   : > { %v2425_v34 = vmax.f32 %v2209_v7, 0.0  ;;  %v2427_v40 = vmax.f32 %v2322_v22, 0.0 }
 0x20d   : > { %v2520_v21 = vpack.c.bf16 %v2424_v48, %v2416_v54  ;;  %v2522_v23 = vpack.c.bf16 %v2426_v8, %v2418_v6 }
 0x20e   : > { %v2521_v19 = vpack.c.bf16 %v2425_v34, %v2417_v4  ;;  %v2523_v24 = vpack.c.bf16 %v2427_v40, %v2419_v17  ;;  %v2212_v45 = vpop.f32.mrb[48].mxu0  ;;  %v2325_v27 = vpop.f32.mrb[48].mxu1 }
 0x20f   : > { %v2213_v16 = vadd.f32 %v2212_v45, %v11330_v39  ;;  %v2326_v47 = vadd.f32 %v2325_v27, %v11333_v38  ;;  %v2214_v26 = vpop.f32.mrb[49].mxu0  ;;  %v2327_v10 = vpop.f32.mrb[49].mxu1 }
 0x210   : > { %v2215_v49 = vadd.f32 %v2214_v26, %v11338_v5  ;;  %v2328_v50 = vadd.f32 %v2327_v10, %v11341_v15  ;;  %v2216_v37 = vpop.f32.mrb[50].mxu0  ;;  %v2329_v53 = vpop.f32.mrb[50].mxu1  ;;  %2934 = vmatprep.mubr.bf16.mxu0 %v2521_v19  ;;  %3031 = vmatprep.mubr.bf16.mxu1 %v2523_v24 }
 0x211   : > { %v2217_v56 = vadd.f32 %v2216_v37, %v11330_v39  ;;  %v2330_v57 = vadd.f32 %v2329_v53, %v11333_v38  ;;  %v2218_v51 = vpop.f32.mrb[51].mxu0  ;;  %v2331_v42 = vpop.f32.mrb[51].mxu1  ;;  %2935 = vmatmul.mubr.bf16.gmra.mrb[108].mxu0 %v2520_v21  ;;  %3032 = vmatmul.mubr.bf16.gmra.mrb[108].mxu1 %v2522_v23  ;;  %v2432_v61 = vmax.f32 %v2213_v16, 0.0  ;;  %v2434_v20 = vmax.f32 %v2326_v47, 0.0 }
 0x212   : > { %v2219_v43 = vadd.f32 %v2218_v51, %v11338_v5  ;;  %v2332_v60 = vadd.f32 %v2331_v42, %v11341_v15  ;;  %v2433_v1 = vmax.f32 %v2215_v49, 0.0  ;;  %v2435_v3 = vmax.f32 %v2328_v50, 0.0 }
 0x213   : > { %v2440_v62 = vmax.f32 %v2217_v56, 0.0  ;;  %v2442_v12 = vmax.f32 %v2330_v57, 0.0 }
 0x214   : > { %v2441_v63 = vmax.f32 %v2219_v43, 0.0  ;;  %v2443_v30 = vmax.f32 %v2332_v60, 0.0 }
 0x215   : > { %v2528_v52 = vpack.c.bf16 %v2440_v62, %v2432_v61  ;;  %v2530_v2 = vpack.c.bf16 %v2442_v12, %v2434_v20 }
 0x216   : > { %v2529_v35 = vpack.c.bf16 %v2441_v63, %v2433_v1  ;;  %v2531_v9 = vpack.c.bf16 %v2443_v30, %v2435_v3  ;;  %v2222_v46 = vpop.f32.mrb[52].mxu0  ;;  %v2335_v36 = vpop.f32.mrb[52].mxu1 }
 0x217   : > { %v2223_v59 = vadd.f32 %v2222_v46, %v11330_v39  ;;  %v2336_v18 = vadd.f32 %v2335_v36, %v11333_v38  ;;  %v2224_v13 = vpop.f32.mrb[53].mxu0  ;;  %v2337_v11 = vpop.f32.mrb[53].mxu1 }
 0x218   : > { %v2225_v14 = vadd.f32 %v2224_v13, %v11338_v5  ;;  %v2338_v28 = vadd.f32 %v2337_v11, %v11341_v15  ;;  %v2226_v44 = vpop.f32.mrb[54].mxu0  ;;  %v2339_v32 = vpop.f32.mrb[54].mxu1  ;;  %2942 = vmatprep.mubr.bf16.mxu0 %v2529_v35  ;;  %3039 = vmatprep.mubr.bf16.mxu1 %v2531_v9 }
 0x219   : > { %v2227_v41 = vadd.f32 %v2226_v44, %v11330_v39  ;;  %v2340_v31 = vadd.f32 %v2339_v32, %v11333_v38  ;;  %v2228_v25 = vpop.f32.mrb[55].mxu0  ;;  %v2341_v7 = vpop.f32.mrb[55].mxu1  ;;  %2943 = vmatmul.mubr.bf16.gmra.mrb[112].mxu0 %v2528_v52  ;;  %3040 = vmatmul.mubr.bf16.gmra.mrb[112].mxu1 %v2530_v2  ;;  %v2448_v6 = vmax.f32 %v2223_v59, 0.0  ;;  %v2450_v48 = vmax.f32 %v2336_v18, 0.0 }
 0x21a   : > { %v2229_v22 = vadd.f32 %v2228_v25, %v11338_v5  ;;  %v2342_v54 = vadd.f32 %v2341_v7, %v11341_v15  ;;  %v2449_v17 = vmax.f32 %v2225_v14, 0.0  ;;  %v2451_v34 = vmax.f32 %v2338_v28, 0.0 }
 0x21b   : > { %v2456_v8 = vmax.f32 %v2227_v41, 0.0  ;;  %v2458_v4 = vmax.f32 %v2340_v31, 0.0 }
 0x21c   : > { %v2457_v40 = vmax.f32 %v2229_v22, 0.0  ;;  %v2459_v21 = vmax.f32 %v2342_v54, 0.0 }
 0x21d   : > { %v2536_v23 = vpack.c.bf16 %v2456_v8, %v2448_v6  ;;  %v2538_v19 = vpack.c.bf16 %v2458_v4, %v2450_v48 }
 0x21e   : > { %v2537_v24 = vpack.c.bf16 %v2457_v40, %v2449_v17  ;;  %v2539_v45 = vpack.c.bf16 %v2459_v21, %v2451_v34  ;;  %v2232_v27 = vpop.f32.mrb[56].mxu0  ;;  %v2345_v16 = vpop.f32.mrb[56].mxu1 }
 0x21f   : > { %v2233_v47 = vadd.f32 %v2232_v27, %v11330_v39  ;;  %v2346_v26 = vadd.f32 %v2345_v16, %v11333_v38  ;;  %v2234_v10 = vpop.f32.mrb[57].mxu0  ;;  %v2347_v49 = vpop.f32.mrb[57].mxu1 }
 0x220   : > { %v2235_v50 = vadd.f32 %v2234_v10, %v11338_v5  ;;  %v2348_v37 = vadd.f32 %v2347_v49, %v11341_v15  ;;  %v2236_v53 = vpop.f32.mrb[58].mxu0  ;;  %v2349_v56 = vpop.f32.mrb[58].mxu1  ;;  %2950 = vmatprep.mubr.bf16.mxu0 %v2537_v24  ;;  %3047 = vmatprep.mubr.bf16.mxu1 %v2539_v45 }
 0x221   : > { %v2237_v57 = vadd.f32 %v2236_v53, %v11330_v39  ;;  %v2350_v51 = vadd.f32 %v2349_v56, %v11333_v38  ;;  %v2238_v42 = vpop.f32.mrb[59].mxu0  ;;  %v2351_v43 = vpop.f32.mrb[59].mxu1  ;;  %2951 = vmatmul.mubr.bf16.gmra.mrb[116].mxu0 %v2536_v23  ;;  %3048 = vmatmul.mubr.bf16.gmra.mrb[116].mxu1 %v2538_v19  ;;  %v2464_v20 = vmax.f32 %v2233_v47, 0.0  ;;  %v2466_v62 = vmax.f32 %v2346_v26, 0.0 }
 0x222   : > { %v2239_v60 = vadd.f32 %v2238_v42, %v11338_v5  ;;  %v2352_v61 = vadd.f32 %v2351_v43, %v11341_v15  ;;  %v2465_v3 = vmax.f32 %v2235_v50, 0.0  ;;  %v2467_v63 = vmax.f32 %v2348_v37, 0.0 }
 0x223   : > { %v2472_v12 = vmax.f32 %v2237_v57, 0.0  ;;  %v2474_v1 = vmax.f32 %v2350_v51, 0.0 }
 0x224   : > { %v2473_v30 = vmax.f32 %v2239_v60, 0.0  ;;  %v2475_v52 = vmax.f32 %v2352_v61, 0.0 }
 0x225   : > { %v2544_v2 = vpack.c.bf16 %v2472_v12, %v2464_v20  ;;  %v2546_v35 = vpack.c.bf16 %v2474_v1, %v2466_v62 }
 0x226   : > { %v2545_v9 = vpack.c.bf16 %v2473_v30, %v2465_v3  ;;  %v2547_v46 = vpack.c.bf16 %v2475_v52, %v2467_v63  ;;  %v2242_v36 = vpop.f32.mrb[60].mxu0  ;;  %v2355_v59 = vpop.f32.mrb[60].mxu1  ;;  %v9277_v30 = vld [vmem:[%s12866_s5 + $0x40] sm:$0xff]  }
 0x227   : > { %v2243_v18 = vadd.f32 %v2242_v36, %v11330_v39  ;;  %v2356_v13 = vadd.f32 %v2355_v59, %v11333_v38  ;;  %v2244_v11 = vpop.f32.mrb[61].mxu0  ;;  %v2357_v14 = vpop.f32.mrb[61].mxu1  ;;  %v9278_v52 = vld [vmem:[%s12866_s5] sm:$0xff]   ;;  %8474 = vmatprep.subr.bf16.mxu0 %v9277_v30 }
 0x228   : > { %v2245_v28 = vadd.f32 %v2244_v11, %v11338_v5  ;;  %v2358_v44 = vadd.f32 %v2357_v14, %v11341_v15  ;;  %v2246_v32 = vpop.f32.mrb[62].mxu0  ;;  %v2359_v41 = vpop.f32.mrb[62].mxu1  ;;  %2958 = vmatprep.mubr.bf16.mxu0 %v2545_v9  ;;  %3055 = vmatprep.mubr.bf16.mxu1 %v2547_v46  ;;  %v9280_v59 = vld [vmem:[%s12866_s5 + $0x80] sm:$0xff]  }
 0x229   : > { %v2247_v31 = vadd.f32 %v2246_v32, %v11330_v39  ;;  %v2360_v25 = vadd.f32 %v2359_v41, %v11333_v38  ;;  %v2248_v7 = vpop.f32.mrb[63].mxu0  ;;  %v2361_v22 = vpop.f32.mrb[63].mxu1  ;;  %2959 = vmatmul.mubr.bf16.gmra.mrb[120].mxu0 %v2544_v2  ;;  %3056 = vmatmul.mubr.bf16.gmra.mrb[120].mxu1 %v2546_v35  ;;  %v2480_v48 = vmax.f32 %v2243_v18, 0.0  ;;  %v2482_v8 = vmax.f32 %v2356_v13, 0.0  ;;  %v9279_v2 = vld [vmem:[%s12866_s5 + $0xc0] sm:$0xff]  }
 0x22a   : > { %v2249_v54 = vadd.f32 %v2248_v7, %v11338_v5  ;;  %v2362_v6 = vadd.f32 %v2361_v22, %v11341_v15  ;;  %v2481_v34 = vmax.f32 %v2245_v28, 0.0  ;;  %v2483_v40 = vmax.f32 %v2358_v44, 0.0  ;;  %v11410_v5 = vld [vmem:[%s12865_s4] sm:$0xf]  ;;  %8502 = vmatprep.subr.bf16.mxu1 %v9279_v2  ;;  %8475 = vmatpush3.bf16.msra.mxu0 %v9278_v52 }
 0x22b   : > { %v2488_v4 = vmax.f32 %v2247_v31, 0.0  ;;  %v2490_v17 = vmax.f32 %v2360_v25, 0.0  ;;  %v11415_v27 = vrot.slane %v11410_v5, %v1290_v58  ;;  %v11420_v16 = vrot.slane %v11410_v5, %v1294_v0  ;;  %8503 = vmatpush3.bf16.msra.mxu1 %v9280_v59  ;;  %v9295_v30 = vld [vmem:[%s12866_s5 + $0xe0] sm:$0xff]  }
 0x22c   : > { %v2489_v21 = vmax.f32 %v2249_v54, 0.0  ;;  %v2491_v23 = vmax.f32 %v2362_v6, 0.0  ;;  %v9281_v54 = vld [vmem:[%s12866_s5 + $0x48] sm:$0xff]  }
 0x22d   : > { %v2552_v19 = vpack.c.bf16 %v2488_v4, %v2480_v48  ;;  %v2554_v39 = vpack.c.bf16 %v2490_v17, %v2482_v8  ;;  %v9282_v6 = vld [vmem:[%s12866_s5 + $0x8] sm:$0xff]   ;;  %8476 = vmatprep.subr.bf16.mxu0 %v9281_v54 }
 0x22e   : > { %v2553_v24 = vpack.c.bf16 %v2489_v21, %v2481_v34  ;;  %v2555_v38 = vpack.c.bf16 %v2491_v23, %v2483_v40  ;;  %v9283_v48 = vld [vmem:[%s12866_s5 + $0xc8] sm:$0xff]   ;;  %8477 = vmatpush3.bf16.msra.mxu0 %v9282_v6  ;;  %v9285_v21 = vld [vmem:[%s12866_s5 + $0x50] sm:$0xff]  }
 0x22f   : > { %v9284_v8 = vld [vmem:[%s12866_s5 + $0x88] sm:$0xff]   ;;  %8504 = vmatprep.subr.bf16.mxu1 %v9283_v48  ;;  %v9286_v23 = vld [vmem:[%s12866_s5 + $0x10] sm:$0xff]   ;;  %8478 = vmatprep.subr.bf16.mxu0 %v9285_v21 }
 0x230   : > { %2966 = vmatprep.mubr.bf16.mxu0 %v2553_v24  ;;  %3063 = vmatprep.mubr.bf16.mxu1 %v2555_v38  ;;  %v9299_v54 = vld [vmem:[%s12866_s5 + $0xe8] sm:$0xff]   ;;  %v9301_v48 = vld [vmem:[%s12866_s5 + $0x70] sm:$0xff]  }
 0x231   : > { %2967 = vmatmul.mubr.bf16.gmra.mrb[124].mxu0 %v2552_v19  ;;  %3064 = vmatmul.mubr.bf16.gmra.mrb[124].mxu1 %v2554_v39  ;;  %v9287_v19 = vld [vmem:[%s12866_s5 + $0xd0] sm:$0xff]   ;;  %v9300_v6 = vld [vmem:[%s12866_s5 + $0xa8] sm:$0xff]  }
 0x232   : > { %8505 = vmatpush3.bf16.msra.mxu1 %v9284_v8  ;;  %8479 = vmatpush3.bf16.msra.mxu0 %v9286_v23  ;;  %v9303_v8 = vld [vmem:[%s12866_s5 + $0xf0] sm:$0xff]  }
 0x233   : > { %8506 = vmatprep.subr.bf16.mxu1 %v9287_v19  ;;  %v9306_v19 = vld [vmem:[%s12866_s5 + $0x38] sm:$0xff]  }
 0x254   : > { %v8234_v15 = vpop.f32.mrb[64].mxu0  ;;  %v8298_v45 = vpop.f32.mrb[64].mxu1 }
 0x255   : > { %v8235_v47 = vpop.f32.mrb[65].mxu0  ;;  %v8299_v26 = vpop.f32.mrb[65].mxu1 }
 0x256   : > { %v8236_v10 = vadd.f32 %v8235_v47, %v8234_v15  ;;  %v8300_v49 = vadd.f32 %v8299_v26, %v8298_v45  ;;  %v8237_v50 = vpop.f32.mrb[66].mxu0  ;;  %v8301_v37 = vpop.f32.mrb[66].mxu1  ;;  %v9288_v45 = vld [vmem:[%s12866_s5 + $0x90] sm:$0xff]  }
 0x257   : > { %v8238_v53 = vpop.f32.mrb[67].mxu0  ;;  %v8302_v56 = vpop.f32.mrb[67].mxu1  ;;  %8507 = vmatpush3.bf16.msra.mxu1 %v9288_v45 }
 0x258   : > { %v3094_v57 = vadd.f32 %v8236_v10, %v11415_v27  ;;  %v3095_v51 = vadd.f32 %v8300_v49, %v11420_v16  ;;  %v8239_v42 = vadd.f32 %v8238_v53, %v8237_v50  ;;  %v8303_v58 = vadd.f32 %v8302_v56, %v8301_v37 }
 0x25a   : > { %v3158_v43 = vmax.f32 %v3094_v57, 0.0  ;;  %v3159_v60 = vmax.f32 %v3095_v51, 0.0  ;;  %v3098_v61 = vadd.f32 %v8239_v42, %v11415_v27  ;;  %v3099_v0 = vadd.f32 %v8303_v58, %v11420_v16 }
 0x25c   : > { %3222 = vst [vmem:[#allocation2] sm:$0xff] %v3158_v43  ;;  %3223 = vst [vmem:[#allocation2 + $0x8] sm:$0xff] %v3159_v60  ;;  %v3162_v20 = vmax.f32 %v3098_v61, 0.0  ;;  %v3163_v62 = vmax.f32 %v3099_v0, 0.0  ;;  %v9289_v43 = vld [vmem:[%s12866_s5 + $0x58] sm:$0xff]  }
 0x25d   : > { %v9290_v60 = vld [vmem:[%s12866_s5 + $0x18] sm:$0xff]   ;;  %8480 = vmatprep.subr.bf16.mxu0 %v9289_v43 }
 0x25e   : > { %3226 = vst [vmem:[#allocation2 + $0x20] sm:$0xff] %v3162_v20  ;;  %3227 = vst [vmem:[#allocation2 + $0x28] sm:$0xff] %v3163_v62  ;;  %v9291_v61 = vld [vmem:[%s12866_s5 + $0xd8] sm:$0xff]   ;;  %8481 = vmatpush3.bf16.msra.mxu0 %v9290_v60 }
 0x25f   : > { %v9292_v0 = vld [vmem:[%s12866_s5 + $0x98] sm:$0xff]   ;;  %8508 = vmatprep.subr.bf16.mxu1 %v9291_v61  ;;  %v9309_v61 = vld [vmem:[%s12866_s5 + $0x140] sm:$0xff]  }
 0x260   : > { %8509 = vmatpush3.bf16.msra.mxu1 %v9292_v0  ;;  %v9310_v0 = vld [vmem:[%s12866_s5 + $0x1c0] sm:$0xff]  }
 0x261   : > { %8510 = vmatprep.subr.bf16.mxu1 %v9295_v30 }
 0x264   : > { %v8240_v12 = vpop.f32.mrb[68].mxu0  ;;  %v8304_v1 = vpop.f32.mrb[68].mxu1 }
 0x265   : > { %v8241_v3 = vpop.f32.mrb[69].mxu0  ;;  %v8305_v63 = vpop.f32.mrb[69].mxu1 }
 0x266   : > { %v8242_v35 = vadd.f32 %v8241_v3, %v8240_v12  ;;  %v8306_v9 = vadd.f32 %v8305_v63, %v8304_v1  ;;  %v8243_v46 = vpop.f32.mrb[70].mxu0  ;;  %v8307_v36 = vpop.f32.mrb[70].mxu1  ;;  %v9293_v3 = vld [vmem:[%s12866_s5 + $0x60] sm:$0xff]  }
 0x267   : > { %v8244_v18 = vpop.f32.mrb[71].mxu0  ;;  %v8308_v13 = vpop.f32.mrb[71].mxu1  ;;  %v9294_v63 = vld [vmem:[%s12866_s5 + $0x20] sm:$0xff]   ;;  %8482 = vmatprep.subr.bf16.mxu0 %v9293_v3 }
 0x268   : > { %v3102_v11 = vadd.f32 %v8242_v35, %v11415_v27  ;;  %v3103_v14 = vadd.f32 %v8306_v9, %v11420_v16  ;;  %v8245_v28 = vadd.f32 %v8244_v18, %v8243_v46  ;;  %v8309_v44 = vadd.f32 %v8308_v13, %v8307_v36  ;;  %v9296_v46 = vld [vmem:[%s12866_s5 + $0xa0] sm:$0xff]   ;;  %8483 = vmatpush3.bf16.msra.mxu0 %v9294_v63 }
 0x269   : > { %8511 = vmatpush3.bf16.msra.mxu1 %v9296_v46 }
 0x26a   : > { %v3166_v32 = vmax.f32 %v3102_v11, 0.0  ;;  %v3167_v41 = vmax.f32 %v3103_v14, 0.0  ;;  %v3106_v31 = vadd.f32 %v8245_v28, %v11415_v27  ;;  %v3107_v25 = vadd.f32 %v8309_v44, %v11420_v16  ;;  %8512 = vmatprep.subr.bf16.mxu1 %v9299_v54 }
 0x26c   : > { %3230 = vst [vmem:[#allocation2 + $0x40] sm:$0xff] %v3166_v32  ;;  %3231 = vst [vmem:[#allocation2 + $0x48] sm:$0xff] %v3167_v41  ;;  %v3170_v7 = vmax.f32 %v3106_v31, 0.0  ;;  %v3171_v22 = vmax.f32 %v3107_v25, 0.0 }
 0x26d   : > { %8513 = vmatpush3.bf16.msra.mxu1 %v9300_v6 }
 0x26e   : > { %3234 = vst [vmem:[#allocation2 + $0x60] sm:$0xff] %v3170_v7  ;;  %3235 = vst [vmem:[#allocation2 + $0x68] sm:$0xff] %v3171_v22  ;;  %v9297_v7 = vld [vmem:[%s12866_s5 + $0x68] sm:$0xff]   ;;  %8514 = vmatprep.subr.bf16.mxu1 %v9303_v8 }
 0x26f   : > { %v9298_v22 = vld [vmem:[%s12866_s5 + $0x28] sm:$0xff]   ;;  %8484 = vmatprep.subr.bf16.mxu0 %v9297_v7 }
 0x270   : > { %8485 = vmatpush3.bf16.msra.mxu0 %v9298_v22 }
 0x271   : > { %8486 = vmatprep.subr.bf16.mxu0 %v9301_v48 }
 0x274   : > { %v8246_v4 = vpop.f32.mrb[72].mxu0  ;;  %v8310_v17 = vpop.f32.mrb[72].mxu1 }
 0x275   : > { %v8247_v34 = vpop.f32.mrb[73].mxu0  ;;  %v8311_v40 = vpop.f32.mrb[73].mxu1 }
 0x276   : > { %v8248_v39 = vadd.f32 %v8247_v34, %v8246_v4  ;;  %v8312_v24 = vadd.f32 %v8311_v40, %v8310_v17  ;;  %v8249_v38 = vpop.f32.mrb[74].mxu0  ;;  %v8313_v15 = vpop.f32.mrb[74].mxu1  ;;  %v9302_v4 = vld [vmem:[%s12866_s5 + $0x30] sm:$0xff]   ;;  %v9305_v34 = vld [vmem:[%s12866_s5 + $0x78] sm:$0xff]  }
 0x277   : > { %v8250_v47 = vpop.f32.mrb[75].mxu0  ;;  %v8314_v26 = vpop.f32.mrb[75].mxu1  ;;  %v9304_v17 = vld [vmem:[%s12866_s5 + $0xb0] sm:$0xff]   ;;  %v9307_v40 = vld [vmem:[%s12866_s5 + $0xf8] sm:$0xff]   ;;  %8487 = vmatpush3.bf16.msra.mxu0 %v9302_v4 }
 0x278   : > { %v3110_v10 = vadd.f32 %v8248_v39, %v11415_v27  ;;  %v3111_v49 = vadd.f32 %v8312_v24, %v11420_v16  ;;  %v8251_v50 = vadd.f32 %v8250_v47, %v8249_v38  ;;  %v8315_v37 = vadd.f32 %v8314_v26, %v8313_v15  ;;  %8515 = vmatpush3.bf16.msra.mxu1 %v9304_v17  ;;  %v9308_v38 = vld [vmem:[%s12866_s5 + $0xb8] sm:$0xff]  }
 0x279   : > { %8488 = vmatprep.subr.bf16.mxu0 %v9305_v34  ;;  %8516 = vmatprep.subr.bf16.mxu1 %v9307_v40 }
 0x27a   : > { %v3174_v53 = vmax.f32 %v3110_v10, 0.0  ;;  %v3175_v56 = vmax.f32 %v3111_v49, 0.0  ;;  %v3114_v57 = vadd.f32 %v8251_v50, %v11415_v27  ;;  %v3115_v51 = vadd.f32 %v8315_v37, %v11420_v16 }
 0x27b   : > { %8489 = vmatpush3.bf16.msra.mxu0 %v9306_v19 }
 0x27c   : > { %3238 = vst [vmem:[#allocation2 + $0x80] sm:$0xff] %v3174_v53  ;;  %3239 = vst [vmem:[#allocation2 + $0x88] sm:$0xff] %v3175_v56  ;;  %v3178_v42 = vmax.f32 %v3114_v57, 0.0  ;;  %v3179_v58 = vmax.f32 %v3115_v51, 0.0  ;;  %8517 = vmatpush3.bf16.msra.mxu1 %v9308_v38  ;;  %8530 = vmatprep.subr.bf16.mxu0 %v9309_v61 }
 0x27d   : > { %8558 = vmatprep.subr.bf16.mxu1 %v9310_v0 }
 0x27e   : > { %3242 = vst [vmem:[#allocation2 + $0xa0] sm:$0xff] %v3178_v42  ;;  %3243 = vst [vmem:[#allocation2 + $0xa8] sm:$0xff] %v3179_v58 }
 0x284   : > { %v8252_v20 = vpop.f32.mrb[76].mxu0  ;;  %v8316_v62 = vpop.f32.mrb[76].mxu1 }
 0x285   : > { %v8253_v12 = vpop.f32.mrb[77].mxu0  ;;  %v8317_v1 = vpop.f32.mrb[77].mxu1 }
 0x286   : > { %v8254_v52 = vadd.f32 %v8253_v12, %v8252_v20  ;;  %v8318_v2 = vadd.f32 %v8317_v1, %v8316_v62  ;;  %v8255_v35 = vpop.f32.mrb[78].mxu0  ;;  %v8319_v9 = vpop.f32.mrb[78].mxu1 }
 0x287   : > { %v8256_v36 = vpop.f32.mrb[79].mxu0  ;;  %v8320_v59 = vpop.f32.mrb[79].mxu1 }
 0x288   : > { %v3118_v18 = vadd.f32 %v8254_v52, %v11415_v27  ;;  %v3119_v13 = vadd.f32 %v8318_v2, %v11420_v16  ;;  %v8257_v11 = vadd.f32 %v8256_v36, %v8255_v35  ;;  %v8321_v14 = vadd.f32 %v8320_v59, %v8319_v9 }
 0x28a   : > { %v3182_v28 = vmax.f32 %v3118_v18, 0.0  ;;  %v3183_v44 = vmax.f32 %v3119_v13, 0.0  ;;  %v3122_v32 = vadd.f32 %v8257_v11, %v11415_v27  ;;  %v3123_v41 = vadd.f32 %v8321_v14, %v11420_v16 }
 0x28c   : > { %3246 = vst [vmem:[#allocation2 + $0xc0] sm:$0xff] %v3182_v28  ;;  %3247 = vst [vmem:[#allocation2 + $0xc8] sm:$0xff] %v3183_v44  ;;  %v3186_v31 = vmax.f32 %v3122_v32, 0.0  ;;  %v3187_v25 = vmax.f32 %v3123_v41, 0.0 }
 0x28e   : > { %3250 = vst [vmem:[#allocation2 + $0xe0] sm:$0xff] %v3186_v31  ;;  %3251 = vst [vmem:[#allocation2 + $0xe8] sm:$0xff] %v3187_v25 }
 0x294   : > { %v8258_v21 = vpop.f32.mrb[80].mxu0  ;;  %v8322_v23 = vpop.f32.mrb[80].mxu1 }
 0x295   : > { %v8259_v39 = vpop.f32.mrb[81].mxu0  ;;  %v8323_v24 = vpop.f32.mrb[81].mxu1 }
 0x296   : > { %v8260_v15 = vadd.f32 %v8259_v39, %v8258_v21  ;;  %v8324_v45 = vadd.f32 %v8323_v24, %v8322_v23  ;;  %v8261_v47 = vpop.f32.mrb[82].mxu0  ;;  %v8325_v26 = vpop.f32.mrb[82].mxu1 }
 0x297   : > { %v8262_v10 = vpop.f32.mrb[83].mxu0  ;;  %v8326_v49 = vpop.f32.mrb[83].mxu1 }
 0x298   : > { %v3126_v50 = vadd.f32 %v8260_v15, %v11415_v27  ;;  %v3127_v37 = vadd.f32 %v8324_v45, %v11420_v16  ;;  %v8263_v53 = vadd.f32 %v8262_v10, %v8261_v47  ;;  %v8327_v56 = vadd.f32 %v8326_v49, %v8325_v26 }
 0x29a   : > { %v3190_v57 = vmax.f32 %v3126_v50, 0.0  ;;  %v3191_v51 = vmax.f32 %v3127_v37, 0.0  ;;  %v3130_v42 = vadd.f32 %v8263_v53, %v11415_v27  ;;  %v3131_v58 = vadd.f32 %v8327_v56, %v11420_v16 }
 0x29c   : > { %3254 = vst [vmem:[#allocation2 + $0x100] sm:$0xff] %v3190_v57  ;;  %3255 = vst [vmem:[#allocation2 + $0x108] sm:$0xff] %v3191_v51  ;;  %v3194_v43 = vmax.f32 %v3130_v42, 0.0  ;;  %v3195_v60 = vmax.f32 %v3131_v58, 0.0 }
 0x29e   : > { %3258 = vst [vmem:[#allocation2 + $0x120] sm:$0xff] %v3194_v43  ;;  %3259 = vst [vmem:[#allocation2 + $0x128] sm:$0xff] %v3195_v60 }
 0x2a4   : > { %v8264_v20 = vpop.f32.mrb[84].mxu0  ;;  %v8328_v62 = vpop.f32.mrb[84].mxu1 }
 0x2a5   : > { %v8265_v12 = vpop.f32.mrb[85].mxu0  ;;  %v8329_v1 = vpop.f32.mrb[85].mxu1 }
 0x2a6   : > { %v8266_v3 = vadd.f32 %v8265_v12, %v8264_v20  ;;  %v8330_v63 = vadd.f32 %v8329_v1, %v8328_v62  ;;  %v8267_v30 = vpop.f32.mrb[86].mxu0  ;;  %v8331_v52 = vpop.f32.mrb[86].mxu1 }
 0x2a7   : > { %v8268_v2 = vpop.f32.mrb[87].mxu0  ;;  %v8332_v35 = vpop.f32.mrb[87].mxu1 }
 0x2a8   : > { %v3134_v9 = vadd.f32 %v8266_v3, %v11415_v27  ;;  %v3135_v46 = vadd.f32 %v8330_v63, %v11420_v16  ;;  %v8269_v36 = vadd.f32 %v8268_v2, %v8267_v30  ;;  %v8333_v59 = vadd.f32 %v8332_v35, %v8331_v52 }
 0x2a9   : > { %v11559_v3 = vrot.slane %v11410_v5, %v1298_v29  ;;  %v11564_v63 = vrot.slane %v11410_v5, %v1302_v55 }
 0x2aa   : > { %v3198_v18 = vmax.f32 %v3134_v9, 0.0  ;;  %v3199_v13 = vmax.f32 %v3135_v46, 0.0  ;;  %v3138_v11 = vadd.f32 %v8269_v36, %v11415_v27  ;;  %v3139_v14 = vadd.f32 %v8333_v59, %v11420_v16 }
 0x2ac   : > { %3262 = vst [vmem:[#allocation2 + $0x140] sm:$0xff] %v3198_v18  ;;  %3263 = vst [vmem:[#allocation2 + $0x148] sm:$0xff] %v3199_v13  ;;  %v3202_v28 = vmax.f32 %v3138_v11, 0.0  ;;  %v3203_v44 = vmax.f32 %v3139_v14, 0.0 }
 0x2ae   : > { %3266 = vst [vmem:[#allocation2 + $0x160] sm:$0xff] %v3202_v28  ;;  %3267 = vst [vmem:[#allocation2 + $0x168] sm:$0xff] %v3203_v44 }
 0x2b4   : > { %v8270_v32 = vpop.f32.mrb[88].mxu0  ;;  %v8334_v41 = vpop.f32.mrb[88].mxu1 }
 0x2b5   : > { %v8271_v31 = vpop.f32.mrb[89].mxu0  ;;  %v8335_v25 = vpop.f32.mrb[89].mxu1 }
 0x2b6   : > { %v8272_v7 = vadd.f32 %v8271_v31, %v8270_v32  ;;  %v8336_v22 = vadd.f32 %v8335_v25, %v8334_v41  ;;  %v8273_v54 = vpop.f32.mrb[90].mxu0  ;;  %v8337_v6 = vpop.f32.mrb[90].mxu1 }
 0x2b7   : > { %v8274_v48 = vpop.f32.mrb[91].mxu0  ;;  %v8338_v8 = vpop.f32.mrb[91].mxu1 }
 0x2b8   : > { %v3142_v4 = vadd.f32 %v8272_v7, %v11415_v27  ;;  %v3143_v17 = vadd.f32 %v8336_v22, %v11420_v16  ;;  %v8275_v34 = vadd.f32 %v8274_v48, %v8273_v54  ;;  %v8339_v40 = vadd.f32 %v8338_v8, %v8337_v6 }
 0x2ba   : > { %v3206_v21 = vmax.f32 %v3142_v4, 0.0  ;;  %v3207_v23 = vmax.f32 %v3143_v17, 0.0  ;;  %v3146_v19 = vadd.f32 %v8275_v34, %v11415_v27  ;;  %v3147_v39 = vadd.f32 %v8339_v40, %v11420_v16 }
 0x2bc   : > { %3270 = vst [vmem:[#allocation2 + $0x180] sm:$0xff] %v3206_v21  ;;  %3271 = vst [vmem:[#allocation2 + $0x188] sm:$0xff] %v3207_v23  ;;  %v3210_v24 = vmax.f32 %v3146_v19, 0.0  ;;  %v3211_v38 = vmax.f32 %v3147_v39, 0.0 }
 0x2be   : > { %3274 = vst [vmem:[#allocation2 + $0x1a0] sm:$0xff] %v3210_v24  ;;  %3275 = vst [vmem:[#allocation2 + $0x1a8] sm:$0xff] %v3211_v38 }
 0x2c4   : > { %v8276_v15 = vpop.f32.mrb[92].mxu0  ;;  %v8340_v45 = vpop.f32.mrb[92].mxu1 }
 0x2c5   : > { %v8277_v47 = vpop.f32.mrb[93].mxu0  ;;  %v8341_v26 = vpop.f32.mrb[93].mxu1 }
 0x2c6   : > { %v8278_v10 = vadd.f32 %v8277_v47, %v8276_v15  ;;  %v8342_v49 = vadd.f32 %v8341_v26, %v8340_v45  ;;  %v8279_v50 = vpop.f32.mrb[94].mxu0  ;;  %v8343_v37 = vpop.f32.mrb[94].mxu1 }
 0x2c7   : > { %v8280_v53 = vpop.f32.mrb[95].mxu0  ;;  %v8344_v56 = vpop.f32.mrb[95].mxu1 }
 0x2c8   : > { %v3150_v57 = vadd.f32 %v8278_v10, %v11415_v27  ;;  %v3151_v51 = vadd.f32 %v8342_v49, %v11420_v16  ;;  %v8281_v42 = vadd.f32 %v8280_v53, %v8279_v50  ;;  %v8345_v58 = vadd.f32 %v8344_v56, %v8343_v37 }
 0x2ca   : > { %v3214_v43 = vmax.f32 %v3150_v57, 0.0  ;;  %v3215_v60 = vmax.f32 %v3151_v51, 0.0  ;;  %v3154_v61 = vadd.f32 %v8281_v42, %v11415_v27  ;;  %v3155_v0 = vadd.f32 %v8345_v58, %v11420_v16 }
 0x2cc   : > { %3278 = vst [vmem:[#allocation2 + $0x1c0] sm:$0xff] %v3214_v43  ;;  %3279 = vst [vmem:[#allocation2 + $0x1c8] sm:$0xff] %v3215_v60  ;;  %v3218_v20 = vmax.f32 %v3154_v61, 0.0  ;;  %v3219_v62 = vmax.f32 %v3155_v0, 0.0  ;;  %v8362_v12 = vpop.f32.mrb[96].mxu0  ;;  %v8426_v1 = vpop.f32.mrb[96].mxu1 }
 0x2cd   : > { %v8363_v30 = vpop.f32.mrb[97].mxu0  ;;  %v8427_v27 = vpop.f32.mrb[97].mxu1 }
 0x2ce   : > { %3282 = vst [vmem:[#allocation2 + $0x1e0] sm:$0xff] %v3218_v20  ;;  %3283 = vst [vmem:[#allocation2 + $0x1e8] sm:$0xff] %v3219_v62  ;;  %v8364_v16 = vadd.f32 %v8363_v30, %v8362_v12  ;;  %v8428_v52 = vadd.f32 %v8427_v27, %v8426_v1  ;;  %v8365_v2 = vpop.f32.mrb[98].mxu0  ;;  %v8429_v35 = vpop.f32.mrb[98].mxu1 }
 0x2cf   : > { %v8366_v9 = vpop.f32.mrb[99].mxu0  ;;  %v8430_v46 = vpop.f32.mrb[99].mxu1 }
 0x2d0   : > { %v3096_v36 = vadd.f32 %v8364_v16, %v11559_v3  ;;  %v3097_v29 = vadd.f32 %v8428_v52, %v11564_v63  ;;  %v8367_v59 = vadd.f32 %v8366_v9, %v8365_v2  ;;  %v8431_v18 = vadd.f32 %v8430_v46, %v8429_v35 }
 0x2d2   : > { %v3160_v13 = vmax.f32 %v3096_v36, 0.0  ;;  %v3161_v11 = vmax.f32 %v3097_v29, 0.0  ;;  %v3100_v55 = vadd.f32 %v8367_v59, %v11559_v3  ;;  %v3101_v5 = vadd.f32 %v8431_v18, %v11564_v63 }
 0x2d4   : > { %3224 = vst [vmem:[#allocation2 + $0x10] sm:$0xff] %v3160_v13  ;;  %3225 = vst [vmem:[#allocation2 + $0x18] sm:$0xff] %v3161_v11  ;;  %v3164_v14 = vmax.f32 %v3100_v55, 0.0  ;;  %v3165_v28 = vmax.f32 %v3101_v5, 0.0  ;;  %v8368_v44 = vpop.f32.mrb[100].mxu0  ;;  %v8432_v32 = vpop.f32.mrb[100].mxu1 }
 0x2d5   : > { %v8369_v41 = vpop.f32.mrb[101].mxu0  ;;  %v8433_v31 = vpop.f32.mrb[101].mxu1 }
 0x2d6   : > { %3228 = vst [vmem:[#allocation2 + $0x30] sm:$0xff] %v3164_v14  ;;  %3229 = vst [vmem:[#allocation2 + $0x38] sm:$0xff] %v3165_v28  ;;  %v8370_v25 = vadd.f32 %v8369_v41, %v8368_v44  ;;  %v8434_v7 = vadd.f32 %v8433_v31, %v8432_v32  ;;  %v8371_v22 = vpop.f32.mrb[102].mxu0  ;;  %v8435_v54 = vpop.f32.mrb[102].mxu1 }
 0x2d7   : > { %v8372_v6 = vpop.f32.mrb[103].mxu0  ;;  %v8436_v48 = vpop.f32.mrb[103].mxu1 }
 0x2d8   : > { %v3104_v8 = vadd.f32 %v8370_v25, %v11559_v3  ;;  %v3105_v4 = vadd.f32 %v8434_v7, %v11564_v63  ;;  %v8373_v17 = vadd.f32 %v8372_v6, %v8371_v22  ;;  %v8437_v34 = vadd.f32 %v8436_v48, %v8435_v54 }
 0x2da   : > { %v3168_v40 = vmax.f32 %v3104_v8, 0.0  ;;  %v3169_v21 = vmax.f32 %v3105_v4, 0.0  ;;  %v3108_v23 = vadd.f32 %v8373_v17, %v11559_v3  ;;  %v3109_v19 = vadd.f32 %v8437_v34, %v11564_v63 }
 0x2dc   : > { %3232 = vst [vmem:[#allocation2 + $0x50] sm:$0xff] %v3168_v40  ;;  %3233 = vst [vmem:[#allocation2 + $0x58] sm:$0xff] %v3169_v21  ;;  %v3172_v39 = vmax.f32 %v3108_v23, 0.0  ;;  %v3173_v24 = vmax.f32 %v3109_v19, 0.0  ;;  %v8374_v38 = vpop.f32.mrb[104].mxu0  ;;  %v8438_v15 = vpop.f32.mrb[104].mxu1 }
 0x2dd   : > { %v8375_v45 = vpop.f32.mrb[105].mxu0  ;;  %v8439_v47 = vpop.f32.mrb[105].mxu1 }
 0x2de   : > { %3236 = vst [vmem:[#allocation2 + $0x70] sm:$0xff] %v3172_v39  ;;  %3237 = vst [vmem:[#allocation2 + $0x78] sm:$0xff] %v3173_v24  ;;  %v8376_v26 = vadd.f32 %v8375_v45, %v8374_v38  ;;  %v8440_v10 = vadd.f32 %v8439_v47, %v8438_v15  ;;  %v8377_v49 = vpop.f32.mrb[106].mxu0  ;;  %v8441_v50 = vpop.f32.mrb[106].mxu1 }
 0x2df   : > { %v8378_v37 = vpop.f32.mrb[107].mxu0  ;;  %v8442_v53 = vpop.f32.mrb[107].mxu1 }
 0x2e0   : > { %v3112_v56 = vadd.f32 %v8376_v26, %v11559_v3  ;;  %v3113_v57 = vadd.f32 %v8440_v10, %v11564_v63  ;;  %v8379_v51 = vadd.f32 %v8378_v37, %v8377_v49  ;;  %v8443_v42 = vadd.f32 %v8442_v53, %v8441_v50 }
 0x2e2   : > { %v3176_v58 = vmax.f32 %v3112_v56, 0.0  ;;  %v3177_v43 = vmax.f32 %v3113_v57, 0.0  ;;  %v3116_v60 = vadd.f32 %v8379_v51, %v11559_v3  ;;  %v3117_v61 = vadd.f32 %v8443_v42, %v11564_v63 }
 0x2e4   : > { %3240 = vst [vmem:[#allocation2 + $0x90] sm:$0xff] %v3176_v58  ;;  %3241 = vst [vmem:[#allocation2 + $0x98] sm:$0xff] %v3177_v43  ;;  %v3180_v0 = vmax.f32 %v3116_v60, 0.0  ;;  %v3181_v20 = vmax.f32 %v3117_v61, 0.0  ;;  %v8380_v62 = vpop.f32.mrb[108].mxu0  ;;  %v8444_v12 = vpop.f32.mrb[108].mxu1 }
 0x2e5   : > { %v8381_v1 = vpop.f32.mrb[109].mxu0  ;;  %v8445_v30 = vpop.f32.mrb[109].mxu1 }
 0x2e6   : > { %3244 = vst [vmem:[#allocation2 + $0xb0] sm:$0xff] %v3180_v0  ;;  %3245 = vst [vmem:[#allocation2 + $0xb8] sm:$0xff] %v3181_v20  ;;  %v8382_v27 = vadd.f32 %v8381_v1, %v8380_v62  ;;  %v8446_v16 = vadd.f32 %v8445_v30, %v8444_v12  ;;  %v8383_v52 = vpop.f32.mrb[110].mxu0  ;;  %v8447_v2 = vpop.f32.mrb[110].mxu1 }
 0x2e7   : > { %v8384_v35 = vpop.f32.mrb[111].mxu0  ;;  %v8448_v9 = vpop.f32.mrb[111].mxu1 }
 0x2e8   : > { %v3120_v46 = vadd.f32 %v8382_v27, %v11559_v3  ;;  %v3121_v36 = vadd.f32 %v8446_v16, %v11564_v63  ;;  %v8385_v29 = vadd.f32 %v8384_v35, %v8383_v52  ;;  %v8449_v59 = vadd.f32 %v8448_v9, %v8447_v2 }
 0x2e9   : > { %v9565_v9 = vmov 1966171168  }
 0x2ea   : > { %v3184_v18 = vmax.f32 %v3120_v46, 0.0  ;;  %v3185_v13 = vmax.f32 %v3121_v36, 0.0  ;;  %v3124_v11 = vadd.f32 %v8385_v29, %v11559_v3  ;;  %v3125_v55 = vadd.f32 %v8449_v59, %v11564_v63 }
 0x2eb   : > { %v3394_v46 = vunpack.c.l.s4 %v9565_v9 }
 0x2ec   : > { %3248 = vst [vmem:[#allocation2 + $0xd0] sm:$0xff] %v3184_v18  ;;  %3249 = vst [vmem:[#allocation2 + $0xd8] sm:$0xff] %v3185_v13  ;;  %v3188_v5 = vmax.f32 %v3124_v11, 0.0  ;;  %v3189_v14 = vmax.f32 %v3125_v55, 0.0  ;;  %v8386_v28 = vpop.f32.mrb[112].mxu0  ;;  %v8450_v44 = vpop.f32.mrb[112].mxu1 }
 0x2ed   : > { %v8387_v32 = vpop.f32.mrb[113].mxu0  ;;  %v8451_v41 = vpop.f32.mrb[113].mxu1 }
 0x2ee   : > { %3252 = vst [vmem:[#allocation2 + $0xf0] sm:$0xff] %v3188_v5  ;;  %3253 = vst [vmem:[#allocation2 + $0xf8] sm:$0xff] %v3189_v14  ;;  %v8388_v31 = vadd.f32 %v8387_v32, %v8386_v28  ;;  %v8452_v25 = vadd.f32 %v8451_v41, %v8450_v44  ;;  %v8389_v7 = vpop.f32.mrb[114].mxu0  ;;  %v8453_v22 = vpop.f32.mrb[114].mxu1  ;;  %v3395_v32 = vunpack.c.0.s8 %v3394_v46 }
 0x2ef   : > { %v8390_v54 = vpop.f32.mrb[115].mxu0  ;;  %v8454_v6 = vpop.f32.mrb[115].mxu1  ;;  %v3320_v14 = vld [vmem:[#allocation2 + $0x42] ss:$8 sm:$0xf] }
 0x2f0   : > { %v3128_v48 = vadd.f32 %v8388_v31, %v11559_v3  ;;  %v3129_v8 = vadd.f32 %v8452_v25, %v11564_v63  ;;  %v8391_v4 = vadd.f32 %v8390_v54, %v8389_v7  ;;  %v8455_v17 = vadd.f32 %v8454_v6, %v8453_v22  ;;  %v3322_v28 = vld [vmem:[#allocation2 + $0x82] ss:$8 sm:$0xf] }
 0x2f1   : > { %v3318_v6 = vld [vmem:[#allocation2 + $0x2] ss:$8 sm:$0xf] }
 0x2f2   : > { %v3192_v34 = vmax.f32 %v3128_v48, 0.0  ;;  %v3193_v40 = vmax.f32 %v3129_v8, 0.0  ;;  %v3132_v21 = vadd.f32 %v8391_v4, %v11559_v3  ;;  %v3133_v23 = vadd.f32 %v8455_v17, %v11564_v63  ;;  %v3864_v48 = vld [vmem:[#allocation2 + $0x46] ss:$8 sm:$0xf] }
 0x2f3   : > { %v3324_v44 = vld [vmem:[#allocation2 + $0xc2] ss:$8 sm:$0xf]  ;;  %v3868_v41 = vld [vmem:[#allocation2 + $0xc6] ss:$8 sm:$0xf] }
 0x2f4   : > { %3256 = vst [vmem:[#allocation2 + $0x110] sm:$0xff] %v3192_v34  ;;  %3257 = vst [vmem:[#allocation2 + $0x118] sm:$0xff] %v3193_v40  ;;  %v3196_v19 = vmax.f32 %v3132_v21, 0.0  ;;  %v3197_v39 = vmax.f32 %v3133_v23, 0.0  ;;  %v8392_v24 = vpop.f32.mrb[116].mxu0  ;;  %v8456_v38 = vpop.f32.mrb[116].mxu1  ;;  %v3550_v34 = vcombine.low %v3322_v28, %v3324_v44 }
 0x2f5   : > { %v8393_v15 = vpop.f32.mrb[117].mxu0  ;;  %v8457_v45 = vpop.f32.mrb[117].mxu1  ;;  %v4252_v31 = vld [vmem:[#allocation2 + $0xe2] ss:$8 sm:$0xf] }
 0x2f6   : > { %3260 = vst [vmem:[#allocation2 + $0x130] sm:$0xff] %v3196_v19  ;;  %3261 = vst [vmem:[#allocation2 + $0x138] sm:$0xff] %v3197_v39  ;;  %v8394_v47 = vadd.f32 %v8393_v15, %v8392_v24  ;;  %v8458_v26 = vadd.f32 %v8457_v45, %v8456_v38  ;;  %v8395_v10 = vpop.f32.mrb[118].mxu0  ;;  %v8459_v49 = vpop.f32.mrb[118].mxu1  ;;  %v11595_v45 = vsub.s32 %v3395_v32, %v11202_v33 }
 0x2f7   : > { %v8396_v50 = vpop.f32.mrb[119].mxu0  ;;  %v8460_v37 = vpop.f32.mrb[119].mxu1  ;;  %v4248_v8 = vld [vmem:[#allocation2 + $0x62] ss:$8 sm:$0xf] }
 0x2f8   : > { %v3136_v53 = vadd.f32 %v8394_v47, %v11559_v3  ;;  %v3137_v56 = vadd.f32 %v8458_v26, %v11564_v63  ;;  %v8397_v57 = vadd.f32 %v8396_v50, %v8395_v10  ;;  %v8461_v51 = vadd.f32 %v8460_v37, %v8459_v49  ;;  %v3866_v40 = vld [vmem:[#allocation2 + $0x86] ss:$8 sm:$0xf]  ;;  %v4250_v24 = vld [vmem:[#allocation2 + $0xa2] ss:$8 sm:$0xf] }
 0x2f9   : > { %v3549_v47 = vcombine.low %v3318_v6, %v3320_v14  ;;  %v3934_v26 = vcombine.low %v3866_v40, %v3868_v41  ;;  %v4318_v10 = vcombine.low %v4250_v24, %v4252_v31  ;;  %v3884_v14 = vld [vmem:[#allocation2 + $0xc7] ss:$8 sm:$0xf] }
 0x2fa   : > { %v3200_v42 = vmax.f32 %v3136_v53, 0.0  ;;  %v3201_v58 = vmax.f32 %v3137_v56, 0.0  ;;  %v3140_v43 = vadd.f32 %v8397_v57, %v11559_v3  ;;  %v3141_v60 = vadd.f32 %v8461_v51, %v11564_v63  ;;  %v3862_v56 = vld [vmem:[#allocation2 + $0x6] ss:$8 sm:$0xf] }
 0x2fb   : > { %v4246_v57 = vld [vmem:[#allocation2 + $0x22] ss:$8 sm:$0xf]  ;;  %v3566_v51 = vrot.slane %v3550_v34, %v11595_v45  ;;  %v3870_v28 = vld [vmem:[#allocation2 + $0x106] ss:$8 sm:$0xf] }
 0x2fc   : > { %3264 = vst [vmem:[#allocation2 + $0x150] sm:$0xff] %v3200_v42  ;;  %3265 = vst [vmem:[#allocation2 + $0x158] sm:$0xff] %v3201_v58  ;;  %v3204_v61 = vmax.f32 %v3140_v43, 0.0  ;;  %v3205_v0 = vmax.f32 %v3141_v60, 0.0  ;;  %v8398_v20 = vpop.f32.mrb[120].mxu0  ;;  %v8462_v62 = vpop.f32.mrb[120].mxu1  ;;  %v3933_v42 = vcombine.low %v3862_v56, %v3864_v48  ;;  %v4317_v58 = vcombine.low %v4246_v57, %v4248_v8 }
 0x2fd   : > { %v8399_v12 = vpop.f32.mrb[121].mxu0  ;;  %v8463_v1 = vpop.f32.mrb[121].mxu1  ;;  %v4254_v31 = vld [vmem:[#allocation2 + $0x122] ss:$8 sm:$0xf] }
 0x2fe   : > { %3268 = vst [vmem:[#allocation2 + $0x170] sm:$0xff] %v3204_v61  ;;  %3269 = vst [vmem:[#allocation2 + $0x178] sm:$0xff] %v3205_v0  ;;  %v8400_v30 = vadd.f32 %v8399_v12, %v8398_v20  ;;  %v8464_v27 = vadd.f32 %v8463_v1, %v8462_v62  ;;  %v8401_v16 = vpop.f32.mrb[122].mxu0  ;;  %v8465_v52 = vpop.f32.mrb[122].mxu1  ;;  %v3950_v20 = vrot.slane %v3934_v26, %v11595_v45 }
 0x2ff   : > { %v8402_v2 = vpop.f32.mrb[123].mxu0  ;;  %v8466_v35 = vpop.f32.mrb[123].mxu1  ;;  %v3336_v0 = vld [vmem:[#allocation2 + $0x43] ss:$8 sm:$0xf]  ;;  %v4334_v62 = vrot.slane %v4318_v10, %v11595_v45 }
 0x300   : > { %v3144_v36 = vadd.f32 %v8400_v30, %v11559_v3  ;;  %v3145_v29 = vadd.f32 %v8464_v27, %v11564_v63  ;;  %v8403_v59 = vadd.f32 %v8402_v2, %v8401_v16  ;;  %v8467_v18 = vadd.f32 %v8466_v35, %v8465_v52  ;;  %v3334_v12 = vld [vmem:[#allocation2 + $0x3] ss:$8 sm:$0xf]  ;;  %v3880_v1 = vld [vmem:[#allocation2 + $0x47] ss:$8 sm:$0xf] }
 0x301   : > { %v3559_v16 = vrot.slane %v3549_v47, %v11595_v45  ;;  %v3340_v52 = vld [vmem:[#allocation2 + $0xc3] ss:$8 sm:$0xf]  ;;  %v3943_v2 = vrot.slane %v3933_v42, %v11595_v45  ;;  %v3629_v35 = vcombine.low %v3334_v12, %v3336_v0 }
 0x302   : > { %v3208_v13 = vmax.f32 %v3144_v36, 0.0  ;;  %v3209_v11 = vmax.f32 %v3145_v29, 0.0  ;;  %v3148_v55 = vadd.f32 %v8403_v59, %v11559_v3  ;;  %v3149_v5 = vadd.f32 %v8467_v18, %v11564_v63  ;;  %v3338_v29 = vld [vmem:[#allocation2 + $0x83] ss:$8 sm:$0xf] }
 0x303   : > { %v3328_v9 = vld [vmem:[#allocation2 + $0x142] ss:$8 sm:$0xf]  ;;  %v3581_v46 = vcombine.low %v3559_v16, %v3566_v51  ;;  %v3582_v36 = vcombine.high %v3559_v16, %v3566_v51  ;;  %v3965_v32 = vcombine.low %v3943_v2, %v3950_v20  ;;  %v3342_v34 = vld [vmem:[#allocation2 + $0x103] ss:$8 sm:$0xf] }
 0x304   : > { %3272 = vst [vmem:[#allocation2 + $0x190] sm:$0xff] %v3208_v13  ;;  %3273 = vst [vmem:[#allocation2 + $0x198] sm:$0xff] %v3209_v11  ;;  %v3212_v25 = vmax.f32 %v3148_v55, 0.0  ;;  %v3213_v7 = vmax.f32 %v3149_v5, 0.0  ;;  %v8404_v22 = vpop.f32.mrb[124].mxu0  ;;  %v8468_v54 = vpop.f32.mrb[124].mxu1  ;;  %v3966_v11 = vcombine.high %v3943_v2, %v3950_v20  ;;  %v3630_v5 = vcombine.low %v3338_v29, %v3340_v52 }
 0x305   : > { %v8405_v4 = vpop.f32.mrb[125].mxu0  ;;  %v8469_v17 = vpop.f32.mrb[125].mxu1  ;;  %v3326_v18 = vld [vmem:[#allocation2 + $0x102] ss:$8 sm:$0xf]  ;;  %v3598_v48 = vrot.slane %v3582_v36, %v11595_v45  ;;  %v3591_v8 = vrot.slane %v3581_v46, %v11595_v45  ;;  %v3975_v26 = vrot.slane %v3965_v32, %v11595_v45 }
 0x306   : > { %3276 = vst [vmem:[#allocation2 + $0x1b0] sm:$0xff] %v3212_v25  ;;  %3277 = vst [vmem:[#allocation2 + $0x1b8] sm:$0xff] %v3213_v7  ;;  %v8406_v21 = vadd.f32 %v8405_v4, %v8404_v22  ;;  %v8470_v23 = vadd.f32 %v8469_v17, %v8468_v54  ;;  %v8407_v19 = vpop.f32.mrb[126].mxu0  ;;  %v8471_v39 = vpop.f32.mrb[126].mxu1  ;;  %v3551_v41 = vcombine.low %v3326_v18, %v3328_v9 }
 0x307   : > { %v8408_v38 = vpop.f32.mrb[127].mxu0  ;;  %v8472_v15 = vpop.f32.mrb[127].mxu1  ;;  %v3872_v13 = vld [vmem:[#allocation2 + $0x146] ss:$8 sm:$0xf]  ;;  %v11608_v22 = vrot.slane %v3629_v35, %v11595_v45 }
 0x308   : > { %v3152_v49 = vadd.f32 %v8406_v21, %v11559_v3  ;;  %v3153_v50 = vadd.f32 %v8470_v23, %v11564_v63  ;;  %v8409_v37 = vadd.f32 %v8408_v38, %v8407_v19  ;;  %v8473_v53 = vadd.f32 %v8472_v15, %v8471_v39  ;;  %v4256_v44 = vld [vmem:[#allocation2 + $0x162] ss:$8 sm:$0xf]  ;;  %v3344_v7 = vld [vmem:[#allocation2 + $0x143] ss:$8 sm:$0xf] }
 0x309   : > { %v3882_v54 = vld [vmem:[#allocation2 + $0x87] ss:$8 sm:$0xf]  ;;  %v3935_v17 = vcombine.low %v3870_v28, %v3872_v13  ;;  %v3982_v19 = vrot.slane %v3966_v11, %v11595_v45  ;;  %v4319_v39 = vcombine.low %v4254_v31, %v4256_v44  ;;  %v11618_v38 = vrot.slane %v3630_v5, %v11595_v45 }
 0x30a   : > { %v3216_v43 = vmax.f32 %v3152_v49, 0.0  ;;  %v3217_v60 = vmax.f32 %v3153_v50, 0.0  ;;  %v3156_v33 = vadd.f32 %v8409_v37, %v11559_v3  ;;  %v3157_v61 = vadd.f32 %v8473_v53, %v11564_v63  ;;  %v3878_v63 = vld [vmem:[#allocation2 + $0x7] ss:$8 sm:$0xf] }
 0x30b   : > { %v4327_v3 = vrot.slane %v4317_v58, %v11595_v45  ;;  %v4013_v59 = vcombine.low %v3878_v63, %v3880_v1  ;;  %v3330_v6 = vld [vmem:[#allocation2 + $0x182] ss:$8 sm:$0xf]  ;;  %v3874_v4 = vld [vmem:[#allocation2 + $0x186] ss:$8 sm:$0xf]  ;;  %v4014_v50 = vcombine.low %v3882_v54, %v3884_v14  ;;  %v3573_v37 = vrot.slane %v3551_v41, %v11595_v45 }
 0x30c   : > { %3280 = vst [vmem:[#allocation2 + $0x1d0] sm:$0xff] %v3216_v43  ;;  %3281 = vst [vmem:[#allocation2 + $0x1d8] sm:$0xff] %v3217_v60  ;;  %v3220_v30 = vmax.f32 %v3156_v33, 0.0  ;;  %v3221_v27 = vmax.f32 %v3157_v61, 0.0  ;;  %v3631_v51 = vcombine.low %v3342_v34, %v3344_v7  ;;  %v3957_v43 = vrot.slane %v3935_v17, %v11595_v45  ;;  %v9311_v17 = vld [vmem:[%s12866_s5 + $0x100] sm:$0xff]  }
 0x30d   : > { %v4350_v55 = vcombine.high %v4327_v3, %v4334_v62  ;;  %v4349_v25 = vcombine.low %v4327_v3, %v4334_v62  ;;  %v11613_v40 = vrot.slane %v4013_v59, %v11595_v45  ;;  %v3346_v10 = vld [vmem:[#allocation2 + $0x183] ss:$8 sm:$0xf]  ;;  %v4258_v53 = vld [vmem:[#allocation2 + $0x1a2] ss:$8 sm:$0xf]  ;;  %v4341_v0 = vrot.slane %v4319_v39, %v11595_v45 }
 0x30e   : > { %3284 = vst [vmem:[#allocation2 + $0x1f0] sm:$0xff] %v3220_v30  ;;  %3285 = vst [vmem:[#allocation2 + $0x1f8] sm:$0xff] %v3221_v27  ;;  %v11628_v61 = vld [vmem:[#allocation2 + $0x147] ss:$8 sm:$0xf]  ;;  %v3661_v62 = vcombine.low %v11608_v22, %v11618_v38  ;;  %v3662_v12 = vcombine.high %v11608_v22, %v11618_v38  ;;  %v11640_v35 = vrot.slane %v3631_v51, %v11595_v45  ;;  %v12869_v54 = vmov 0.0  }
 0x30f   : > { %v4366_v24 = vrot.slane %v4350_v55, %v11595_v45  ;;  %v11623_v57 = vrot.slane %v4349_v25, %v11595_v45  ;;  %v3886_v52 = vld [vmem:[#allocation2 + $0x107] ss:$8 sm:$0xf]  ;;  %v11644_v9 = vrot.slane %v4014_v50, %v11595_v45  ;;  %v3900_v22 = vld [vmem:[#allocation2 + $0xe0] ss:$8 sm:$0xf] }
 0x310   : > { %v4015_v63 = vcombine.low %v3886_v52, %v11628_v61  ;;  %v3890_v18 = vld [vmem:[#allocation2 + $0x187] ss:$8 sm:$0xf]  ;;  %v11997_v51 = vld [vmem:[#allocation2 + $0x64] ss:$8 sm:$0xf] }
 0x311   : > { %v9312_v34 = vld [vmem:[%s12866_s5 + $0x180] sm:$0xff]   ;;  %v9323_v38 = vld [vmem:[%s12866_s5 + $0x118] sm:$0xff]  }
 0x312   : > { %v3912_v39 = vld [vmem:[#allocation2 + $0x61] ss:$8 sm:$0xf] }
 0x313   : > { %v3332_v21 = vld [vmem:[#allocation2 + $0x1c2] ss:$8 sm:$0xf]  ;;  %v3876_v23 = vld [vmem:[#allocation2 + $0x1c6] ss:$8 sm:$0xf] }
 0x314   : > { %v3552_v15 = vcombine.low %v3330_v6, %v3332_v21  ;;  %v3936_v47 = vcombine.low %v3874_v4, %v3876_v23  ;;  %v3348_v49 = vld [vmem:[#allocation2 + $0x1c3] ss:$8 sm:$0xf]  ;;  %v3892_v2 = vld [vmem:[#allocation2 + $0x1c7] ss:$8 sm:$0xf] }
 0x315   : > { %v4260_v56 = vld [vmem:[#allocation2 + $0x1e2] ss:$8 sm:$0xf]  ;;  %v3632_v42 = vcombine.low %v3346_v10, %v3348_v49  ;;  %v4016_v5 = vcombine.low %v3890_v18, %v3892_v2  ;;  %v11747_v2 = vld [vmem:[#allocation2 + $0x4] ss:$8 sm:$0xf] }
 0x316   : > { %v3580_v58 = vrot.slane %v3552_v15, %v11595_v45  ;;  %v3964_v60 = vrot.slane %v3936_v47, %v11595_v45  ;;  %v4320_v33 = vcombine.low %v4258_v53, %v4260_v56  ;;  %v9313_v15 = vld [vmem:[%s12866_s5 + $0x148] sm:$0xff]  }
 0x317   : > { %v11632_v20 = vrot.slane %v3632_v42, %v11595_v45  ;;  %v9314_v47 = vld [vmem:[%s12866_s5 + $0x1c8] sm:$0xff]   ;;  %v11699_v49 = vrot.slane %v4016_v5, %v11595_v45  ;;  %v3678_v42 = vrot.slane %v3662_v12, %v11595_v45  ;;  %v9319_v12 = vld [vmem:[%s12866_s5 + $0x110] sm:$0xff]  }
 0x318   : > { %v3583_v1 = vcombine.low %v3573_v37, %v3580_v58  ;;  %v3584_v30 = vcombine.high %v3573_v37, %v3580_v58  ;;  %v3968_v27 = vcombine.high %v3957_v43, %v3964_v60  ;;  %v4348_v16 = vrot.slane %v4320_v33, %v11595_v45  ;;  %v9316_v56 = vld [vmem:[%s12866_s5 + $0x188] sm:$0xff]  }
 0x319   : > { %v3967_v3 = vcombine.low %v3957_v43, %v3964_v60  ;;  %v3664_v55 = vcombine.high %v11640_v35, %v11632_v20  ;;  %v4045_v58 = vcombine.low %v11613_v40, %v11644_v9  ;;  %v9317_v43 = vld [vmem:[%s12866_s5 + $0x150] sm:$0xff]  }
 0x31a   : > { %v3612_v46 = vrot.slane %v3584_v30, %v11595_v45  ;;  %v3605_v36 = vrot.slane %v3583_v1, %v11595_v45  ;;  %v3996_v29 = vrot.slane %v3968_v27, %v11595_v45  ;;  %v4352_v59 = vcombine.high %v4341_v0, %v4348_v16  ;;  %v9318_v60 = vld [vmem:[%s12866_s5 + $0x1d0] sm:$0xff]  }
 0x31b   : > { %v3989_v13 = vrot.slane %v3967_v3, %v11595_v45  ;;  %v4351_v11 = vcombine.low %v4341_v0, %v4348_v16  ;;  %v3692_v53 = vrot.slane %v3664_v55, %v11595_v45  ;;  %v11730_v0 = vrot.slane %v4015_v63, %v11595_v45  ;;  %v9320_v1 = vld [vmem:[%s12866_s5 + $0x190] sm:$0xff]   ;;  %v9321_v63 = vld [vmem:[%s12866_s5 + $0x158] sm:$0xff]  }
 0x31c   : > { %v11652_v14 = vcombine.low %v3598_v48, %v3612_v46  ;;  %v11654_v28 = vcombine.high %v3598_v48, %v3612_v46  ;;  %v11656_v44 = vcombine.low %v3591_v8, %v3605_v36  ;;  %v11658_v32 = vcombine.high %v3591_v8, %v3605_v36  ;;  %v11739_v27 = vld [vmem:[#allocation2 + $0x44] ss:$8 sm:$0xf] }
 0x31d   : > { %v11660_v41 = vcombine.low %v3982_v19, %v3996_v29  ;;  %v4380_v31 = vrot.slane %v4352_v59, %v11595_v45  ;;  %v11663_v25 = vcombine.high %v3982_v19, %v3996_v29  ;;  %v11665_v7 = vcombine.low %v3975_v26, %v3989_v13  ;;  %v11749_v3 = vld [vmem:[#allocation2 + $0xc4] ss:$8 sm:$0xf] }
 0x31e   : > { %12880 = vst [vmem:[#allocation4_spill] sm:$0xff] %v11658_v32  ;;  %v4822_v6 = vpack.c.bf16 %v11652_v14, %v12869_v54  ;;  %v4824_v48 = vpack.c.bf16 %v11654_v28, %v12869_v54  ;;  %v4821_v4 = vpack.c.bf16 %v11656_v44, %v12869_v54  ;;  %v4823_v8 = vpack.c.bf16 %v11658_v32, %v12869_v54  ;;  %v9322_v46 = vld [vmem:[%s12866_s5 + $0x1d8] sm:$0xff]  }
 0x31f   : > { %v11681_v21 = vcombine.low %v4366_v24, %v4380_v31  ;;  %v11683_v23 = vcombine.high %v4366_v24, %v4380_v31  ;;  %v4373_v19 = vrot.slane %v4351_v11, %v11595_v45  ;;  %v11694_v10 = vcombine.high %v3975_v26, %v3989_v13  ;;  %v9315_v26 = vld [vmem:[%s12866_s5 + $0x108] sm:$0xff]  }
 0x320   : > { %6967 = vmatprep.mubr.bf16.mxu0 %v4822_v6  ;;  %7016 = vmatprep.mubr.bf16.mxu1 %v4824_v48  ;;  %v3663_v24 = vcombine.low %v11640_v35, %v11632_v20  ;;  %v3364_v20 = vld [vmem:[#allocation2 + $0x1c4] ss:$8 sm:$0xf]  ;;  %v11743_v16 = vcombine.high %v3678_v42, %v3692_v53  ;;  %v4047_v52 = vcombine.low %v11730_v0, %v11699_v49  ;;  %v11762_v13 = vld [vmem:[#allocation2 + $0x60] ss:$8 sm:$0xf] }
 0x321   : > { %6968 = vmatmul.mubr.bf16.vlgmr.msra.gmra.mrb[128].mxu0 %v4821_v4  ;;  %7017 = vmatmul.mubr.bf16.vlgmr.msra.gmra.mrb[128].mxu1 %v4823_v8  ;;  %v4854_v50 = vpack.c.bf16 %v11681_v21, %v11660_v41  ;;  %v4856_v37 = vpack.c.bf16 %v11683_v23, %v11663_v25  ;;  %v11724_v33 = vcombine.low %v11623_v57, %v4373_v19  ;;  %v3362_v35 = vld [vmem:[#allocation2 + $0x184] ss:$8 sm:$0xf]  ;;  %v3898_v6 = vld [vmem:[#allocation2 + $0xa0] ss:$8 sm:$0xf] }
 0x322   : > { %8531 = vmatpush3.bf16.msra.mxu0 %v9311_v17  ;;  %8559 = vmatpush3.bf16.msra.mxu1 %v9312_v34  ;;  %v11727_v61 = vcombine.high %v11623_v57, %v4373_v19  ;;  %v3685_v30 = vrot.slane %v3663_v24, %v11595_v45  ;;  %v11741_v57 = vcombine.low %v3678_v42, %v3692_v53  ;;  %v3354_v59 = vld [vmem:[#allocation2 + $0x84] ss:$8 sm:$0xf]  ;;  %v11779_v8 = vld [vmem:[#allocation2 + $0x63] ss:$8 sm:$0xf] }
 0x323   : > { %6975 = vmatprep.mubr.bf16.mxu0 %v4854_v50  ;;  %7024 = vmatprep.mubr.bf16.mxu1 %v4856_v37  ;;  %12881 = vst [vmem:[#allocation5_spill] sm:$0xff] %v11724_v33  ;;  %v3671_v36 = vrot.slane %v3661_v62, %v11595_v45  ;;  %v4055_v29 = vrot.slane %v4045_v58, %v11595_v45  ;;  %v3360_v31 = vld [vmem:[#allocation2 + $0x144] ss:$8 sm:$0xf] }
 0x324   : > { %12882 = vst [vmem:[#allocation6_spill] sm:$0xff] %v11727_v61  ;;  %8532 = vmatprep.subr.bf16.mxu0 %v9313_v15  ;;  %8560 = vmatprep.subr.bf16.mxu1 %v9314_v47  ;;  %v3712_v18 = vcombine.low %v3362_v35, %v3364_v20  ;;  %v4853_v11 = vpack.c.bf16 %v11724_v33, %v11665_v7  ;;  %v9324_v62 = vld [vmem:[%s12866_s5 + $0x198] sm:$0xff]   ;;  %v9325_v37 = vld [vmem:[%s12866_s5 + $0x160] sm:$0xff]  }
 0x325   : > { %v4855_v55 = vpack.c.bf16 %v11727_v61, %v11694_v10  ;;  %v4069_v5 = vrot.slane %v4047_v52, %v11595_v45  ;;  %v11775_v48 = vcombine.low %v3671_v36, %v3685_v30  ;;  %v11777_v4 = vcombine.high %v3671_v36, %v3685_v30  ;;  %v11781_v17 = vld [vmem:[#allocation2 + $0xe3] ss:$8 sm:$0xf]  ;;  %v3894_v47 = vld [vmem:[#allocation2 + $0x20] ss:$8 sm:$0xf] }
 0x326   : > { %8533 = vmatpush3.bf16.msra.mxu0 %v9315_v26  ;;  %8561 = vmatpush3.bf16.msra.mxu1 %v9316_v56  ;;  %v4276_v34 = vld [vmem:[#allocation2 + $0x1e3] ss:$8 sm:$0xf]  ;;  %v3709_v19 = vcombine.low %v11747_v2, %v11739_v27  ;;  %v3710_v15 = vcombine.low %v3354_v59, %v11749_v3  ;;  %v4826_v24 = vpack.c.bf16 %v11741_v57, %v12869_v54  ;;  %v3358_v56 = vld [vmem:[#allocation2 + $0x104] ss:$8 sm:$0xf] }
 0x327   : > { %8534 = vmatprep.subr.bf16.mxu0 %v9317_v43  ;;  %8562 = vmatprep.subr.bf16.mxu1 %v9318_v60  ;;  %12883 = vst [vmem:[#allocation7_spill] sm:$0xff] %v11775_v48  ;;  %12884 = vst [vmem:[#allocation8_spill] sm:$0xff] %v11777_v4  ;;  %v4828_v50 = vpack.c.bf16 %v11743_v16, %v12869_v54  ;;  %v9326_v53 = vld [vmem:[%s12866_s5 + $0x1e0] sm:$0xff]   ;;  %v11796_v26 = vcombine.low %v4055_v29, %v4069_v5 }
 0x328   : > { %v3908_v42 = vld [vmem:[#allocation2 + $0x1e0] ss:$8 sm:$0xf]  ;;  %v4262_v58 = vld [vmem:[#allocation2 + $0x23] ss:$8 sm:$0xf]  ;;  %v11798_v20 = vcombine.high %v4055_v29, %v4069_v5  ;;  %v3711_v30 = vcombine.low %v3358_v56, %v3360_v31  ;;  %v4094_v27 = vcombine.low %v3898_v6, %v3900_v22  ;;  %v11801_v2 = vrot.slane %v3712_v18, %v11595_v45 }
 0x329   : > { %6976 = vmatmul.mubr.bf16.gmra.mrb[132].mxu0 %v4853_v11  ;;  %7025 = vmatmul.mubr.bf16.gmra.mrb[132].mxu1 %v4855_v55  ;;  %v4272_v43 = vld [vmem:[#allocation2 + $0x163] ss:$8 sm:$0xf]  ;;  %v3904_v3 = vld [vmem:[#allocation2 + $0x160] ss:$8 sm:$0xf]  ;;  %v4093_v36 = vcombine.low %v3894_v47, %v11762_v13  ;;  %v4397_v55 = vcombine.low %v4262_v58, %v11779_v8  ;;  %v11811_v31 = vrot.slane %v3710_v15, %v11595_v45 }
 0x32a   : > { %8535 = vmatpush3.bf16.msra.mxu0 %v9319_v12  ;;  %8563 = vmatpush3.bf16.msra.mxu1 %v9320_v1  ;;  %v4274_v60 = vld [vmem:[#allocation2 + $0x1a3] ss:$8 sm:$0xf]  ;;  %v3906_v35 = vld [vmem:[#allocation2 + $0x1a0] ss:$8 sm:$0xf]  ;;  %v11820_v6 = vrot.slane %v3711_v30, %v11595_v45  ;;  %v11823_v8 = vrot.slane %v4094_v27, %v11595_v45  ;;  %v11835_v15 = vrot.slane %v3709_v19, %v11595_v45 }
 0x32b   : > { %7065 = vmatprep.mubr.bf16.mxu0 %v4826_v24  ;;  %7114 = vmatprep.mubr.bf16.mxu1 %v4828_v50  ;;  %v4400_v52 = vcombine.low %v4274_v60, %v4276_v34  ;;  %v4266_v12 = vld [vmem:[#allocation2 + $0xa3] ss:$8 sm:$0xf]  ;;  %v4096_v11 = vcombine.low %v3906_v35, %v3908_v42  ;;  %v3902_v13 = vld [vmem:[#allocation2 + $0x120] ss:$8 sm:$0xf]  ;;  %v11846_v56 = vrot.slane %v4093_v36, %v11595_v45 }
 0x32c   : > { %8536 = vmatprep.subr.bf16.mxu0 %v9321_v63  ;;  %8564 = vmatprep.subr.bf16.mxu1 %v9322_v46  ;;  %v4270_v1 = vld [vmem:[#allocation2 + $0x123] ss:$8 sm:$0xf]  ;;  %v4398_v18 = vcombine.low %v4266_v12, %v11781_v17  ;;  %v4095_v22 = vcombine.low %v3902_v13, %v3904_v3  ;;  %v3300_v34 = vld [vmem:[#allocation2 + $0x1c0] ss:$8 sm:$0xf]  ;;  %v11852_v19 = vrot.slane %v4397_v55, %v11595_v45 }
 0x32d   : > { %v4399_v5 = vcombine.low %v4270_v1, %v4272_v43  ;;  %v9327_v63 = vld [vmem:[%s12866_s5 + $0x120] sm:$0xff]   ;;  %v11832_v17 = vrot.slane %v4400_v52, %v11595_v45  ;;  %v9331_v47 = vld [vmem:[%s12866_s5 + $0x128] sm:$0xff]   ;;  %v11849_v42 = vrot.slane %v4096_v11, %v11595_v45  ;;  %v3741_v27 = vcombine.low %v11835_v15, %v11811_v31  ;;  %v9333_v1 = vld [vmem:[%s12866_s5 + $0x170] sm:$0xff]  }
 0x32e   : > { %8537 = vmatpush3.bf16.msra.mxu0 %v9323_v38  ;;  %8565 = vmatpush3.bf16.msra.mxu1 %v9324_v62  ;;  %v9328_v46 = vld [vmem:[%s12866_s5 + $0x1a0] sm:$0xff]   ;;  %v9329_v38 = vld [vmem:[%s12866_s5 + $0x168] sm:$0xff]   ;;  %v11855_v58 = vrot.slane %v4398_v18, %v11595_v45  ;;  %v11863_v36 = vrot.slane %v4095_v22, %v11595_v45  ;;  %v4125_v12 = vcombine.low %v11846_v56, %v11823_v8  ;;  %v9334_v11 = vld [vmem:[%s12866_s5 + $0x1f0] sm:$0xff]  }
 0x32f   : > { %8538 = vmatprep.subr.bf16.mxu0 %v9325_v37  ;;  %8566 = vmatprep.subr.bf16.mxu1 %v9326_v53  ;;  %v9330_v62 = vld [vmem:[%s12866_s5 + $0x1e8] sm:$0xff]   ;;  %v3743_v53 = vcombine.low %v11820_v6, %v11801_v2  ;;  %v11858_v43 = vrot.slane %v4399_v5, %v11595_v45 }
 0x330   : > { %v9332_v24 = vld [vmem:[%s12866_s5 + $0x1a8] sm:$0xff]   ;;  %v4127_v22 = vcombine.low %v11863_v36, %v11849_v42 }
 0x331   : > { %v3292_v50 = vld [vmem:[#allocation2 + $0xc0] ss:$8 sm:$0xf]  ;;  %v4432_v55 = vcombine.high %v11858_v43, %v11832_v17  ;;  %v3920_v32 = vld [vmem:[#allocation2 + $0x161] ss:$8 sm:$0xf] }
 0x332   : > { %v3296_v37 = vld [vmem:[#allocation2 + $0x140] ss:$8 sm:$0xf]  ;;  %8539 = vmatpush3.bf16.msra.mxu0 %v9327_v63  ;;  %8567 = vmatpush3.bf16.msra.mxu1 %v9328_v46  ;;  %v3765_v46 = vrot.slane %v3743_v53, %v11595_v45 }
 0x333   : > { %v3288_v60 = vld [vmem:[#allocation2 + $0x40] ss:$8 sm:$0xf]  ;;  %8540 = vmatprep.subr.bf16.mxu0 %v9329_v38  ;;  %8568 = vmatprep.subr.bf16.mxu1 %v9330_v62  ;;  %v4046_v38 = vcombine.high %v11613_v40, %v11644_v9  ;;  %v4048_v62 = vcombine.high %v11730_v0, %v11699_v49  ;;  %v4135_v9 = vrot.slane %v4125_v12, %v11595_v45 }
 0x334   : > { %v3298_v30 = vld [vmem:[#allocation2 + $0x180] ss:$8 sm:$0xf]  ;;  %v4149_v49 = vrot.slane %v4127_v22, %v11595_v45 }
 0x335   : > { %v3290_v52 = vld [vmem:[#allocation2 + $0x80] ss:$8 sm:$0xf]  ;;  %v3392_v35 = vcombine.low %v3298_v30, %v3300_v34  ;;  %v4430_v34 = vcombine.high %v11852_v19, %v11855_v58  ;;  %v3751_v30 = vrot.slane %v3741_v27, %v11595_v45  ;;  %v4076_v12 = vrot.slane %v4048_v62, %v11595_v45 }
 0x336   : > { %v3294_v3 = vld [vmem:[#allocation2 + $0x100] ss:$8 sm:$0xf]  ;;  %v3390_v5 = vcombine.low %v3290_v52, %v3292_v50  ;;  %8541 = vmatpush3.bf16.msra.mxu0 %v9331_v47  ;;  %8569 = vmatpush3.bf16.msra.mxu1 %v9332_v24  ;;  %v4460_v24 = vrot.slane %v4432_v55, %v11595_v45  ;;  %v4062_v22 = vrot.slane %v4046_v38, %v11595_v45 }
 0x337   : > { %v3286_v18 = vld [vmem:[#allocation2] ss:$8 sm:$0xf]  ;;  %v3391_v13 = vcombine.low %v3294_v3, %v3296_v37  ;;  %v11892_v40 = vrot.slane %v3392_v35, %v11595_v45  ;;  %8542 = vmatprep.subr.bf16.mxu0 %v9333_v1  ;;  %8570 = vmatprep.subr.bf16.mxu1 %v9334_v11  ;;  %v11909_v27 = vcombine.low %v3751_v30, %v3765_v46 }
 0x338   : > { %v3389_v63 = vcombine.low %v3286_v18, %v3288_v60  ;;  %v9335_v50 = vld [vmem:[%s12866_s5 + $0x130] sm:$0xff]   ;;  %v9337_v0 = vld [vmem:[%s12866_s5 + $0x178] sm:$0xff]   ;;  %v11904_v53 = vrot.slane %v3390_v5, %v11595_v45  ;;  %v11911_v52 = vcombine.high %v3751_v30, %v3765_v46  ;;  %v11913_v3 = vcombine.low %v4135_v9, %v4149_v49  ;;  %v9344_v38 = vld [vmem:[%s12866_s5 + $0x280] sm:$0xff]  }
 0x339   : > { %v9336_v37 = vld [vmem:[%s12866_s5 + $0x1b0] sm:$0xff]   ;;  %v9338_v47 = vld [vmem:[%s12866_s5 + $0x1f8] sm:$0xff]   ;;  %v11907_v60 = vrot.slane %v3391_v13, %v11595_v45  ;;  %v11915_v35 = vcombine.high %v4135_v9, %v4149_v49  ;;  %v4446_v1 = vrot.slane %v4430_v34, %v11595_v45  ;;  %v4431_v11 = vcombine.low %v11858_v43, %v11832_v17  ;;  %v9341_v43 = vld [vmem:[%s12866_s5 + $0x240] sm:$0xff]  }
 0x33a   : > { %v11922_v55 = vrot.slane %v3389_v63, %v11595_v45  ;;  %8543 = vmatpush3.bf16.msra.mxu0 %v9335_v50  ;;  %8571 = vmatpush3.bf16.msra.mxu1 %v9336_v37  ;;  %v9339_v18 = vld [vmem:[%s12866_s5 + $0x138] sm:$0xff]   ;;  %v9342_v63 = vld [vmem:[%s12866_s5 + $0x2c0] sm:$0xff]   ;;  %v4429_v62 = vcombine.low %v11852_v19, %v11855_v58  ;;  %v3744_v37 = vcombine.high %v11820_v6, %v11801_v2  ;;  %v9345_v2 = vld [vmem:[%s12866_s5 + $0x248] sm:$0xff]  }
 0x33b   : > { %v9340_v5 = vld [vmem:[%s12866_s5 + $0x1b8] sm:$0xff]   ;;  %v3424_v13 = vcombine.high %v11907_v60, %v11892_v40  ;;  %8544 = vmatprep.subr.bf16.mxu0 %v9337_v0  ;;  %8572 = vmatprep.subr.bf16.mxu1 %v9338_v47  ;;  %v11945_v34 = vcombine.low %v4446_v1, %v4460_v24  ;;  %v11947_v30 = vcombine.high %v4446_v1, %v4460_v24  ;;  %v9343_v9 = vld [vmem:[%s12866_s5 + $0x200] sm:$0xff]   ;;  %v9346_v6 = vld [vmem:[%s12866_s5 + $0x2c8] sm:$0xff]  }
 0x33c   : > { %v3422_v50 = vcombine.high %v11922_v55, %v11904_v53  ;;  %v4453_v19 = vrot.slane %v4431_v11, %v11595_v45  ;;  %v3742_v58 = vcombine.high %v11835_v15, %v11811_v31  ;;  %v11962_v49 = vcombine.low %v4062_v22, %v4076_v12  ;;  %v3380_v24 = vld [vmem:[#allocation2 + $0x1c5] ss:$8 sm:$0xf] }
 0x33d   : > { %12885 = vst [vmem:[#allocation9_spill] sm:$0xff] %v11945_v34  ;;  %12886 = vst [vmem:[#allocation10_spill] sm:$0xff] %v11947_v30  ;;  %v11964_v0 = vcombine.high %v4062_v22, %v4076_v12  ;;  %v11973_v47 = vrot.slane %v3424_v13, %v11595_v45  ;;  %v4825_v31 = vpack.c.bf16 %v11775_v48, %v12869_v54  ;;  %v11980_v1 = vld [vmem:[#allocation2 + $0x45] ss:$8 sm:$0xf] }
 0x33e   : > { %8545 = vmatpush3.bf16.msra.mxu0 %v9339_v18  ;;  %8573 = vmatpush3.bf16.msra.mxu1 %v9340_v5  ;;  %v4827_v15 = vpack.c.bf16 %v11777_v4, %v12869_v54  ;;  %v4439_v12 = vrot.slane %v4429_v62, %v11595_v45  ;;  %v3370_v11 = vld [vmem:[#allocation2 + $0x85] ss:$8 sm:$0xf]  ;;  %v4858_v13 = vpack.c.bf16 %v11945_v34, %v11962_v49  ;;  %v3924_v34 = vld [vmem:[#allocation2 + $0x1e1] ss:$8 sm:$0xf] }
 0x33f   : > { %8586 = vmatprep.subr.bf16.mxu0 %v9341_v43  ;;  %8614 = vmatprep.subr.bf16.mxu1 %v9342_v63  ;;  %v3372_v18 = vld [vmem:[#allocation2 + $0xc5] ss:$8 sm:$0xf]  ;;  %v4860_v22 = vpack.c.bf16 %v11947_v30, %v11964_v0  ;;  %v3438_v17 = vrot.slane %v3422_v50, %v11595_v45  ;;  %v3772_v46 = vrot.slane %v3744_v37, %v11595_v45  ;;  %v3916_v43 = vld [vmem:[#allocation2 + $0xe1] ss:$8 sm:$0xf] }
 0x340   : > { %v3376_v5 = vld [vmem:[#allocation2 + $0x145] ss:$8 sm:$0xf]  ;;  %v11994_v59 = vcombine.low %v4439_v12, %v4453_v19  ;;  %v3758_v29 = vrot.slane %v3742_v58, %v11595_v45  ;;  %v3790_v58 = vcombine.low %v3370_v11, %v3372_v18  ;;  %v3914_v30 = vld [vmem:[#allocation2 + $0xa1] ss:$8 sm:$0xf] }
 0x341   : > { %v3378_v54 = vld [vmem:[#allocation2 + $0x185] ss:$8 sm:$0xf]  ;;  %7066 = vmatmul.mubr.bf16.vlgmr.msra.gmra.mrb[136].mxu0 %v4825_v31  ;;  %7115 = vmatmul.mubr.bf16.vlgmr.msra.gmra.mrb[136].mxu1 %v4827_v15  ;;  %v11999_v31 = vcombine.high %v4439_v12, %v4453_v19  ;;  %v3455_v48 = vcombine.low %v3438_v17, %v11973_v47  ;;  %v3910_v12 = vld [vmem:[#allocation2 + $0x21] ss:$8 sm:$0xf] }
 0x342   : > { %v9347_v63 = vld [vmem:[%s12866_s5 + $0x208] sm:$0xff]   ;;  %12887 = vst [vmem:[#allocation11_spill] sm:$0xff] %v11994_v59  ;;  %v3792_v37 = vcombine.low %v3378_v54, %v3380_v24  ;;  %7073 = vmatprep.mubr.bf16.mxu0 %v4858_v13  ;;  %7122 = vmatprep.mubr.bf16.mxu1 %v4860_v22  ;;  %v9349_v15 = vld [vmem:[%s12866_s5 + $0x250] sm:$0xff]   ;;  %v3456_v54 = vcombine.high %v3438_v17, %v11973_v47 }
 0x343   : > { %v9348_v62 = vld [vmem:[%s12866_s5 + $0x288] sm:$0xff]   ;;  %12888 = vst [vmem:[#allocation12_spill] sm:$0xff] %v11999_v31  ;;  %v9350_v4 = vld [vmem:[%s12866_s5 + $0x2d0] sm:$0xff]   ;;  %8587 = vmatpush3.bf16.msra.mxu0 %v9343_v9  ;;  %8615 = vmatpush3.bf16.msra.mxu1 %v9344_v38  ;;  %v4174_v13 = vcombine.low %v3914_v30, %v3916_v43  ;;  %v12009_v22 = vcombine.low %v3758_v29, %v3772_v46 }
 0x344   : > { %v3374_v50 = vld [vmem:[#allocation2 + $0x105] ss:$8 sm:$0xf]  ;;  %8588 = vmatprep.subr.bf16.mxu0 %v9345_v2  ;;  %8616 = vmatprep.subr.bf16.mxu1 %v9346_v6  ;;  %v12011_v61 = vcombine.high %v3758_v29, %v3772_v46  ;;  %v3922_v11 = vld [vmem:[#allocation2 + $0x1a1] ss:$8 sm:$0xf]  ;;  %v12015_v9 = vrot.slane %v3792_v37, %v11595_v45  ;;  %v4173_v38 = vcombine.low %v3910_v12, %v3912_v39 }
 0x345   : > { %v3366_v24 = vld [vmem:[#allocation2 + $0x5] ss:$8 sm:$0xf]  ;;  %v3791_v19 = vcombine.low %v3374_v50, %v3376_v5  ;;  %v4278_v18 = vld [vmem:[#allocation2 + $0x24] ss:$8 sm:$0xf]  ;;  %v4176_v17 = vcombine.low %v3922_v11, %v3924_v34  ;;  %v4857_v47 = vpack.c.bf16 %v11994_v59, %v11796_v26  ;;  %v4859_v30 = vpack.c.bf16 %v11999_v31, %v11798_v20 }
 0x346   : > { %v3789_v33 = vcombine.low %v3366_v24, %v11980_v1  ;;  %v4477_v2 = vcombine.low %v4278_v18, %v11997_v51  ;;  %v12023_v29 = vrot.slane %v3790_v58, %v11595_v45  ;;  %v3918_v46 = vld [vmem:[#allocation2 + $0x121] ss:$8 sm:$0xf]  ;;  %v4284_v34 = vld [vmem:[#allocation2 + $0xe4] ss:$8 sm:$0xf]  ;;  %v12035_v51 = vrot.slane %v4174_v13, %v11595_v45 }
 0x347   : > { %8589 = vmatpush3.bf16.msra.mxu0 %v9347_v63  ;;  %8617 = vmatpush3.bf16.msra.mxu1 %v9348_v62  ;;  %v9351_v6 = vld [vmem:[%s12866_s5 + $0x210] sm:$0xff]   ;;  %v12032_v1 = vrot.slane %v3791_v19, %v11595_v45  ;;  %v4175_v5 = vcombine.low %v3918_v46, %v3920_v32  ;;  %v4830_v43 = vpack.c.bf16 %v12009_v22, %v3455_v48  ;;  %v9353_v62 = vld [vmem:[%s12866_s5 + $0x258] sm:$0xff]  }
 0x348   : > { %v9352_v39 = vld [vmem:[%s12866_s5 + $0x290] sm:$0xff]   ;;  %8590 = vmatprep.subr.bf16.mxu0 %v9349_v15  ;;  %8618 = vmatprep.subr.bf16.mxu1 %v9350_v4  ;;  %v4832_v63 = vpack.c.bf16 %v12011_v61, %v3456_v54  ;;  %v9354_v50 = vld [vmem:[%s12866_s5 + $0x2d8] sm:$0xff]   ;;  %v12046_v37 = vrot.slane %v3789_v33, %v11595_v45  ;;  %v12051_v4 = vrot.slane %v4173_v38, %v11595_v45  ;;  %v9357_v38 = vld [vmem:[%s12866_s5 + $0x260] sm:$0xff]  }
 0x349   : > { %7074 = vmatmul.mubr.bf16.gmra.mrb[140].mxu0 %v4857_v47  ;;  %7123 = vmatmul.mubr.bf16.gmra.mrb[140].mxu1 %v4859_v30  ;;  %v4282_v32 = vld [vmem:[#allocation2 + $0xa4] ss:$8 sm:$0xf]  ;;  %v3823_v48 = vcombine.low %v12032_v1, %v12015_v9  ;;  %v12054_v58 = vrot.slane %v4176_v17, %v11595_v45  ;;  %v12065_v11 = vrot.slane %v4175_v5, %v11595_v45 }
 0x34a   : > { %v4292_v15 = vld [vmem:[#allocation2 + $0x1e4] ss:$8 sm:$0xf]  ;;  %7163 = vmatprep.mubr.bf16.mxu0 %v4830_v43  ;;  %7212 = vmatprep.mubr.bf16.mxu1 %v4832_v63  ;;  %v4478_v24 = vcombine.low %v4282_v32, %v4284_v34  ;;  %v3821_v19 = vcombine.low %v12046_v37, %v12023_v29  ;;  %v4205_v18 = vcombine.low %v12051_v4, %v12035_v51 }
 0x34b   : > { %v9355_v33 = vld [vmem:[%s12866_s5 + $0x218] sm:$0xff]   ;;  %8591 = vmatpush3.bf16.msra.mxu0 %v9351_v6  ;;  %8619 = vmatpush3.bf16.msra.mxu1 %v9352_v39  ;;  %v9358_v17 = vld [vmem:[%s12866_s5 + $0x2e0] sm:$0xff]   ;;  %v12076_v46 = vrot.slane %v4477_v2, %v11595_v45  ;;  %v3845_v6 = vrot.slane %v3823_v48, %v11595_v45  ;;  %v4207_v39 = vcombine.low %v12065_v11, %v12054_v58 }
 0x34c   : > { %v9356_v54 = vld [vmem:[%s12866_s5 + $0x298] sm:$0xff]   ;;  %8592 = vmatprep.subr.bf16.mxu0 %v9353_v62  ;;  %8620 = vmatprep.subr.bf16.mxu1 %v9354_v50  ;;  %v12082_v5 = vrot.slane %v4478_v24, %v11595_v45  ;;  %v3831_v43 = vrot.slane %v3821_v19, %v11595_v45  ;;  %v4215_v63 = vrot.slane %v4205_v18, %v11595_v45  ;;  %v9359_v2 = vld [vmem:[%s12866_s5 + $0x220] sm:$0xff]  }
 0x34d   : > { %v4288_v12 = vld [vmem:[#allocation2 + $0x164] ss:$8 sm:$0xf]  ;;  %v4229_v50 = vrot.slane %v4207_v39, %v11595_v45  ;;  %v3421_v48 = vcombine.low %v11922_v55, %v11904_v53  ;;  %v4128_v24 = vcombine.high %v11863_v36, %v11849_v42  ;;  %v3304_v39 = vld [vmem:[#allocation2 + $0x41] ss:$8 sm:$0xf]  ;;  %v4844_v59 = vpack.c.bf16 %v11964_v0, %v11743_v16 }
 0x34e   : > { %v4290_v13 = vld [vmem:[#allocation2 + $0x1a4] ss:$8 sm:$0xf]  ;;  %v4658_v0 = vld [vmem:[#allocation2 + $0x1a7] ss:$8 sm:$0xf] }
 0x34f   : > { %v4480_v47 = vcombine.low %v4290_v13, %v4292_v15  ;;  %v4286_v30 = vld [vmem:[#allocation2 + $0x124] ss:$8 sm:$0xf]  ;;  %8593 = vmatpush3.bf16.msra.mxu0 %v9355_v33  ;;  %8621 = vmatpush3.bf16.msra.mxu1 %v9356_v54  ;;  %v12118_v13 = vcombine.low %v3831_v43, %v3845_v6  ;;  %v12120_v18 = vcombine.low %v4215_v63, %v4229_v50  ;;  %v3306_v15 = vld [vmem:[#allocation2 + $0x81] ss:$8 sm:$0xf] }
 0x350   : > { %v4479_v34 = vcombine.low %v4286_v30, %v4288_v12  ;;  %v9360_v62 = vld [vmem:[%s12866_s5 + $0x2a0] sm:$0xff]   ;;  %8594 = vmatprep.subr.bf16.mxu0 %v9357_v38  ;;  %8622 = vmatprep.subr.bf16.mxu1 %v9358_v17  ;;  %v9361_v33 = vld [vmem:[%s12866_s5 + $0x268] sm:$0xff]   ;;  %v3423_v12 = vcombine.low %v11907_v60, %v11892_v40  ;;  %v12122_v38 = vcombine.high %v4215_v63, %v4229_v50  ;;  %v9365_v42 = vld [vmem:[%s12866_s5 + $0x270] sm:$0xff]  }
 0x351   : > { %v9362_v54 = vld [vmem:[%s12866_s5 + $0x2e8] sm:$0xff]   ;;  %v12108_v19 = vrot.slane %v4480_v47, %v11595_v45  ;;  %v9366_v36 = vld [vmem:[%s12866_s5 + $0x2f0] sm:$0xff]   ;;  %v4126_v40 = vcombine.high %v11846_v56, %v11823_v8  ;;  %v12135_v47 = vcombine.high %v3831_v43, %v3845_v6  ;;  %v4510_v30 = vcombine.high %v12076_v46, %v12082_v5  ;;  %v9454_v16 = vld [vmem:[%s12866_s5 + $0x5e0] sm:$0xff]  }
 0x352   : > { %v9363_v53 = vld [vmem:[%s12866_s5 + $0x228] sm:$0xff]   ;;  %v12133_v60 = vrot.slane %v4479_v34, %v11595_v45  ;;  %v4156_v8 = vrot.slane %v4128_v24, %v11595_v45  ;;  %v4842_v24 = vpack.c.bf16 %v11962_v49, %v11741_v57  ;;  %v9453_v57 = vld [vmem:[%s12866_s5 + $0x560] sm:$0xff]  }
 0x353   : > { %v9364_v55 = vld [vmem:[%s12866_s5 + $0x2a8] sm:$0xff]   ;;  %8595 = vmatpush3.bf16.msra.mxu0 %v9359_v2  ;;  %8623 = vmatpush3.bf16.msra.mxu1 %v9360_v62  ;;  %v3431_v2 = vrot.slane %v3421_v48, %v11595_v45  ;;  %v3445_v62 = vrot.slane %v3423_v12, %v11595_v45  ;;  %v4142_v50 = vrot.slane %v4126_v40, %v11595_v45  ;;  %v9367_v48 = vld [vmem:[%s12866_s5 + $0x230] sm:$0xff]  }
 0x354   : > { %v3316_v17 = vld [vmem:[#allocation2 + $0x1c1] ss:$8 sm:$0xf]  ;;  %8596 = vmatprep.subr.bf16.mxu0 %v9361_v33  ;;  %8624 = vmatprep.subr.bf16.mxu1 %v9362_v54  ;;  %v4512_v56 = vcombine.high %v12133_v60, %v12108_v19  ;;  %v4656_v49 = vld [vmem:[#allocation2 + $0x167] ss:$8 sm:$0xf] }
 0x355   : > { %v3308_v63 = vld [vmem:[#allocation2 + $0xc1] ss:$8 sm:$0xf] }
 0x356   : > { %v3312_v34 = vld [vmem:[#allocation2 + $0x141] ss:$8 sm:$0xf]  ;;  %v3470_v31 = vcombine.low %v3306_v15, %v3308_v63  ;;  %v4208_v15 = vcombine.high %v12065_v11, %v12054_v58  ;;  %v12167_v63 = vcombine.low %v4142_v50, %v4156_v8  ;;  %v3824_v58 = vcombine.high %v12032_v1, %v12015_v9 }
 0x357   : > { %v3314_v6 = vld [vmem:[#allocation2 + $0x181] ss:$8 sm:$0xf]  ;;  %8597 = vmatpush3.bf16.msra.mxu0 %v9363_v53  ;;  %8625 = vmatpush3.bf16.msra.mxu1 %v9364_v55  ;;  %v4206_v11 = vcombine.high %v12051_v4, %v12035_v51  ;;  %v3822_v51 = vcombine.high %v12046_v37, %v12023_v29 }
 0x358   : > { %v3472_v32 = vcombine.low %v3314_v6, %v3316_v17  ;;  %v3302_v33 = vld [vmem:[#allocation2 + $0x1] ss:$8 sm:$0xf]  ;;  %8598 = vmatprep.subr.bf16.mxu0 %v9365_v42  ;;  %8626 = vmatprep.subr.bf16.mxu1 %v9366_v36  ;;  %v4526_v6 = vrot.slane %v4510_v30, %v11595_v45  ;;  %v3454_v42 = vcombine.high %v3431_v2, %v3445_v62 }
 0x359   : > { %v3310_v54 = vld [vmem:[#allocation2 + $0x101] ss:$8 sm:$0xf]  ;;  %v3469_v40 = vcombine.low %v3302_v33, %v3304_v39  ;;  %v4540_v39 = vrot.slane %v4512_v56, %v11595_v45  ;;  %v12178_v36 = vcombine.high %v4142_v50, %v4156_v8  ;;  %v12183_v30 = vrot.slane %v3470_v31, %v11595_v45 }
 0x35a   : > { %v9368_v12 = vld [vmem:[%s12866_s5 + $0x2b0] sm:$0xff]   ;;  %v3471_v17 = vcombine.low %v3310_v54, %v3312_v34  ;;  %v9369_v53 = vld [vmem:[%s12866_s5 + $0x278] sm:$0xff]   ;;  %v3453_v34 = vcombine.low %v3431_v2, %v3445_v62  ;;  %v12172_v33 = vrot.slane %v3472_v32, %v11595_v45  ;;  %v4511_v54 = vcombine.low %v12133_v60, %v12108_v19  ;;  %v9373_v31 = vld [vmem:[%s12866_s5 + $0x340] sm:$0xff]  }
 0x35b   : > { %v9370_v55 = vld [vmem:[%s12866_s5 + $0x2f8] sm:$0xff]   ;;  %8599 = vmatpush3.bf16.msra.mxu0 %v9367_v48  ;;  %8627 = vmatpush3.bf16.msra.mxu1 %v9368_v12  ;;  %v4236_v4 = vrot.slane %v4208_v15, %v11595_v45  ;;  %v9374_v19 = vld [vmem:[%s12866_s5 + $0x3c0] sm:$0xff]   ;;  %v12203_v60 = vcombine.low %v4526_v6, %v4540_v39  ;;  %v12205_v50 = vcombine.high %v4526_v6, %v4540_v39  ;;  %v9377_v39 = vld [vmem:[%s12866_s5 + $0x348] sm:$0xff]  }
 0x35c   : > { %v9371_v32 = vld [vmem:[%s12866_s5 + $0x238] sm:$0xff]   ;;  %v12192_v1 = vrot.slane %v3471_v17, %v11595_v45  ;;  %8600 = vmatprep.subr.bf16.mxu0 %v9369_v53  ;;  %8628 = vmatprep.subr.bf16.mxu1 %v9370_v55  ;;  %v4846_v8 = vpack.c.bf16 %v12167_v63, %v12009_v22  ;;  %v12210_v29 = vrot.slane %v3469_v40, %v11595_v45  ;;  %v9485_v22 = vld [vmem:[%s12866_s5 + $0x660] sm:$0xff]  }
 0x35d   : > { %v9372_v9 = vld [vmem:[%s12866_s5 + $0x2b8] sm:$0xff]   ;;  %v3852_v56 = vrot.slane %v3824_v58, %v11595_v45  ;;  %v4222_v2 = vrot.slane %v4206_v11, %v11595_v45  ;;  %v4829_v62 = vpack.c.bf16 %v11909_v27, %v3453_v34  ;;  %v4831_v48 = vpack.c.bf16 %v11911_v52, %v3454_v42  ;;  %v9378_v34 = vld [vmem:[%s12866_s5 + $0x3c8] sm:$0xff]  }
 0x35e   : > { %v3504_v37 = vcombine.high %v12192_v1, %v12172_v33  ;;  %v4509_v12 = vcombine.low %v12076_v46, %v12082_v5  ;;  %v3502_v40 = vcombine.high %v12210_v29, %v12183_v30  ;;  %v3838_v17 = vrot.slane %v3822_v51, %v11595_v45  ;;  %v9375_v46 = vld [vmem:[%s12866_s5 + $0x300] sm:$0xff]  }
 0x35f   : > { %8601 = vmatpush3.bf16.msra.mxu0 %v9371_v32  ;;  %8629 = vmatpush3.bf16.msra.mxu1 %v9372_v9  ;;  %v12223_v15 = vcombine.low %v4222_v2, %v4236_v4  ;;  %v4862_v53 = vpack.c.bf16 %v12203_v60, %v12167_v63  ;;  %v4864_v55 = vpack.c.bf16 %v12205_v50, %v12178_v36  ;;  %v9376_v5 = vld [vmem:[%s12866_s5 + $0x380] sm:$0xff]  }
 0x360   : > { %8642 = vmatprep.subr.bf16.mxu0 %v9373_v31  ;;  %8670 = vmatprep.subr.bf16.mxu1 %v9374_v19  ;;  %v4533_v6 = vrot.slane %v4511_v54, %v11595_v45  ;;  %v3532_v58 = vrot.slane %v3504_v37, %v11595_v45  ;;  %v12243_v11 = vcombine.low %v3838_v17, %v3852_v56  ;;  %v9380_v19 = vld [vmem:[%s12866_s5 + $0x388] sm:$0xff]   ;;  %v9487_v63 = vld [vmem:[%s12866_s5 + $0x620] sm:$0xff]  }
 0x361   : > { %v12245_v42 = vcombine.high %v4222_v2, %v4236_v4  ;;  %v4848_v32 = vpack.c.bf16 %v12178_v36, %v12011_v61  ;;  %v4519_v54 = vrot.slane %v4509_v12, %v11595_v45  ;;  %v3518_v9 = vrot.slane %v3502_v40, %v11595_v45  ;;  %v9379_v4 = vld [vmem:[%s12866_s5 + $0x308] sm:$0xff]   ;;  %v9486_v61 = vld [vmem:[%s12866_s5 + $0x6e0] sm:$0xff]  }
 0x362   : > { %7164 = vmatmul.mubr.bf16.vlgmr.msra.gmra.mrb[144].mxu0 %v4829_v62  ;;  %7213 = vmatmul.mubr.bf16.vlgmr.msra.gmra.mrb[144].mxu1 %v4831_v48  ;;  %v12251_v51 = vcombine.high %v3838_v17, %v3852_v56  ;;  %v4850_v31 = vpack.c.bf16 %v12223_v15, %v12243_v11  ;;  %v9381_v56 = vld [vmem:[%s12866_s5 + $0x350] sm:$0xff]   ;;  %v9488_v36 = vld [vmem:[%s12866_s5 + $0x6a0] sm:$0xff]  }
 0x363   : > { %7171 = vmatprep.mubr.bf16.mxu0 %v4862_v53  ;;  %7220 = vmatprep.mubr.bf16.mxu1 %v4864_v55  ;;  %v12261_v37 = vcombine.low %v4519_v54, %v4533_v6  ;;  %v12263_v2 = vcombine.high %v4519_v54, %v4533_v6  ;;  %v9382_v62 = vld [vmem:[%s12866_s5 + $0x3d0] sm:$0xff]   ;;  %v3535_v48 = vcombine.low %v3518_v9, %v3532_v58  ;;  %v9388_v54 = vld [vmem:[%s12866_s5 + $0x398] sm:$0xff]  }
 0x364   : > { %8643 = vmatpush3.bf16.msra.mxu0 %v9375_v46  ;;  %8671 = vmatpush3.bf16.msra.mxu1 %v9376_v5  ;;  %v3536_v12 = vcombine.high %v3518_v9, %v3532_v58  ;;  %v4852_v40 = vpack.c.bf16 %v12245_v42, %v12251_v51  ;;  %v9383_v55 = vld [vmem:[%s12866_s5 + $0x310] sm:$0xff]   ;;  %v9387_v58 = vld [vmem:[%s12866_s5 + $0x318] sm:$0xff]  }
 0x365   : > { %8644 = vmatprep.subr.bf16.mxu0 %v9377_v39  ;;  %8672 = vmatprep.subr.bf16.mxu1 %v9378_v34  ;;  %v4861_v17 = vpack.c.bf16 %v12261_v37, %v11913_v3  ;;  %v4863_v53 = vpack.c.bf16 %v12263_v2, %v11915_v35  ;;  %v9384_v46 = vld [vmem:[%s12866_s5 + $0x390] sm:$0xff]   ;;  %v4834_v5 = vpack.c.bf16 %v12243_v11, %v3535_v48  ;;  %v9385_v39 = vld [vmem:[%s12866_s5 + $0x358] sm:$0xff]   ;;  %v9518_v11 = vld [vmem:[%s12866_s5 + $0x7e0] sm:$0xff]  }
 0x366   : > { %v4836_v6 = vpack.c.bf16 %v12251_v51, %v3536_v12  ;;  %v9386_v34 = vld [vmem:[%s12866_s5 + $0x3d8] sm:$0xff]   ;;  %v9520_v51 = vld [vmem:[%s12866_s5 + $0x7a0] sm:$0xff]  }
 0x367   : > { %v4308_v9 = vld [vmem:[#allocation2 + $0x1e5] ss:$8 sm:$0xf] }
 0x368   : > { %8645 = vmatpush3.bf16.msra.mxu0 %v9379_v4  ;;  %8673 = vmatpush3.bf16.msra.mxu1 %v9380_v19  ;;  %v9389_v4 = vld [vmem:[%s12866_s5 + $0x360] sm:$0xff]  }
 0x369   : > { %8646 = vmatprep.subr.bf16.mxu0 %v9381_v56  ;;  %8674 = vmatprep.subr.bf16.mxu1 %v9382_v62  ;;  %v9390_v19 = vld [vmem:[%s12866_s5 + $0x3e0] sm:$0xff]  }
 0x36a   : > { %7172 = vmatmul.mubr.bf16.gmra.mrb[148].mxu0 %v4861_v17  ;;  %7221 = vmatmul.mubr.bf16.gmra.mrb[148].mxu1 %v4863_v53  ;;  %v4300_v56 = vld [vmem:[#allocation2 + $0xe5] ss:$8 sm:$0xf] }
 0x36b   : > { %7261 = vmatprep.mubr.bf16.mxu0 %v4834_v5  ;;  %7310 = vmatprep.mubr.bf16.mxu1 %v4836_v6  ;;  %v4304_v62 = vld [vmem:[#allocation2 + $0x165] ss:$8 sm:$0xf] }
 0x36c   : > { %8647 = vmatpush3.bf16.msra.mxu0 %v9383_v55  ;;  %8675 = vmatpush3.bf16.msra.mxu1 %v9384_v46  ;;  %v4306_v48 = vld [vmem:[#allocation2 + $0x1a5] ss:$8 sm:$0xf] }
 0x36d   : > { %8648 = vmatprep.subr.bf16.mxu0 %v9385_v39  ;;  %8676 = vmatprep.subr.bf16.mxu1 %v9386_v34  ;;  %v4296_v12 = vld [vmem:[#allocation2 + $0x65] ss:$8 sm:$0xf]  ;;  %v4560_v17 = vcombine.low %v4306_v48, %v4308_v9  ;;  %v3503_v48 = vcombine.low %v12192_v1, %v12172_v33 }
 0x36e   : > { %v4298_v53 = vld [vmem:[#allocation2 + $0xa5] ss:$8 sm:$0xf] }
 0x36f   : > { %v4302_v5 = vld [vmem:[#allocation2 + $0x125] ss:$8 sm:$0xf]  ;;  %v4558_v6 = vcombine.low %v4298_v53, %v4300_v56  ;;  %v4588_v9 = vrot.slane %v4560_v17, %v11595_v45 }
 0x370   : > { %8649 = vmatpush3.bf16.msra.mxu0 %v9387_v58  ;;  %8677 = vmatpush3.bf16.msra.mxu1 %v9388_v54  ;;  %v9391_v55 = vld [vmem:[%s12866_s5 + $0x320] sm:$0xff]   ;;  %v4559_v43 = vcombine.low %v4302_v5, %v4304_v62  ;;  %v9393_v39 = vld [vmem:[%s12866_s5 + $0x368] sm:$0xff]   ;;  %v9398_v17 = vld [vmem:[%s12866_s5 + $0x3f0] sm:$0xff]  }
 0x371   : > { %v9392_v46 = vld [vmem:[%s12866_s5 + $0x3a0] sm:$0xff]   ;;  %8650 = vmatprep.subr.bf16.mxu0 %v9389_v4  ;;  %8678 = vmatprep.subr.bf16.mxu1 %v9390_v19  ;;  %v9394_v34 = vld [vmem:[%s12866_s5 + $0x3e8] sm:$0xff]   ;;  %v4574_v19 = vrot.slane %v4558_v6, %v11595_v45  ;;  %v9400_v33 = vld [vmem:[%s12866_s5 + $0x3b0] sm:$0xff]  }
 0x372   : > { %v4294_v58 = vld [vmem:[#allocation2 + $0x25] ss:$8 sm:$0xf]  ;;  %v4581_v62 = vrot.slane %v4559_v43, %v11595_v45 }
 0x373   : > { %v4557_v54 = vcombine.low %v4294_v58, %v4296_v12  ;;  %v9395_v56 = vld [vmem:[%s12866_s5 + $0x328] sm:$0xff]   ;;  %v9397_v12 = vld [vmem:[%s12866_s5 + $0x370] sm:$0xff]   ;;  %v9404_v58 = vld [vmem:[%s12866_s5 + $0x3b8] sm:$0xff]  }
 0x374   : > { %8651 = vmatpush3.bf16.msra.mxu0 %v9391_v55  ;;  %8679 = vmatpush3.bf16.msra.mxu1 %v9392_v46  ;;  %v9396_v4 = vld [vmem:[%s12866_s5 + $0x3a8] sm:$0xff]   ;;  %v4592_v5 = vcombine.high %v4581_v62, %v4588_v9  ;;  %v3501_v55 = vcombine.low %v12210_v29, %v12183_v30  ;;  %v9399_v43 = vld [vmem:[%s12866_s5 + $0x330] sm:$0xff]   ;;  %v9401_v46 = vld [vmem:[%s12866_s5 + $0x378] sm:$0xff]   ;;  %v3525_v29 = vrot.slane %v3503_v48, %v11595_v45 }
 0x375   : > { %8652 = vmatprep.subr.bf16.mxu0 %v9393_v39  ;;  %8680 = vmatprep.subr.bf16.mxu1 %v9394_v34  ;;  %v4567_v53 = vrot.slane %v4557_v54, %v11595_v45  ;;  %v9402_v30 = vld [vmem:[%s12866_s5 + $0x3f8] sm:$0xff]   ;;  %v9405_v48 = vld [vmem:[%s12866_s5 + $0x440] sm:$0xff]  }
 0x376   : > { %v4620_v6 = vrot.slane %v4592_v5, %v11595_v45  ;;  %v3511_v39 = vrot.slane %v3501_v55, %v11595_v45  ;;  %v9403_v34 = vld [vmem:[%s12866_s5 + $0x338] sm:$0xff]  }
 0x377   : > { %v4590_v1 = vcombine.high %v4567_v53, %v4574_v19 }
 0x378   : > { %8653 = vmatpush3.bf16.msra.mxu0 %v9395_v56  ;;  %8681 = vmatpush3.bf16.msra.mxu1 %v9396_v4  ;;  %v3533_v56 = vcombine.low %v3511_v39, %v3525_v29  ;;  %v3534_v4 = vcombine.high %v3511_v39, %v3525_v29  ;;  %v9410_v29 = vld [vmem:[%s12866_s5 + $0x4c8] sm:$0xff]  }
 0x379   : > { %8654 = vmatprep.subr.bf16.mxu0 %v9397_v12  ;;  %8682 = vmatprep.subr.bf16.mxu1 %v9398_v17  ;;  %v4606_v54 = vrot.slane %v4590_v1, %v11595_v45  ;;  %v9406_v12 = vld [vmem:[%s12866_s5 + $0x4c0] sm:$0xff]   ;;  %v4591_v17 = vcombine.low %v4581_v62, %v4588_v9  ;;  %v9411_v39 = vld [vmem:[%s12866_s5 + $0x408] sm:$0xff]  }
 0x37a   : > { %v4835_v1 = vpack.c.bf16 %v12135_v47, %v3534_v4  ;;  %v9408_v9 = vld [vmem:[%s12866_s5 + $0x480] sm:$0xff]   ;;  %v9414_v4 = vld [vmem:[%s12866_s5 + $0x4d0] sm:$0xff]  }
 0x37b   : > { %v12363_v5 = vcombine.low %v4606_v54, %v4620_v6  ;;  %v12365_v55 = vcombine.high %v4606_v54, %v4620_v6  ;;  %v4613_v62 = vrot.slane %v4591_v17, %v11595_v45  ;;  %v9415_v17 = vld [vmem:[%s12866_s5 + $0x410] sm:$0xff]  }
 0x37c   : > { %8655 = vmatpush3.bf16.msra.mxu0 %v9399_v43  ;;  %8683 = vmatpush3.bf16.msra.mxu1 %v9400_v33  ;;  %v4589_v43 = vcombine.low %v4567_v53, %v4574_v19  ;;  %v4833_v33 = vpack.c.bf16 %v12118_v13, %v3533_v56  ;;  %v9413_v56 = vld [vmem:[%s12866_s5 + $0x450] sm:$0xff]  }
 0x37d   : > { %8656 = vmatprep.subr.bf16.mxu0 %v9401_v46  ;;  %8684 = vmatprep.subr.bf16.mxu1 %v9402_v30  ;;  %v9407_v46 = vld [vmem:[%s12866_s5 + $0x400] sm:$0xff]   ;;  %v4866_v19 = vpack.c.bf16 %v12363_v5, %v12223_v15  ;;  %v4868_v53 = vpack.c.bf16 %v12365_v55, %v12245_v42  ;;  %v9409_v30 = vld [vmem:[%s12866_s5 + $0x448] sm:$0xff]  }
 0x37e   : > { %v4599_v6 = vrot.slane %v4589_v43, %v11595_v45  ;;  %v9416_v43 = vld [vmem:[%s12866_s5 + $0x490] sm:$0xff]   ;;  %v9517_v15 = vld [vmem:[%s12866_s5 + $0x760] sm:$0xff]  }
 0x37f   : > { %v9519_v42 = vld [vmem:[%s12866_s5 + $0x720] sm:$0xff]  }
 0x380   : > { %8657 = vmatpush3.bf16.msra.mxu0 %v9403_v34  ;;  %8685 = vmatpush3.bf16.msra.mxu1 %v9404_v58  ;;  %v9412_v34 = vld [vmem:[%s12866_s5 + $0x488] sm:$0xff]   ;;  %v12393_v58 = vcombine.low %v4599_v6, %v4613_v62  ;;  %v12395_v54 = vcombine.high %v4599_v6, %v4613_v62  ;;  %v9419_v62 = vld [vmem:[%s12866_s5 + $0x418] sm:$0xff]  }
 0x381   : > { %8698 = vmatprep.subr.bf16.mxu0 %v9405_v48  ;;  %8726 = vmatprep.subr.bf16.mxu1 %v9406_v12 }
 0x382   : > { %v4865_v48 = vpack.c.bf16 %v12393_v58, %v12120_v18  ;;  %v4867_v12 = vpack.c.bf16 %v12395_v54, %v12122_v38 }
 0x383   : > { %7262 = vmatmul.mubr.bf16.vlgmr.msra.gmra.mrb[152].mxu0 %v4833_v33  ;;  %7311 = vmatmul.mubr.bf16.vlgmr.msra.gmra.mrb[152].mxu1 %v4835_v1  ;;  %v9417_v33 = vld [vmem:[%s12866_s5 + $0x458] sm:$0xff]  }
 0x384   : > { %7269 = vmatprep.mubr.bf16.mxu0 %v4866_v19  ;;  %7318 = vmatprep.mubr.bf16.mxu1 %v4868_v53  ;;  %v9418_v1 = vld [vmem:[%s12866_s5 + $0x4d8] sm:$0xff]  }
 0x385   : > { %8699 = vmatpush3.bf16.msra.mxu0 %v9407_v46  ;;  %8727 = vmatpush3.bf16.msra.mxu1 %v9408_v9  ;;  %v12889_v46 = vpack.c.bf16 %v11660_v41, %v11652_v14  ;;  %v12890_v9 = vpack.c.bf16 %v11663_v25, %v11654_v28  ;;  %v9420_v19 = vld [vmem:[%s12866_s5 + $0x498] sm:$0xff]   ;;  %v9421_v14 = vld [vmem:[%s12866_s5 + $0x460] sm:$0xff]  }
 0x386   : > { %8700 = vmatprep.subr.bf16.mxu0 %v9409_v30  ;;  %8728 = vmatprep.subr.bf16.mxu1 %v9410_v29  ;;  %v4644_v53 = vld [vmem:[#allocation2 + $0x1e6] ss:$8 sm:$0xf] }
 0x387   : > { %v9422_v28 = vld [vmem:[%s12866_s5 + $0x4e0] sm:$0xff]  }
 0x388   : > { %v4636_v41 = vld [vmem:[#allocation2 + $0xe6] ss:$8 sm:$0xf] }
 0x389   : > { %8701 = vmatpush3.bf16.msra.mxu0 %v9411_v39  ;;  %8729 = vmatpush3.bf16.msra.mxu1 %v9412_v34  ;;  %v4640_v25 = vld [vmem:[#allocation2 + $0x166] ss:$8 sm:$0xf] }
 0x38a   : > { %8702 = vmatprep.subr.bf16.mxu0 %v9413_v56  ;;  %8730 = vmatprep.subr.bf16.mxu1 %v9414_v4  ;;  %v4642_v30 = vld [vmem:[#allocation2 + $0x1a6] ss:$8 sm:$0xf] }
 0x38b   : > { %7270 = vmatmul.mubr.bf16.gmra.mrb[156].mxu0 %v4865_v48  ;;  %7319 = vmatmul.mubr.bf16.gmra.mrb[156].mxu1 %v4867_v12  ;;  %v4632_v29 = vld [vmem:[#allocation2 + $0x66] ss:$8 sm:$0xf]  ;;  %v4672_v6 = vcombine.low %v4642_v30, %v4644_v53 }
 0x38c   : > { %7359 = vmatprep.mubr.bf16.mxu0 %v12889_v46  ;;  %7408 = vmatprep.mubr.bf16.mxu1 %v12890_v9  ;;  %v4634_v39 = vld [vmem:[#allocation2 + $0xa6] ss:$8 sm:$0xf] }
 0x38d   : > { %8703 = vmatpush3.bf16.msra.mxu0 %v9415_v17  ;;  %8731 = vmatpush3.bf16.msra.mxu1 %v9416_v43  ;;  %v4638_v34 = vld [vmem:[#allocation2 + $0x126] ss:$8 sm:$0xf]  ;;  %v4670_v48 = vcombine.low %v4634_v39, %v4636_v41  ;;  %v4700_v46 = vrot.slane %v4672_v6, %v11595_v45 }
 0x38e   : > { %8704 = vmatprep.subr.bf16.mxu0 %v9417_v33  ;;  %8732 = vmatprep.subr.bf16.mxu1 %v9418_v1  ;;  %v9423_v56 = vld [vmem:[%s12866_s5 + $0x420] sm:$0xff]   ;;  %v4671_v12 = vcombine.low %v4638_v34, %v4640_v25  ;;  %v9425_v17 = vld [vmem:[%s12866_s5 + $0x468] sm:$0xff]   ;;  %v9431_v30 = vld [vmem:[%s12866_s5 + $0x430] sm:$0xff]  }
 0x38f   : > { %v9424_v4 = vld [vmem:[%s12866_s5 + $0x4a0] sm:$0xff]   ;;  %v9426_v43 = vld [vmem:[%s12866_s5 + $0x4e8] sm:$0xff]   ;;  %v9433_v39 = vld [vmem:[%s12866_s5 + $0x478] sm:$0xff]  }
 0x390   : > { %v4630_v33 = vld [vmem:[#allocation2 + $0x26] ss:$8 sm:$0xf]  ;;  %v4693_v53 = vrot.slane %v4671_v12, %v11595_v45 }
 0x391   : > { %8705 = vmatpush3.bf16.msra.mxu0 %v9419_v62  ;;  %8733 = vmatpush3.bf16.msra.mxu1 %v9420_v19  ;;  %v4669_v1 = vcombine.low %v4630_v33, %v4632_v29  ;;  %v9427_v9 = vld [vmem:[%s12866_s5 + $0x428] sm:$0xff]   ;;  %v4686_v19 = vrot.slane %v4670_v48, %v11595_v45  ;;  %v9432_v29 = vld [vmem:[%s12866_s5 + $0x4b0] sm:$0xff]   ;;  %v9434_v34 = vld [vmem:[%s12866_s5 + $0x4f8] sm:$0xff]  }
 0x392   : > { %8706 = vmatprep.subr.bf16.mxu0 %v9421_v14  ;;  %8734 = vmatprep.subr.bf16.mxu1 %v9422_v28  ;;  %v9428_v62 = vld [vmem:[%s12866_s5 + $0x4a8] sm:$0xff]   ;;  %v9429_v14 = vld [vmem:[%s12866_s5 + $0x470] sm:$0xff]   ;;  %v4704_v25 = vcombine.high %v4693_v53, %v4700_v46  ;;  %v9436_v48 = vld [vmem:[%s12866_s5 + $0x4b8] sm:$0xff]   ;;  %v4703_v33 = vcombine.low %v4693_v53, %v4700_v46 }
 0x393   : > { %v9430_v28 = vld [vmem:[%s12866_s5 + $0x4f0] sm:$0xff]   ;;  %v4679_v41 = vrot.slane %v4669_v1, %v11595_v45  ;;  %v9442_v53 = vld [vmem:[%s12866_s5 + $0x5c8] sm:$0xff]  }
 0x395   : > { %8707 = vmatpush3.bf16.msra.mxu0 %v9423_v56  ;;  %8735 = vmatpush3.bf16.msra.mxu1 %v9424_v4  ;;  %v4702_v6 = vcombine.high %v4679_v41, %v4686_v19  ;;  %v4732_v56 = vrot.slane %v4704_v25, %v11595_v45  ;;  %v9435_v4 = vld [vmem:[%s12866_s5 + $0x438] sm:$0xff]   ;;  %v4725_v25 = vrot.slane %v4703_v33, %v11595_v45 }
 0x396   : > { %8708 = vmatprep.subr.bf16.mxu0 %v9425_v17  ;;  %8736 = vmatprep.subr.bf16.mxu1 %v9426_v43  ;;  %v9437_v17 = vld [vmem:[%s12866_s5 + $0x540] sm:$0xff]   ;;  %v9449_v33 = vld [vmem:[%s12866_s5 + $0x558] sm:$0xff]  }
 0x397   : > { %v4718_v12 = vrot.slane %v4702_v6, %v11595_v45  ;;  %v9438_v43 = vld [vmem:[%s12866_s5 + $0x5c0] sm:$0xff]  }
 0x399   : > { %8709 = vmatpush3.bf16.msra.mxu0 %v9427_v9  ;;  %8737 = vmatpush3.bf16.msra.mxu1 %v9428_v62  ;;  %v4735_v1 = vcombine.low %v4718_v12, %v4732_v56  ;;  %v4736_v9 = vcombine.high %v4718_v12, %v4732_v56  ;;  %v4701_v62 = vcombine.low %v4679_v41, %v4686_v19  ;;  %v9441_v19 = vld [vmem:[%s12866_s5 + $0x548] sm:$0xff]  }
 0x39a   : > { %8710 = vmatprep.subr.bf16.mxu0 %v9429_v14  ;;  %8738 = vmatprep.subr.bf16.mxu1 %v9430_v28  ;;  %v9439_v14 = vld [vmem:[%s12866_s5 + $0x500] sm:$0xff]   ;;  %v12891_v41 = vpack.c.bf16 %v11665_v7, %v11656_v44  ;;  %v12894_v56 = vld [vmem:[#allocation5_spill] sm:$0xff] }
 0x39b   : > { %v9440_v28 = vld [vmem:[%s12866_s5 + $0x580] sm:$0xff]   ;;  %v4872_v46 = vpack.c.bf16 %v4736_v9, %v11683_v23  ;;  %v9443_v23 = vld [vmem:[%s12866_s5 + $0x508] sm:$0xff]   ;;  %v9451_v9 = vld [vmem:[%s12866_s5 + $0x518] sm:$0xff]  }
 0x39d   : > { %8711 = vmatpush3.bf16.msra.mxu0 %v9431_v30  ;;  %8739 = vmatpush3.bf16.msra.mxu1 %v9432_v29  ;;  %v4870_v30 = vpack.c.bf16 %v4735_v1, %v11681_v21  ;;  %v12892_v29 = vld [vmem:[#allocation4_spill] sm:$0xff]  ;;  %v4711_v21 = vrot.slane %v4701_v62, %v11595_v45  ;;  %v9450_v1 = vld [vmem:[%s12866_s5 + $0x5d8] sm:$0xff]  }
 0x39e   : > { %8712 = vmatprep.subr.bf16.mxu0 %v9433_v39  ;;  %8740 = vmatprep.subr.bf16.mxu1 %v9434_v34  ;;  %v12893_v6 = vpack.c.bf16 %v11694_v10, %v12892_v29  ;;  %v9444_v39 = vld [vmem:[%s12866_s5 + $0x588] sm:$0xff]   ;;  %v9445_v10 = vld [vmem:[%s12866_s5 + $0x550] sm:$0xff]   ;;  %v9452_v62 = vld [vmem:[%s12866_s5 + $0x598] sm:$0xff]  }
 0x39f   : > { %v4733_v44 = vcombine.low %v4711_v21, %v4725_v25  ;;  %v4734_v7 = vcombine.high %v4711_v21, %v4725_v25  ;;  %v9446_v34 = vld [vmem:[%s12866_s5 + $0x5d0] sm:$0xff]   ;;  %v9457_v29 = vld [vmem:[%s12866_s5 + $0x568] sm:$0xff]  }
 0x3a0   : > { %v4650_v25 = vld [vmem:[#allocation2 + $0xa7] ss:$8 sm:$0xf] }
 0x3a1   : > { %8713 = vmatpush3.bf16.msra.mxu0 %v9435_v4  ;;  %8741 = vmatpush3.bf16.msra.mxu1 %v9436_v48  ;;  %v4869_v4 = vpack.c.bf16 %v4733_v44, %v12894_v56  ;;  %v12895_v48 = vld [vmem:[#allocation6_spill] sm:$0xff]  ;;  %v9459_v44 = vld [vmem:[%s12866_s5 + $0x528] sm:$0xff]  }
 0x3a2   : > { %8754 = vmatprep.subr.bf16.mxu0 %v9437_v17  ;;  %8782 = vmatprep.subr.bf16.mxu1 %v9438_v43  ;;  %v4871_v12 = vpack.c.bf16 %v4734_v7, %v12895_v48  ;;  %v9447_v17 = vld [vmem:[%s12866_s5 + $0x510] sm:$0xff]   ;;  %v9460_v7 = vld [vmem:[%s12866_s5 + $0x5a8] sm:$0xff]  }
 0x3a3   : > { %v9448_v43 = vld [vmem:[%s12866_s5 + $0x590] sm:$0xff]  }
 0x3a4   : > { %7360 = vmatmul.mubr.bf16.vlgmr.msra.gmra.mrb[160].mxu0 %v12891_v41  ;;  %7409 = vmatmul.mubr.bf16.vlgmr.msra.gmra.mrb[160].mxu1 %v12893_v6  ;;  %v9458_v6 = vld [vmem:[%s12866_s5 + $0x5e8] sm:$0xff]   ;;  %v9461_v56 = vld [vmem:[%s12866_s5 + $0x570] sm:$0xff]  }
 0x3a5   : > { %7367 = vmatprep.mubr.bf16.mxu0 %v4870_v30  ;;  %7416 = vmatprep.mubr.bf16.mxu1 %v4872_v46  ;;  %v4654_v30 = vld [vmem:[#allocation2 + $0x127] ss:$8 sm:$0xf] }
 0x3a6   : > { %8755 = vmatpush3.bf16.msra.mxu0 %v9439_v14  ;;  %8783 = vmatpush3.bf16.msra.mxu1 %v9440_v28  ;;  %v4660_v14 = vld [vmem:[#allocation2 + $0x1e7] ss:$8 sm:$0xf]  ;;  %v4751_v41 = vcombine.low %v4654_v30, %v4656_v49 }
 0x3a7   : > { %8756 = vmatprep.subr.bf16.mxu0 %v9441_v19  ;;  %8784 = vmatprep.subr.bf16.mxu1 %v9442_v53  ;;  %v4752_v28 = vcombine.low %v4658_v0, %v4660_v14  ;;  %v9455_v46 = vld [vmem:[%s12866_s5 + $0x520] sm:$0xff]   ;;  %v9467_v14 = vld [vmem:[%s12866_s5 + $0x538] sm:$0xff]  }
 0x3a8   : > { %v9456_v19 = vld [vmem:[%s12866_s5 + $0x5a0] sm:$0xff]  }
 0x3a9   : > { %v4646_v21 = vld [vmem:[#allocation2 + $0x27] ss:$8 sm:$0xf] }
 0x3aa   : > { %8757 = vmatpush3.bf16.msra.mxu0 %v9443_v23  ;;  %8785 = vmatpush3.bf16.msra.mxu1 %v9444_v39  ;;  %v4780_v39 = vrot.slane %v4752_v28, %v11595_v45  ;;  %v9470_v49 = vld [vmem:[%s12866_s5 + $0x6c0] sm:$0xff]  }
 0x3ab   : > { %8758 = vmatprep.subr.bf16.mxu0 %v9445_v10  ;;  %8786 = vmatprep.subr.bf16.mxu1 %v9446_v34  ;;  %v4773_v34 = vrot.slane %v4751_v41, %v11595_v45  ;;  %v9471_v30 = vld [vmem:[%s12866_s5 + $0x600] sm:$0xff]  }
 0x3ac   : > { %7368 = vmatmul.mubr.bf16.gmra.mrb[164].mxu0 %v4869_v4  ;;  %7417 = vmatmul.mubr.bf16.gmra.mrb[164].mxu1 %v4871_v12  ;;  %v9462_v4 = vld [vmem:[%s12866_s5 + $0x5f0] sm:$0xff]  }
 0x3ad   : > { %7457 = vmatprep.mubr.bf16.mxu0 %v4842_v24  ;;  %7506 = vmatprep.mubr.bf16.mxu1 %v4844_v59  ;;  %v4652_v59 = vld [vmem:[#allocation2 + $0xe7] ss:$8 sm:$0xf]  ;;  %v4784_v12 = vcombine.high %v4773_v34, %v4780_v39  ;;  %v4783_v0 = vcombine.low %v4773_v34, %v4780_v39 }
 0x3ae   : > { %8759 = vmatpush3.bf16.msra.mxu0 %v9447_v17  ;;  %8787 = vmatpush3.bf16.msra.mxu1 %v9448_v43  ;;  %v4648_v24 = vld [vmem:[#allocation2 + $0x67] ss:$8 sm:$0xf]  ;;  %v4750_v53 = vcombine.low %v4650_v25, %v4652_v59 }
 0x3af   : > { %8760 = vmatprep.subr.bf16.mxu0 %v9449_v33  ;;  %8788 = vmatprep.subr.bf16.mxu1 %v9450_v1  ;;  %v4749_v23 = vcombine.low %v4646_v21, %v4648_v24  ;;  %v9463_v17 = vld [vmem:[%s12866_s5 + $0x530] sm:$0xff]   ;;  %v9465_v1 = vld [vmem:[%s12866_s5 + $0x578] sm:$0xff]   ;;  %v9469_v59 = vld [vmem:[%s12866_s5 + $0x640] sm:$0xff]  }
 0x3b0   : > { %v4766_v10 = vrot.slane %v4750_v53, %v11595_v45  ;;  %v9464_v43 = vld [vmem:[%s12866_s5 + $0x5b0] sm:$0xff]   ;;  %v12896_v53 = vld [vmem:[#allocation9_spill] sm:$0xff]  ;;  %v12898_v39 = vld [vmem:[#allocation7_spill] sm:$0xff] }
 0x3b1   : > { %v4759_v48 = vrot.slane %v4749_v23, %v11595_v45  ;;  %v9473_v21 = vld [vmem:[%s12866_s5 + $0x648] sm:$0xff]  }
 0x3b2   : > { %8761 = vmatpush3.bf16.msra.mxu0 %v9451_v9  ;;  %8789 = vmatpush3.bf16.msra.mxu1 %v9452_v62  ;;  %v9466_v9 = vld [vmem:[%s12866_s5 + $0x5f8] sm:$0xff]   ;;  %v4812_v62 = vrot.slane %v4784_v12, %v11595_v45  ;;  %v9474_v23 = vld [vmem:[%s12866_s5 + $0x6c8] sm:$0xff]  }
 0x3b3   : > { %8762 = vmatprep.subr.bf16.mxu0 %v9453_v57  ;;  %8790 = vmatprep.subr.bf16.mxu1 %v9454_v16  ;;  %v4782_v33 = vcombine.high %v4759_v48, %v4766_v10  ;;  %v9468_v57 = vld [vmem:[%s12866_s5 + $0x5b8] sm:$0xff]   ;;  %v4781_v25 = vcombine.low %v4759_v48, %v4766_v10 }
 0x3b4   : > { %v12902_v12 = vld [vmem:[#allocation11_spill] sm:$0xff] }
 0x3b5   : > { %v4798_v16 = vrot.slane %v4782_v33, %v11595_v45  ;;  %v4791_v34 = vrot.slane %v4781_v25, %v11595_v45  ;;  %v9496_v25 = vld [vmem:[%s12866_s5 + $0x6b0] sm:$0xff]  }
 0x3b6   : > { %8763 = vmatpush3.bf16.msra.mxu0 %v9455_v46  ;;  %8791 = vmatpush3.bf16.msra.mxu1 %v9456_v19  ;;  %v9472_v46 = vld [vmem:[%s12866_s5 + $0x680] sm:$0xff]   ;;  %v4805_v19 = vrot.slane %v4783_v0, %v11595_v45  ;;  %v9477_v45 = vld [vmem:[%s12866_s5 + $0x650] sm:$0xff]  }
 0x3b7   : > { %8764 = vmatprep.subr.bf16.mxu0 %v9457_v29  ;;  %8792 = vmatprep.subr.bf16.mxu1 %v9458_v6  ;;  %v4815_v24 = vcombine.low %v4798_v16, %v4812_v62  ;;  %v4816_v28 = vcombine.high %v4798_v16, %v4812_v62  ;;  %v12897_v29 = vld [vmem:[#allocation10_spill] sm:$0xff]  ;;  %v9481_v62 = vld [vmem:[%s12866_s5 + $0x658] sm:$0xff]  }
 0x3b8   : > { %v4814_v48 = vcombine.high %v4791_v34, %v4805_v19  ;;  %v9484_v16 = vld [vmem:[%s12866_s5 + $0x698] sm:$0xff]   ;;  %v9493_v0 = vld [vmem:[%s12866_s5 + $0x670] sm:$0xff]  }
 0x3b9   : > { %v4874_v41 = vpack.c.bf16 %v4815_v24, %v12896_v53  ;;  %v4876_v6 = vpack.c.bf16 %v4816_v28, %v12897_v29  ;;  %v9494_v24 = vld [vmem:[%s12866_s5 + $0x6f0] sm:$0xff]   ;;  %v9500_v53 = vld [vmem:[%s12866_s5 + $0x6b8] sm:$0xff]   ;;  %v9502_v29 = vld [vmem:[%s12866_s5 + $0x7c0] sm:$0xff]  }
 0x3ba   : > { %8765 = vmatpush3.bf16.msra.mxu0 %v9459_v44  ;;  %8793 = vmatpush3.bf16.msra.mxu1 %v9460_v7  ;;  %v12899_v44 = vpack.c.bf16 %v11796_v26, %v12898_v39  ;;  %v12900_v7 = vld [vmem:[#allocation8_spill] sm:$0xff]  ;;  %v4813_v26 = vcombine.low %v4791_v34, %v4805_v19  ;;  %v9495_v28 = vld [vmem:[%s12866_s5 + $0x630] sm:$0xff]   ;;  %v9499_v19 = vld [vmem:[%s12866_s5 + $0x638] sm:$0xff]   ;;  %v12905_v34 = vpack.c.bf16 %v11913_v3, %v11909_v27 }
 0x3bb   : > { %8766 = vmatprep.subr.bf16.mxu0 %v9461_v56  ;;  %8794 = vmatprep.subr.bf16.mxu1 %v9462_v4  ;;  %v12901_v10 = vpack.c.bf16 %v11798_v20, %v12900_v7  ;;  %v9475_v56 = vld [vmem:[%s12866_s5 + $0x608] sm:$0xff]   ;;  %v9478_v20 = vld [vmem:[%s12866_s5 + $0x6d0] sm:$0xff]  }
 0x3bc   : > { %v9476_v4 = vld [vmem:[%s12866_s5 + $0x688] sm:$0xff]   ;;  %v9509_v27 = vld [vmem:[%s12866_s5 + $0x750] sm:$0xff]  }
 0x3bd   : > { %v9505_v7 = vld [vmem:[%s12866_s5 + $0x748] sm:$0xff]  }
 0x3be   : > { %8767 = vmatpush3.bf16.msra.mxu0 %v9463_v17  ;;  %8795 = vmatpush3.bf16.msra.mxu1 %v9464_v43  ;;  %v4873_v17 = vpack.c.bf16 %v4813_v26, %v12902_v12  ;;  %v12903_v43 = vld [vmem:[#allocation12_spill] sm:$0xff]  ;;  %v9512_v26 = vld [vmem:[%s12866_s5 + $0x790] sm:$0xff]   ;;  %v9522_v12 = vld [vmem:[%s12866_s5 + $0x7e8] sm:$0xff]  }
 0x3bf   : > { %8768 = vmatprep.subr.bf16.mxu0 %v9465_v1  ;;  %8796 = vmatprep.subr.bf16.mxu1 %v9466_v9  ;;  %v4875_v33 = vpack.c.bf16 %v4814_v48, %v12903_v43  ;;  %v9479_v1 = vld [vmem:[%s12866_s5 + $0x610] sm:$0xff]   ;;  %v9513_v48 = vld [vmem:[%s12866_s5 + $0x758] sm:$0xff]  }
 0x3c0   : > { %v9480_v9 = vld [vmem:[%s12866_s5 + $0x690] sm:$0xff]  }
 0x3c2   : > { %8769 = vmatpush3.bf16.msra.mxu0 %v9467_v14  ;;  %8797 = vmatpush3.bf16.msra.mxu1 %v9468_v57  ;;  %v9482_v14 = vld [vmem:[%s12866_s5 + $0x6d8] sm:$0xff]  }
 0x3c3   : > { %8810 = vmatprep.subr.bf16.mxu0 %v9469_v59  ;;  %8838 = vmatprep.subr.bf16.mxu1 %v9470_v49  ;;  %v9483_v57 = vld [vmem:[%s12866_s5 + $0x618] sm:$0xff]   ;;  %v9491_v59 = vld [vmem:[%s12866_s5 + $0x628] sm:$0xff]  }
 0x3c4   : > { %v9492_v49 = vld [vmem:[%s12866_s5 + $0x6a8] sm:$0xff]  }
 0x3c5   : > { %7458 = vmatmul.mubr.bf16.vlgmr.msra.gmra.mrb[168].mxu0 %v12899_v44  ;;  %7507 = vmatmul.mubr.bf16.vlgmr.msra.gmra.mrb[168].mxu1 %v12901_v10  ;;  %v9506_v10 = vld [vmem:[%s12866_s5 + $0x7c8] sm:$0xff]  }
 0x3c6   : > { %7465 = vmatprep.mubr.bf16.mxu0 %v4874_v41  ;;  %7514 = vmatprep.mubr.bf16.mxu1 %v4876_v6  ;;  %v9501_v41 = vld [vmem:[%s12866_s5 + $0x740] sm:$0xff]  }
 0x3c7   : > { %8811 = vmatpush3.bf16.msra.mxu0 %v9471_v30  ;;  %8839 = vmatpush3.bf16.msra.mxu1 %v9472_v46  ;;  %v9497_v30 = vld [vmem:[%s12866_s5 + $0x678] sm:$0xff]   ;;  %v9503_v6 = vld [vmem:[%s12866_s5 + $0x700] sm:$0xff]  }
 0x3c8   : > { %8812 = vmatprep.subr.bf16.mxu0 %v9473_v21  ;;  %8840 = vmatprep.subr.bf16.mxu1 %v9474_v23  ;;  %v9498_v46 = vld [vmem:[%s12866_s5 + $0x6f8] sm:$0xff]   ;;  %v9504_v21 = vld [vmem:[%s12866_s5 + $0x780] sm:$0xff]   ;;  %v12904_v23 = vmov 0.0  }
 0x3c9   : > { %v4878_v39 = vpack.c.bf16 %v12904_v23, %v12203_v60  ;;  %v4880_v44 = vpack.c.bf16 %v12904_v23, %v12205_v50  ;;  %v9507_v60 = vld [vmem:[%s12866_s5 + $0x708] sm:$0xff]   ;;  %v4877_v3 = vpack.c.bf16 %v12904_v23, %v12261_v37  ;;  %v9514_v37 = vld [vmem:[%s12866_s5 + $0x7d8] sm:$0xff]  }
 0x3ca   : > { %v9508_v50 = vld [vmem:[%s12866_s5 + $0x788] sm:$0xff]  }
 0x3cb   : > { %8813 = vmatpush3.bf16.msra.mxu0 %v9475_v56  ;;  %8841 = vmatpush3.bf16.msra.mxu1 %v9476_v4  ;;  %v12906_v56 = vpack.c.bf16 %v11915_v35, %v11911_v52  ;;  %v9510_v52 = vld [vmem:[%s12866_s5 + $0x7d0] sm:$0xff]   ;;  %v4879_v35 = vpack.c.bf16 %v12904_v23, %v12263_v2  ;;  %v9515_v2 = vld [vmem:[%s12866_s5 + $0x718] sm:$0xff]  }
 0x3cc   : > { %8814 = vmatprep.subr.bf16.mxu0 %v9477_v45  ;;  %8842 = vmatprep.subr.bf16.mxu1 %v9478_v20  ;;  %v9511_v4 = vld [vmem:[%s12866_s5 + $0x710] sm:$0xff]   ;;  %v9516_v45 = vld [vmem:[%s12866_s5 + $0x798] sm:$0xff]   ;;  %v9521_v20 = vld [vmem:[%s12866_s5 + $0x768] sm:$0xff]  }
 0x3cd   : > { %7466 = vmatmul.mubr.bf16.gmra.mrb[172].mxu0 %v4873_v17  ;;  %7515 = vmatmul.mubr.bf16.gmra.mrb[172].mxu1 %v4875_v33  ;;  %v5398_v17 = vstv %s5397_s20 }
 0x3ce   : > { %7555 = vmatprep.mubr.bf16.mxu0 %v4846_v8  ;;  %7604 = vmatprep.mubr.bf16.mxu1 %v4848_v32  ;;  %v9489_v8 = vld [vmem:[%s12866_s5 + $0x668] sm:$0xff]  }
 0x3cf   : > { %8815 = vmatpush3.bf16.msra.mxu0 %v9479_v1  ;;  %8843 = vmatpush3.bf16.msra.mxu1 %v9480_v9  ;;  %v9490_v32 = vld [vmem:[%s12866_s5 + $0x6e8] sm:$0xff]  }
 0x3d0   : > { %8816 = vmatprep.subr.bf16.mxu0 %v9481_v62  ;;  %8844 = vmatprep.subr.bf16.mxu1 %v9482_v14 }
 0x3d3   : > { %8817 = vmatpush3.bf16.msra.mxu0 %v9483_v57  ;;  %8845 = vmatpush3.bf16.msra.mxu1 %v9484_v16 }
 0x3d4   : > { %8818 = vmatprep.subr.bf16.mxu0 %v9485_v22  ;;  %8846 = vmatprep.subr.bf16.mxu1 %v9486_v61  ;;  %v9523_v61 = vld [vmem:[%s12866_s5 + $0x728] sm:$0xff]  }
 0x3d7   : > { %8819 = vmatpush3.bf16.msra.mxu0 %v9487_v63  ;;  %8847 = vmatpush3.bf16.msra.mxu1 %v9488_v36  ;;  %v9524_v63 = vld [vmem:[%s12866_s5 + $0x7a8] sm:$0xff]  }
 0x3d8   : > { %8820 = vmatprep.subr.bf16.mxu0 %v9489_v8  ;;  %8848 = vmatprep.subr.bf16.mxu1 %v9490_v32  ;;  %v9525_v32 = vld [vmem:[%s12866_s5 + $0x770] sm:$0xff]  }
 0x3db   : > { %8821 = vmatpush3.bf16.msra.mxu0 %v9491_v59  ;;  %8849 = vmatpush3.bf16.msra.mxu1 %v9492_v49  ;;  %v9526_v59 = vld [vmem:[%s12866_s5 + $0x7f0] sm:$0xff]  }
 0x3dc   : > { %8822 = vmatprep.subr.bf16.mxu0 %v9493_v0  ;;  %8850 = vmatprep.subr.bf16.mxu1 %v9494_v24 }
 0x3df   : > { %8823 = vmatpush3.bf16.msra.mxu0 %v9495_v28  ;;  %8851 = vmatpush3.bf16.msra.mxu1 %v9496_v25  ;;  %v9527_v28 = vld [vmem:[%s12866_s5 + $0x730] sm:$0xff]  }
 0x3e0   : > { %8824 = vmatprep.subr.bf16.mxu0 %v9497_v30  ;;  %8852 = vmatprep.subr.bf16.mxu1 %v9498_v46  ;;  %v9528_v25 = vld [vmem:[%s12866_s5 + $0x7b0] sm:$0xff]  }
 0x3e3   : > { %8825 = vmatpush3.bf16.msra.mxu0 %v9499_v19  ;;  %8853 = vmatpush3.bf16.msra.mxu1 %v9500_v53  ;;  %v9529_v19 = vld [vmem:[%s12866_s5 + $0x778] sm:$0xff]  }
 0x3e4   : > { %8866 = vmatprep.subr.bf16.mxu0 %v9501_v41  ;;  %8894 = vmatprep.subr.bf16.mxu1 %v9502_v29  ;;  %v9530_v53 = vld [vmem:[%s12866_s5 + $0x7f8] sm:$0xff]  }
 0x3e6   : > { %7556 = vmatmul.mubr.bf16.vlgmr.msra.gmra.mrb[176].mxu0 %v12905_v34  ;;  %7605 = vmatmul.mubr.bf16.vlgmr.msra.gmra.mrb[176].mxu1 %v12906_v56  ;;  %v9531_v56 = vld [vmem:[%s12866_s5 + $0x738] sm:$0xff]  }
 0x3e7   : > { %7563 = vmatprep.mubr.bf16.mxu0 %v4878_v39  ;;  %7612 = vmatprep.mubr.bf16.mxu1 %v4880_v44 }
 0x3e8   : > { %8867 = vmatpush3.bf16.msra.mxu0 %v9503_v6  ;;  %8895 = vmatpush3.bf16.msra.mxu1 %v9504_v21 }
 0x3e9   : > { %8868 = vmatprep.subr.bf16.mxu0 %v9505_v7  ;;  %8896 = vmatprep.subr.bf16.mxu1 %v9506_v10 }
 0x3ec   : > { %8869 = vmatpush3.bf16.msra.mxu0 %v9507_v60  ;;  %8897 = vmatpush3.bf16.msra.mxu1 %v9508_v50  ;;  %v9532_v60 = vld [vmem:[%s12866_s5 + $0x7b8] sm:$0xff]  }
 0x3ed   : > { %8870 = vmatprep.subr.bf16.mxu0 %v9509_v27  ;;  %8898 = vmatprep.subr.bf16.mxu1 %v9510_v52 }
 0x3ee   : > { %7564 = vmatmul.mubr.bf16.gmra.mrb[180].mxu0 %v4877_v3  ;;  %7613 = vmatmul.mubr.bf16.gmra.mrb[180].mxu1 %v4879_v35 }
 0x3ef   : > { %7653 = vmatprep.mubr.bf16.mxu0 %v4850_v31  ;;  %7702 = vmatprep.mubr.bf16.mxu1 %v4852_v40 }
 0x3f0   : > { %8871 = vmatpush3.bf16.msra.mxu0 %v9511_v4  ;;  %8899 = vmatpush3.bf16.msra.mxu1 %v9512_v26  ;;  %v4882_v4 = vpack.c.bf16 %v12904_v23, %v12363_v5  ;;  %v4884_v26 = vpack.c.bf16 %v12904_v23, %v12365_v55 }
 0x3f1   : > { %8872 = vmatprep.subr.bf16.mxu0 %v9513_v48  ;;  %8900 = vmatprep.subr.bf16.mxu1 %v9514_v37  ;;  %v12907_v48 = vpack.c.bf16 %v12120_v18, %v12118_v13  ;;  %v12908_v37 = vpack.c.bf16 %v12122_v38, %v12135_v47 }
 0x3f4   : > { %8873 = vmatpush3.bf16.msra.mxu0 %v9515_v2  ;;  %8901 = vmatpush3.bf16.msra.mxu1 %v9516_v45  ;;  %v8490_v31 = vpop.f32.mrb[128].mxu0  ;;  %v8518_v40 = vpop.f32.mrb[128].mxu1  ;;  %v4881_v2 = vpack.c.bf16 %v12904_v23, %v12393_v58  ;;  %v4883_v45 = vpack.c.bf16 %v12904_v23, %v12395_v54 }
 0x3f5   : > { %8874 = vmatprep.subr.bf16.mxu0 %v9517_v15  ;;  %8902 = vmatprep.subr.bf16.mxu1 %v9518_v11  ;;  %v8491_v43 = vpop.f32.mrb[129].mxu0  ;;  %v8519_v33 = vpop.f32.mrb[129].mxu1 }
 0x3f6   : > { %v8492_v1 = vadd.f32 %v8491_v43, %v8490_v31  ;;  %v8520_v9 = vadd.f32 %v8519_v33, %v8518_v40  ;;  %v8493_v62 = vpop.f32.mrb[130].mxu0  ;;  %v8521_v14 = vpop.f32.mrb[130].mxu1 }
 0x3f7   : > { %v8494_v57 = vpop.f32.mrb[131].mxu0  ;;  %v8522_v16 = vpop.f32.mrb[131].mxu1 }
 0x3f8   : > { %8875 = vmatpush3.bf16.msra.mxu0 %v9519_v42  ;;  %8903 = vmatpush3.bf16.msra.mxu1 %v9520_v51  ;;  %v6970_v22 = vadd.f32 %v8492_v1, %v5398_v17  ;;  %v8495_v36 = vadd.f32 %v8494_v57, %v8493_v62  ;;  %v8523_v8 = vadd.f32 %v8522_v16, %v8521_v14 }
 0x3f9   : > { %8876 = vmatprep.subr.bf16.mxu0 %v9521_v20  ;;  %8904 = vmatprep.subr.bf16.mxu1 %v9522_v12 }
 0x3fa   : > { %v7019_v49 = vadd.f32 %v8520_v9, %v6970_v22  ;;  %v6973_v0 = vadd.f32 %v8495_v36, %v5398_v17 }
 0x3fc   : > { %8877 = vmatpush3.bf16.msra.mxu0 %v9523_v61  ;;  %8905 = vmatpush3.bf16.msra.mxu1 %v9524_v63  ;;  %v7022_v24 = vadd.f32 %v8523_v8, %v6973_v0  ;;  %v8496_v30 = vpop.f32.mrb[132].mxu0  ;;  %v8524_v46 = vpop.f32.mrb[132].mxu1 }
 0x3fd   : > { %8878 = vmatprep.subr.bf16.mxu0 %v9525_v32  ;;  %8906 = vmatprep.subr.bf16.mxu1 %v9526_v59  ;;  %v8497_v41 = vpop.f32.mrb[133].mxu0  ;;  %v8525_v29 = vpop.f32.mrb[133].mxu1 }
 0x3fe   : > { %v8498_v6 = vadd.f32 %v8497_v41, %v8496_v30  ;;  %v8526_v21 = vadd.f32 %v8525_v29, %v8524_v46  ;;  %v8499_v39 = vpop.f32.mrb[134].mxu0  ;;  %v8527_v44 = vpop.f32.mrb[134].mxu1 }
 0x3ff   : > { %v8500_v7 = vpop.f32.mrb[135].mxu0  ;;  %v8528_v10 = vpop.f32.mrb[135].mxu1 }
 0x400   : > { %8879 = vmatpush3.bf16.msra.mxu0 %v9527_v28  ;;  %8907 = vmatpush3.bf16.msra.mxu1 %v9528_v25  ;;  %v6978_v34 = vadd.f32 %v8498_v6, %v5398_v17  ;;  %v8501_v50 = vadd.f32 %v8500_v7, %v8499_v39  ;;  %v8529_v27 = vadd.f32 %v8528_v10, %v8527_v44 }
 0x401   : > { %8880 = vmatprep.subr.bf16.mxu0 %v9529_v19  ;;  %8908 = vmatprep.subr.bf16.mxu1 %v9530_v53 }
 0x402   : > { %v7027_v52 = vadd.f32 %v8526_v21, %v6978_v34  ;;  %v6981_v3 = vadd.f32 %v8501_v50, %v5398_v17 }
 0x404   : > { %8881 = vmatpush3.bf16.msra.mxu0 %v9531_v56  ;;  %8909 = vmatpush3.bf16.msra.mxu1 %v9532_v60  ;;  %v7030_v35 = vadd.f32 %v8529_v27, %v6981_v3 }
 0x407   : > { %7654 = vmatmul.mubr.bf16.vlgmr.msra.gmra.mrb[184].mxu0 %v12907_v48  ;;  %7703 = vmatmul.mubr.bf16.vlgmr.msra.gmra.mrb[184].mxu1 %v12908_v37 }
 0x408   : > { %7661 = vmatprep.mubr.bf16.mxu0 %v4882_v4  ;;  %7710 = vmatprep.mubr.bf16.mxu1 %v4884_v26 }
 0x40f   : > { %7662 = vmatmul.mubr.bf16.gmra.mrb[188].mxu0 %v4881_v2  ;;  %7711 = vmatmul.mubr.bf16.gmra.mrb[188].mxu1 %v4883_v45 }
 0x414   : > { %v8546_v5 = vpop.f32.mrb[136].mxu0  ;;  %v8574_v55 = vpop.f32.mrb[136].mxu1 }
 0x415   : > { %v8547_v15 = vpop.f32.mrb[137].mxu0  ;;  %v8575_v11 = vpop.f32.mrb[137].mxu1 }
 0x416   : > { %v8548_v13 = vadd.f32 %v8547_v15, %v8546_v5  ;;  %v8576_v18 = vadd.f32 %v8575_v11, %v8574_v55  ;;  %v8549_v42 = vpop.f32.mrb[138].mxu0  ;;  %v8577_v51 = vpop.f32.mrb[138].mxu1 }
 0x417   : > { %v8550_v38 = vpop.f32.mrb[139].mxu0  ;;  %v8578_v47 = vpop.f32.mrb[139].mxu1 }
 0x418   : > { %v7068_v31 = vadd.f32 %v8548_v13, %v7019_v49  ;;  %v8551_v40 = vadd.f32 %v8550_v38, %v8549_v42  ;;  %v8579_v20 = vadd.f32 %v8578_v47, %v8577_v51 }
 0x41a   : > { %v7117_v12 = vadd.f32 %v8576_v18, %v7068_v31  ;;  %v7071_v58 = vadd.f32 %v8551_v40, %v7022_v24 }
 0x41c   : > { %v7120_v17 = vadd.f32 %v8579_v20, %v7071_v58  ;;  %v8552_v43 = vpop.f32.mrb[140].mxu0  ;;  %v8580_v54 = vpop.f32.mrb[140].mxu1 }
 0x41d   : > { %v8553_v23 = vpop.f32.mrb[141].mxu0  ;;  %v8581_v33 = vpop.f32.mrb[141].mxu1 }
 0x41e   : > { %v8554_v1 = vadd.f32 %v8553_v23, %v8552_v43  ;;  %v8582_v9 = vadd.f32 %v8581_v33, %v8580_v54  ;;  %v8555_v62 = vpop.f32.mrb[142].mxu0  ;;  %v8583_v14 = vpop.f32.mrb[142].mxu1 }
 0x41f   : > { %v8556_v57 = vpop.f32.mrb[143].mxu0  ;;  %v8584_v16 = vpop.f32.mrb[143].mxu1 }
 0x420   : > { %v7076_v22 = vadd.f32 %v8554_v1, %v7027_v52  ;;  %v8557_v61 = vadd.f32 %v8556_v57, %v8555_v62  ;;  %v8585_v63 = vadd.f32 %v8584_v16, %v8583_v14 }
 0x422   : > { %v7125_v36 = vadd.f32 %v8582_v9, %v7076_v22  ;;  %v7079_v8 = vadd.f32 %v8557_v61, %v7030_v35 }
 0x424   : > { %v7128_v32 = vadd.f32 %v8585_v63, %v7079_v8 }
 0x435   : > { %v8602_v59 = vpop.f32.mrb[144].mxu0  ;;  %v8630_v49 = vpop.f32.mrb[144].mxu1 }
 0x436   : > { %v8603_v0 = vpop.f32.mrb[145].mxu0  ;;  %v8631_v24 = vpop.f32.mrb[145].mxu1 }
 0x437   : > { %v8604_v28 = vadd.f32 %v8603_v0, %v8602_v59  ;;  %v8632_v25 = vadd.f32 %v8631_v24, %v8630_v49  ;;  %v8605_v30 = vpop.f32.mrb[146].mxu0  ;;  %v8633_v46 = vpop.f32.mrb[146].mxu1 }
 0x438   : > { %v8606_v19 = vpop.f32.mrb[147].mxu0  ;;  %v8634_v53 = vpop.f32.mrb[147].mxu1 }
 0x439   : > { %v7166_v41 = vadd.f32 %v8604_v28, %v7117_v12  ;;  %v8607_v29 = vadd.f32 %v8606_v19, %v8605_v30  ;;  %v8635_v6 = vadd.f32 %v8634_v53, %v8633_v46 }
 0x43b   : > { %v7215_v21 = vadd.f32 %v8632_v25, %v7166_v41  ;;  %v7169_v39 = vadd.f32 %v8607_v29, %v7120_v17 }
 0x43d   : > { %v7218_v44 = vadd.f32 %v8635_v6, %v7169_v39  ;;  %v8608_v7 = vpop.f32.mrb[148].mxu0  ;;  %v8636_v10 = vpop.f32.mrb[148].mxu1 }
 0x43e   : > { %v8609_v34 = vpop.f32.mrb[149].mxu0  ;;  %v8637_v56 = vpop.f32.mrb[149].mxu1 }
 0x43f   : > { %v8610_v60 = vadd.f32 %v8609_v34, %v8608_v7  ;;  %v8638_v50 = vadd.f32 %v8637_v56, %v8636_v10  ;;  %v8611_v27 = vpop.f32.mrb[150].mxu0  ;;  %v8639_v52 = vpop.f32.mrb[150].mxu1 }
 0x440   : > { %v8612_v3 = vpop.f32.mrb[151].mxu0  ;;  %v8640_v35 = vpop.f32.mrb[151].mxu1 }
 0x441   : > { %v7174_v4 = vadd.f32 %v8610_v60, %v7125_v36  ;;  %v8613_v26 = vadd.f32 %v8612_v3, %v8611_v27  ;;  %v8641_v48 = vadd.f32 %v8640_v35, %v8639_v52 }
 0x443   : > { %v7223_v37 = vadd.f32 %v8638_v50, %v7174_v4  ;;  %v7177_v2 = vadd.f32 %v8613_v26, %v7128_v32 }
 0x445   : > { %v7226_v45 = vadd.f32 %v8641_v48, %v7177_v2 }
 0x456   : > { %v8658_v5 = vpop.f32.mrb[152].mxu0  ;;  %v8686_v55 = vpop.f32.mrb[152].mxu1 }
 0x457   : > { %v8659_v15 = vpop.f32.mrb[153].mxu0  ;;  %v8687_v11 = vpop.f32.mrb[153].mxu1 }
 0x458   : > { %v8660_v13 = vadd.f32 %v8659_v15, %v8658_v5  ;;  %v8688_v18 = vadd.f32 %v8687_v11, %v8686_v55  ;;  %v8661_v42 = vpop.f32.mrb[154].mxu0  ;;  %v8689_v51 = vpop.f32.mrb[154].mxu1 }
 0x459   : > { %v8662_v38 = vpop.f32.mrb[155].mxu0  ;;  %v8690_v47 = vpop.f32.mrb[155].mxu1 }
 0x45a   : > { %v7264_v31 = vadd.f32 %v8660_v13, %v7215_v21  ;;  %v8663_v40 = vadd.f32 %v8662_v38, %v8661_v42  ;;  %v8691_v20 = vadd.f32 %v8690_v47, %v8689_v51 }
 0x45c   : > { %v7313_v12 = vadd.f32 %v8688_v18, %v7264_v31  ;;  %v7267_v58 = vadd.f32 %v8663_v40, %v7218_v44 }
 0x45e   : > { %v7316_v17 = vadd.f32 %v8691_v20, %v7267_v58  ;;  %v8664_v43 = vpop.f32.mrb[156].mxu0  ;;  %v8692_v54 = vpop.f32.mrb[156].mxu1 }
 0x45f   : > { %v8665_v23 = vpop.f32.mrb[157].mxu0  ;;  %v8693_v33 = vpop.f32.mrb[157].mxu1 }
 0x460   : > { %v8666_v1 = vadd.f32 %v8665_v23, %v8664_v43  ;;  %v8694_v9 = vadd.f32 %v8693_v33, %v8692_v54  ;;  %v8667_v62 = vpop.f32.mrb[158].mxu0  ;;  %v8695_v14 = vpop.f32.mrb[158].mxu1 }
 0x461   : > { %v8668_v57 = vpop.f32.mrb[159].mxu0  ;;  %v8696_v16 = vpop.f32.mrb[159].mxu1 }
 0x462   : > { %v7272_v22 = vadd.f32 %v8666_v1, %v7223_v37  ;;  %v8669_v61 = vadd.f32 %v8668_v57, %v8667_v62  ;;  %v8697_v63 = vadd.f32 %v8696_v16, %v8695_v14 }
 0x464   : > { %v7321_v36 = vadd.f32 %v8694_v9, %v7272_v22  ;;  %v7275_v8 = vadd.f32 %v8669_v61, %v7226_v45 }
 0x466   : > { %v7324_v32 = vadd.f32 %v8697_v63, %v7275_v8 }
 0x477   : > { %v8714_v59 = vpop.f32.mrb[160].mxu0  ;;  %v8742_v49 = vpop.f32.mrb[160].mxu1 }
 0x478   : > { %v8715_v0 = vpop.f32.mrb[161].mxu0  ;;  %v8743_v24 = vpop.f32.mrb[161].mxu1 }
 0x479   : > { %v8716_v28 = vadd.f32 %v8715_v0, %v8714_v59  ;;  %v8744_v25 = vadd.f32 %v8743_v24, %v8742_v49  ;;  %v8717_v30 = vpop.f32.mrb[162].mxu0  ;;  %v8745_v46 = vpop.f32.mrb[162].mxu1 }
 0x47a   : > { %v8718_v19 = vpop.f32.mrb[163].mxu0  ;;  %v8746_v53 = vpop.f32.mrb[163].mxu1 }
 0x47b   : > { %v7362_v41 = vadd.f32 %v8716_v28, %v7313_v12  ;;  %v8719_v29 = vadd.f32 %v8718_v19, %v8717_v30  ;;  %v8747_v6 = vadd.f32 %v8746_v53, %v8745_v46 }
 0x47d   : > { %v7411_v21 = vadd.f32 %v8744_v25, %v7362_v41  ;;  %v7365_v39 = vadd.f32 %v8719_v29, %v7316_v17 }
 0x47f   : > { %v7414_v44 = vadd.f32 %v8747_v6, %v7365_v39  ;;  %v8720_v7 = vpop.f32.mrb[164].mxu0  ;;  %v8748_v10 = vpop.f32.mrb[164].mxu1 }
 0x480   : > { %v8721_v34 = vpop.f32.mrb[165].mxu0  ;;  %v8749_v56 = vpop.f32.mrb[165].mxu1 }
 0x481   : > { %v8722_v60 = vadd.f32 %v8721_v34, %v8720_v7  ;;  %v8750_v50 = vadd.f32 %v8749_v56, %v8748_v10  ;;  %v8723_v27 = vpop.f32.mrb[166].mxu0  ;;  %v8751_v52 = vpop.f32.mrb[166].mxu1 }
 0x482   : > { %v8724_v3 = vpop.f32.mrb[167].mxu0  ;;  %v8752_v35 = vpop.f32.mrb[167].mxu1 }
 0x483   : > { %v7370_v4 = vadd.f32 %v8722_v60, %v7321_v36  ;;  %v8725_v26 = vadd.f32 %v8724_v3, %v8723_v27  ;;  %v8753_v48 = vadd.f32 %v8752_v35, %v8751_v52 }
 0x485   : > { %v7419_v37 = vadd.f32 %v8750_v50, %v7370_v4  ;;  %v7373_v2 = vadd.f32 %v8725_v26, %v7324_v32 }
 0x487   : > { %v7422_v45 = vadd.f32 %v8753_v48, %v7373_v2 }
 0x498   : > { %v8770_v5 = vpop.f32.mrb[168].mxu0  ;;  %v8798_v55 = vpop.f32.mrb[168].mxu1 }
 0x499   : > { %v8771_v15 = vpop.f32.mrb[169].mxu0  ;;  %v8799_v11 = vpop.f32.mrb[169].mxu1 }
 0x49a   : > { %v8772_v13 = vadd.f32 %v8771_v15, %v8770_v5  ;;  %v8800_v18 = vadd.f32 %v8799_v11, %v8798_v55  ;;  %v8773_v42 = vpop.f32.mrb[170].mxu0  ;;  %v8801_v51 = vpop.f32.mrb[170].mxu1 }
 0x49b   : > { %v8774_v38 = vpop.f32.mrb[171].mxu0  ;;  %v8802_v47 = vpop.f32.mrb[171].mxu1 }
 0x49c   : > { %v7460_v31 = vadd.f32 %v8772_v13, %v7411_v21  ;;  %v8775_v40 = vadd.f32 %v8774_v38, %v8773_v42  ;;  %v8803_v20 = vadd.f32 %v8802_v47, %v8801_v51 }
 0x49e   : > { %v7509_v12 = vadd.f32 %v8800_v18, %v7460_v31  ;;  %v7463_v58 = vadd.f32 %v8775_v40, %v7414_v44 }
 0x4a0   : > { %v7512_v17 = vadd.f32 %v8803_v20, %v7463_v58  ;;  %v8776_v43 = vpop.f32.mrb[172].mxu0  ;;  %v8804_v54 = vpop.f32.mrb[172].mxu1 }
 0x4a1   : > { %v8777_v23 = vpop.f32.mrb[173].mxu0  ;;  %v8805_v33 = vpop.f32.mrb[173].mxu1 }
 0x4a2   : > { %v8778_v1 = vadd.f32 %v8777_v23, %v8776_v43  ;;  %v8806_v9 = vadd.f32 %v8805_v33, %v8804_v54  ;;  %v8779_v62 = vpop.f32.mrb[174].mxu0  ;;  %v8807_v14 = vpop.f32.mrb[174].mxu1 }
 0x4a3   : > { %v8780_v57 = vpop.f32.mrb[175].mxu0  ;;  %v8808_v16 = vpop.f32.mrb[175].mxu1 }
 0x4a4   : > { %v7468_v22 = vadd.f32 %v8778_v1, %v7419_v37  ;;  %v8781_v61 = vadd.f32 %v8780_v57, %v8779_v62  ;;  %v8809_v63 = vadd.f32 %v8808_v16, %v8807_v14 }
 0x4a6   : > { %v7517_v36 = vadd.f32 %v8806_v9, %v7468_v22  ;;  %v7471_v8 = vadd.f32 %v8781_v61, %v7422_v45 }
 0x4a8   : > { %v7520_v32 = vadd.f32 %v8809_v63, %v7471_v8 }
 0x4b9   : > { %v8826_v59 = vpop.f32.mrb[176].mxu0  ;;  %v8854_v49 = vpop.f32.mrb[176].mxu1 }
 0x4ba   : > { %v8827_v0 = vpop.f32.mrb[177].mxu0  ;;  %v8855_v24 = vpop.f32.mrb[177].mxu1 }
 0x4bb   : > { %v8828_v28 = vadd.f32 %v8827_v0, %v8826_v59  ;;  %v8856_v25 = vadd.f32 %v8855_v24, %v8854_v49  ;;  %v8829_v30 = vpop.f32.mrb[178].mxu0  ;;  %v8857_v46 = vpop.f32.mrb[178].mxu1 }
 0x4bc   : > { %v8830_v19 = vpop.f32.mrb[179].mxu0  ;;  %v8858_v53 = vpop.f32.mrb[179].mxu1 }
 0x4bd   : > { %v7558_v41 = vadd.f32 %v8828_v28, %v7509_v12  ;;  %v8831_v29 = vadd.f32 %v8830_v19, %v8829_v30  ;;  %v8859_v6 = vadd.f32 %v8858_v53, %v8857_v46 }
 0x4bf   : > { %v7607_v21 = vadd.f32 %v8856_v25, %v7558_v41  ;;  %v7561_v39 = vadd.f32 %v8831_v29, %v7512_v17 }
 0x4c1   : > { %v7610_v44 = vadd.f32 %v8859_v6, %v7561_v39  ;;  %v8832_v7 = vpop.f32.mrb[180].mxu0  ;;  %v8860_v10 = vpop.f32.mrb[180].mxu1 }
 0x4c2   : > { %v8833_v34 = vpop.f32.mrb[181].mxu0  ;;  %v8861_v56 = vpop.f32.mrb[181].mxu1 }
 0x4c3   : > { %v8834_v60 = vadd.f32 %v8833_v34, %v8832_v7  ;;  %v8862_v50 = vadd.f32 %v8861_v56, %v8860_v10  ;;  %v8835_v27 = vpop.f32.mrb[182].mxu0  ;;  %v8863_v52 = vpop.f32.mrb[182].mxu1 }
 0x4c4   : > { %v8836_v3 = vpop.f32.mrb[183].mxu0  ;;  %v8864_v35 = vpop.f32.mrb[183].mxu1 }
 0x4c5   : > { %v7566_v4 = vadd.f32 %v8834_v60, %v7517_v36  ;;  %v8837_v26 = vadd.f32 %v8836_v3, %v8835_v27  ;;  %v8865_v48 = vadd.f32 %v8864_v35, %v8863_v52 }
 0x4c7   : > { %v7615_v37 = vadd.f32 %v8862_v50, %v7566_v4  ;;  %v7569_v2 = vadd.f32 %v8837_v26, %v7520_v32 }
 0x4c9   : > { %v7618_v45 = vadd.f32 %v8865_v48, %v7569_v2 }
 0x4da   : > { %v8882_v5 = vpop.f32.mrb[184].mxu0  ;;  %v8910_v55 = vpop.f32.mrb[184].mxu1 }
 0x4db   : > { %v8883_v15 = vpop.f32.mrb[185].mxu0  ;;  %v8911_v11 = vpop.f32.mrb[185].mxu1 }
 0x4dc   : > { %v8884_v13 = vadd.f32 %v8883_v15, %v8882_v5  ;;  %v8912_v18 = vadd.f32 %v8911_v11, %v8910_v55  ;;  %v8885_v42 = vpop.f32.mrb[186].mxu0  ;;  %v8913_v51 = vpop.f32.mrb[186].mxu1 }
 0x4dd   : > { %v8886_v38 = vpop.f32.mrb[187].mxu0  ;;  %v8914_v47 = vpop.f32.mrb[187].mxu1 }
 0x4de   : > { %v7656_v31 = vadd.f32 %v8884_v13, %v7607_v21  ;;  %v8887_v40 = vadd.f32 %v8886_v38, %v8885_v42  ;;  %v8915_v20 = vadd.f32 %v8914_v47, %v8913_v51 }
 0x4e0   : > { %v7705_v12 = vadd.f32 %v8912_v18, %v7656_v31  ;;  %v7659_v58 = vadd.f32 %v8887_v40, %v7610_v44 }
 0x4e2   : > { %v7708_v17 = vadd.f32 %v8915_v20, %v7659_v58  ;;  %v8888_v43 = vpop.f32.mrb[188].mxu0  ;;  %v8916_v54 = vpop.f32.mrb[188].mxu1  ;;  %v7719_v0 = vmax.f32 %v7705_v12, 0.0 }
 0x4e3   : > { %v8889_v23 = vpop.f32.mrb[189].mxu0  ;;  %v8917_v33 = vpop.f32.mrb[189].mxu1 }
 0x4e4   : > { %v7720_v1 = vmax.f32 %v7708_v17, 0.0  ;;  %v8890_v9 = vadd.f32 %v8889_v23, %v8888_v43  ;;  %v8918_v62 = vadd.f32 %v8917_v33, %v8916_v54  ;;  %v8891_v14 = vpop.f32.mrb[190].mxu0  ;;  %v8919_v57 = vpop.f32.mrb[190].mxu1 }
 0x4e5   : > { %v8892_v16 = vpop.f32.mrb[191].mxu0  ;;  %v8920_v22 = vpop.f32.mrb[191].mxu1 }
 0x4e6   : > { %v7664_v61 = vadd.f32 %v8890_v9, %v7615_v37  ;;  %v8893_v63 = vadd.f32 %v8892_v16, %v8891_v14  ;;  %v8921_v36 = vadd.f32 %v8920_v22, %v8919_v57  ;;  %7724 = vrot.lane.b32.xlu0 %v7720_v1, %s9557_s23 }
 0x4e8   : > { %v7713_v8 = vadd.f32 %v8918_v62, %v7664_v61  ;;  %v7667_v32 = vadd.f32 %v8893_v63, %v7618_v45 }
 0x4ea   : > { %v7716_v59 = vadd.f32 %v8921_v36, %v7667_v32  ;;  %v7721_v25 = vmax.f32 %v7713_v8, 0.0 }
 0x4ec   : > { %v7722_v49 = vmax.f32 %v7716_v59, 0.0 }
 0x4ee   : > { %7728 = vrot.lane.b32.xlu1 %v7722_v49, %s9557_s23 }
 0x558   : > { %v7725_v24 = vpop.permute.xlu0 %7724 }
 0x559   : > { %v7731_v28 = vsel %vm1124_vm12, %v7719_v0, %v7725_v24 }
 0x55a   : > { %7733 = vst [vmem:[%s284_s17] sm:$0xff] %v7731_v28 }
 0x560   : > { %v7729_v30 = vpop.permute.xlu1 %7728 }
 0x561   : > { %v7732_v46 = vsel %vm1124_vm12, %v7721_v25, %v7729_v30 }
 0x562   : > { %7734 = vst [vmem:[%s284_s17 + $0x8] sm:$0xff] %v7732_v46 }
 0x563 PF: > { %s18_s26 = sadd.s32 1, %s9555_s26  }
 0x564   : > { %p15_p5 = scmp.ge.s32.totalorder %s18_s26, 4  }
 0x566   :  { %17 = sbr.rel (!%p15_p5) target bundleno = 2 (0x2), region = 205 }

</bundles_post_ra>
